<compile_context>
chip_gen: v6e
topology: v6e:2x2x1
jax: 0.10.0
libtpu: 0.0.40
codegen_flags: <defaults>
</compile_context>

<pallas_src>
import jax
import jax.numpy as jnp
from jax import lax
from jax.experimental import pallas as pl

# ----------------------- small, TPU-friendly config -----------------------
IMG = 32          # img_size
PATCH = 8         # patch_size
IN_CH = 3         # in_chans
EMBED = 64        # embed_dim
DEPTH = 2         # depth
HEADS = 4         # num_heads
MLP_RATIO = 4.0
PRETRAIN_IMG = 32 # pretrain_img_size (so pos-embed resize is identity here)
B = 2

HP = IMG // PATCH
WP = IMG // PATCH
N = HP * WP                       # 16 tokens
BN = B * N                        # 32 rows in the fused token slab
HEAD_DIM = EMBED // HEADS         # 16
HIDDEN = int(EMBED * MLP_RATIO)   # 256
PATCH_VEC = IN_CH * PATCH * PATCH # 192
LN_EPS = 1e-5                     # nn.LayerNorm default


# ----------------------------- in-kernel math ------------------------------
def _erf(x):
    # Abramowitz & Stegun 7.1.26 polynomial erf (|abs err| < 1.5e-7); uses only exp so
    # it lowers cleanly in Mosaic and matches torch exact-erf GELU at fp32 precision.
    a1, a2, a3, a4, a5 = 0.254829592, -0.284496736, 1.421413741, -1.453152027, 1.061405429
    p = 0.3275911
    sgn = jnp.where(x >= 0.0, 1.0, -1.0)
    ax = jnp.abs(x)
    t = 1.0 / (1.0 + p * ax)
    poly = ((((a5 * t + a4) * t + a3) * t + a2) * t + a1) * t
    return sgn * (1.0 - poly * jnp.exp(-ax * ax))


def _gelu(x):
    return 0.5 * x * (1.0 + _erf(x * (2.0 ** -0.5)))


def _layernorm(x, w, b):
    mu = jnp.mean(x, axis=-1, keepdims=True)
    var = jnp.mean(jnp.square(x - mu), axis=-1, keepdims=True)
    return (x - mu) * lax.rsqrt(var + LN_EPS) * w + b


def _bf16(x):
    return x.astype(jnp.bfloat16)


# ------------------------------ fused kernel --------------------------------
def vit_fused_kernel(xp_ref, posb_ref, pw_ref,
                     ln1w_ref, ln1b_ref, qkvw_ref, qkvb_ref,
                     projw_ref, projb_ref, ln2w_ref, ln2b_ref,
                     fc1w_ref, fc1b_ref, fc2w_ref, fc2b_ref,
                     nw_ref, nb_ref, out_ref):
    # ---- patch embed (+ absolute pos embed, conv-bias folded into posb) ----
    x = jnp.dot(_bf16(xp_ref[...]), pw_ref[...],
                preferred_element_type=jnp.float32) + posb_ref[...]        # (BN, C) f32

    # ---- transformer blocks (static unroll; all weights resident in VMEM) ----
    for d in range(DEPTH):
        # ---- attention branch ----
        h = _layernorm(x, ln1w_ref[d], ln1b_ref[d])
        # 1/sqrt(head_dim) already folded into the Q columns of qkvw / qkvb.
        qkv = jnp.dot(_bf16(h), qkvw_ref[d],
                      preferred_element_type=jnp.float32) + qkvb_ref[d]    # (BN, 3C)

        proj_wd = projw_ref[d]                                             # (C, C) bf16
        attn = jnp.zeros((BN, EMBED), jnp.float32)
        for hd in range(HEADS):                                            # static unroll
            lo = hd * HEAD_DIM
            # lane slices of qkv; reshape only splits the leading (row) axis.
            q = qkv[:, lo:lo + HEAD_DIM].reshape(B, N, HEAD_DIM)
            k = qkv[:, EMBED + lo:EMBED + lo + HEAD_DIM].reshape(B, N, HEAD_DIM)
            v = qkv[:, 2 * EMBED + lo:2 * EMBED + lo + HEAD_DIM].reshape(B, N, HEAD_DIM)
            # one B-batched contraction per head (batch tokens never mix).
            s = lax.dot_general(_bf16(q), _bf16(k),
                                (((2,), (2,)), ((0,), (0,))),
                                preferred_element_type=jnp.float32)        # (B, N, N)
            s = s - jnp.max(s, axis=-1, keepdims=True)
            p = jnp.exp(s)
            p = p * pl.reciprocal(jnp.sum(p, axis=-1, keepdims=True), approx=True)
            o = lax.dot_general(_bf16(p), _bf16(v),
                                (((2,), (1,)), ((0,), (0,))),
                                preferred_element_type=jnp.float32)        # (B, N, D)
            # fold concat+proj into per-head partial projections (no concatenate).
            attn = attn + jnp.dot(_bf16(o.reshape(BN, HEAD_DIM)),
                                  proj_wd[lo:lo + HEAD_DIM, :],
                                  preferred_element_type=jnp.float32)
        x = x + attn + projb_ref[d]            # residual (drop_path = identity)

        # ---- MLP branch ----
        h2 = _layernorm(x, ln2w_ref[d], ln2b_ref[d])
        h2 = jnp.dot(_bf16(h2), fc1w_ref[d],
                     preferred_element_type=jnp.float32) + fc1b_ref[d]
        h2 = _gelu(h2)
        h2 = jnp.dot(_bf16(h2), fc2w_ref[d],
                     preferred_element_type=jnp.float32) + fc2b_ref[d]
        x = x + h2

    # ---- final LayerNorm (norm_post=True) ----
    out_ref[...] = _layernorm(x, nw_ref[...], nb_ref[...])


# ------------------------------- glue (plain JAX) ---------------------------
def resize_pos_embed(pos_embed):
    # pos_embed: (1, num_positions, C) with a leading cls token (pretrain_use_cls_token=True)
    s = PRETRAIN_IMG // PATCH
    p = pos_embed[:, 1:, :].reshape(1, s, s, EMBED)
    if (s, s) != (HP, WP):
        p = jax.image.resize(p, (1, HP, WP, EMBED), method="bicubic")
    return p.reshape(N, EMBED).astype(jnp.float32)


def vit_forward(x_img, params):
    # Patch embedding: stride==kernel conv == non-overlapping patch extraction + matmul.
    xp = (x_img.reshape(B, IN_CH, HP, PATCH, WP, PATCH)
               .transpose(0, 2, 4, 1, 3, 5)              # (B, Hp, Wp, Cin, ph, pw)
               .reshape(BN, PATCH_VEC))
    pos = resize_pos_embed(params["pos_embed"])                           # (N, C)
    posb = jnp.tile(pos + params["patch_b"], (B, 1))                      # (B*N, C)

    out_flat = pl.pallas_call(
        vit_fused_kernel,
        out_shape=jax.ShapeDtypeStruct((BN, EMBED), jnp.float32),
    )(xp, posb, params["patch_w"],
      params["ln1_w"], params["ln1_b"], params["qkv_w"], params["qkv_b"],
      params["proj_w"], params["proj_b"], params["ln2_w"], params["ln2_b"],
      params["fc1_w"], params["fc1_b"], params["fc2_w"], params["fc2_b"],
      params["norm_w"], params["norm_b"])

    # (B*N, C) -> (B, Hp, Wp, C) -> NCHW feature map
    return out_flat.reshape(B, HP, WP, EMBED).transpose(0, 3, 1, 2)


# ----------------------------- parameter init -------------------------------
def init_params(key):
    keys = iter(jax.random.split(key, 2 + DEPTH * 4))

    def tn(shape, std=0.02):  # trunc_normal_(std=0.02), clipped at +/- 2 std
        return (std * jax.random.truncated_normal(next(keys), -2.0, 2.0, shape)).astype(jnp.float32)

    params = {}
    # PatchEmbed conv weight (E, Cin, ph, pw) -> flattened & transposed matmul weight.
    conv_w = tn((EMBED, IN_CH, PATCH, PATCH))
    params["patch_w"] = conv_w.reshape(EMBED, PATCH_VEC).T.astype(jnp.bfloat16)  # (PATCH_VEC, E)
    params["patch_b"] = jnp.zeros((1, EMBED), jnp.float32)
    # absolute pos embed (with cls token slot)
    num_positions = (PRETRAIN_IMG // PATCH) ** 2 + 1
    params["pos_embed"] = tn((1, num_positions, EMBED))

    scale = HEAD_DIM ** -0.5
    names = ("ln1_w", "ln1_b", "qkv_w", "qkv_b", "proj_w", "proj_b",
             "ln2_w", "ln2_b", "fc1_w", "fc1_b", "fc2_w", "fc2_b")
    stacks = {n: [] for n in names}
    for _ in range(DEPTH):
        stacks["ln1_w"].append(jnp.ones((1, EMBED), jnp.float32))
        stacks["ln1_b"].append(jnp.zeros((1, EMBED), jnp.float32))
        qw = tn((3 * EMBED, EMBED)).T                       # (C, 3C), x @ W^T
        qb = jnp.zeros((1, 3 * EMBED), jnp.float32)
        # fold attention scale into the Q part (one-time host-side transform)
        qw = qw.at[:, :EMBED].multiply(scale)
        qb = qb.at[:, :EMBED].multiply(scale)
        stacks["qkv_w"].append(qw.astype(jnp.bfloat16))
        stacks["qkv_b"].append(qb)
        stacks["proj_w"].append(tn((EMBED, EMBED)).T.astype(jnp.bfloat16))   # (C, C)
        stacks["proj_b"].append(jnp.zeros((1, EMBED), jnp.float32))
        stacks["ln2_w"].append(jnp.ones((1, EMBED), jnp.float32))
        stacks["ln2_b"].append(jnp.zeros((1, EMBED), jnp.float32))
        stacks["fc1_w"].append(tn((HIDDEN, EMBED)).T.astype(jnp.bfloat16))   # (C, 4C)
        stacks["fc1_b"].append(jnp.zeros((1, HIDDEN), jnp.float32))
        stacks["fc2_w"].append(tn((EMBED, HIDDEN)).T.astype(jnp.bfloat16))   # (4C, C)
        stacks["fc2_b"].append(jnp.zeros((1, EMBED), jnp.float32))
    for n in names:
        params[n] = jnp.stack(stacks[n])        # leading DEPTH axis
    params["norm_w"] = jnp.ones((1, EMBED), jnp.float32)
    params["norm_b"] = jnp.zeros((1, EMBED), jnp.float32)
    return params


# ----------------------------------- main -----------------------------------
if __name__ == "__main__":
    key = jax.random.PRNGKey(0)
    pkey, xkey = jax.random.split(key)
    params = init_params(pkey)
    x_img = jax.random.normal(xkey, (B, IN_CH, IMG, IMG), dtype=jnp.float32)

    out = jax.jit(lambda x: vit_forward(x, params))(x_img)
    jax.block_until_ready(out)
    assert out.shape == (B, EMBED, HP, WP), out.shape
    assert out.dtype == jnp.float32
    print("KERNEL_OK")
</pallas_src>

<mosaic_0001>
module attributes {stable_mosaic.version = 11 : i64} {
  func.func @vit_fused_kernel(%arg0: memref<32x192xf32, #tpu.memory_space<vmem>>, %arg1: memref<32x64xf32, #tpu.memory_space<vmem>>, %arg2: memref<192x64xbf16, #tpu.memory_space<vmem>>, %arg3: memref<2x1x64xf32, #tpu.memory_space<vmem>>, %arg4: memref<2x1x64xf32, #tpu.memory_space<vmem>>, %arg5: memref<2x64x192xbf16, #tpu.memory_space<vmem>>, %arg6: memref<2x1x192xf32, #tpu.memory_space<vmem>>, %arg7: memref<2x64x64xbf16, #tpu.memory_space<vmem>>, %arg8: memref<2x1x64xf32, #tpu.memory_space<vmem>>, %arg9: memref<2x1x64xf32, #tpu.memory_space<vmem>>, %arg10: memref<2x1x64xf32, #tpu.memory_space<vmem>>, %arg11: memref<2x64x256xbf16, #tpu.memory_space<vmem>>, %arg12: memref<2x1x256xf32, #tpu.memory_space<vmem>>, %arg13: memref<2x256x64xbf16, #tpu.memory_space<vmem>>, %arg14: memref<2x1x64xf32, #tpu.memory_space<vmem>>, %arg15: memref<1x64xf32, #tpu.memory_space<vmem>>, %arg16: memref<1x64xf32, #tpu.memory_space<vmem>>, %arg17: memref<32x64xf32, #tpu.memory_space<vmem>>) attributes {dimension_semantics = [], scalar_prefetch = 0 : i64, scratch_operands = 0 : i64, tpu.core_type = #tpu.core_type<tc>} {
    %c0 = arith.constant 0 : index
    %c0_0 = arith.constant 0 : index
    %0 = vector.load %arg0[%c0, %c0_0] : memref<32x192xf32, #tpu.memory_space<vmem>>, vector<32x192xf32>
    %1 = arith.truncf %0 : vector<32x192xf32> to vector<32x192xbf16>
    %c0_1 = arith.constant 0 : index
    %c0_2 = arith.constant 0 : index
    %2 = vector.load %arg2[%c0_1, %c0_2] : memref<192x64xbf16, #tpu.memory_space<vmem>>, vector<192x64xbf16>
    %cst = arith.constant dense<0.000000e+00> : vector<32x64xf32>
    %3 = tpu.matmul %1, %2, %cst {dimension_numbers = #tpu.dot_dimension_numbers<[1], [0], [0], [1], [0, 0, 1, 1], [], []>} : vector<32x192xbf16>, vector<192x64xbf16>, vector<32x64xf32> -> vector<32x64xf32>
    %c0_3 = arith.constant 0 : index
    %c0_4 = arith.constant 0 : index
    %4 = vector.load %arg1[%c0_3, %c0_4] : memref<32x64xf32, #tpu.memory_space<vmem>>, vector<32x64xf32>
    %5 = arith.addf %3, %4 : vector<32x64xf32>
    %c0_5 = arith.constant 0 : index
    %c0_6 = arith.constant 0 : index
    %c0_7 = arith.constant 0 : index
    %6 = vector.load %arg3[%c0_5, %c0_6, %c0_7] : memref<2x1x64xf32, #tpu.memory_space<vmem>>, vector<1x1x64xf32>
    %7 = vector.shape_cast %6 : vector<1x1x64xf32> to vector<1x64xf32>
    %c0_8 = arith.constant 0 : index
    %c0_9 = arith.constant 0 : index
    %c0_10 = arith.constant 0 : index
    %8 = vector.load %arg4[%c0_8, %c0_9, %c0_10] : memref<2x1x64xf32, #tpu.memory_space<vmem>>, vector<1x1x64xf32>
    %9 = vector.shape_cast %8 : vector<1x1x64xf32> to vector<1x64xf32>
    %cst_11 = arith.constant dense<0.000000e+00> : vector<32xf32>
    %10 = vector.multi_reduction <add>, %5, %cst_11 [1] : vector<32x64xf32> to vector<32xf32>
    %11 = vector.shape_cast %10 : vector<32xf32> to vector<32x1xf32>
    %cst_12 = arith.constant 6.400000e+01 : f32
    %12 = vector.broadcast %cst_12 : f32 to vector<32x1xf32>
    %13 = arith.divf %11, %12 : vector<32x1xf32>
    %14 = vector.broadcast %13 : vector<32x1xf32> to vector<32x64xf32>
    %15 = arith.subf %5, %14 : vector<32x64xf32>
    %16 = arith.mulf %15, %15 : vector<32x64xf32>
    %cst_13 = arith.constant dense<0.000000e+00> : vector<32xf32>
    %17 = vector.multi_reduction <add>, %16, %cst_13 [1] : vector<32x64xf32> to vector<32xf32>
    %18 = vector.shape_cast %17 : vector<32xf32> to vector<32x1xf32>
    %cst_14 = arith.constant 6.400000e+01 : f32
    %19 = vector.broadcast %cst_14 : f32 to vector<32x1xf32>
    %20 = arith.divf %18, %19 : vector<32x1xf32>
    %21 = vector.broadcast %13 : vector<32x1xf32> to vector<32x64xf32>
    %22 = arith.subf %5, %21 : vector<32x64xf32>
    %cst_15 = arith.constant 9.99999974E-6 : f32
    %23 = vector.broadcast %cst_15 : f32 to vector<32x1xf32>
    %24 = arith.addf %20, %23 : vector<32x1xf32>
    %25 = math.rsqrt %24 : vector<32x1xf32>
    %26 = vector.broadcast %25 : vector<32x1xf32> to vector<32x64xf32>
    %27 = arith.mulf %22, %26 : vector<32x64xf32>
    %28 = vector.broadcast %7 : vector<1x64xf32> to vector<32x64xf32>
    %29 = arith.mulf %27, %28 : vector<32x64xf32>
    %30 = vector.broadcast %9 : vector<1x64xf32> to vector<32x64xf32>
    %31 = arith.addf %29, %30 : vector<32x64xf32>
    %32 = arith.truncf %31 : vector<32x64xf32> to vector<32x64xbf16>
    %c0_16 = arith.constant 0 : index
    %c0_17 = arith.constant 0 : index
    %c0_18 = arith.constant 0 : index
    %33 = vector.load %arg5[%c0_16, %c0_17, %c0_18] : memref<2x64x192xbf16, #tpu.memory_space<vmem>>, vector<1x64x192xbf16>
    %34 = vector.shape_cast %33 : vector<1x64x192xbf16> to vector<64x192xbf16>
    %cst_19 = arith.constant dense<0.000000e+00> : vector<32x192xf32>
    %35 = tpu.matmul %32, %34, %cst_19 {dimension_numbers = #tpu.dot_dimension_numbers<[1], [0], [0], [1], [0, 0, 1, 1], [], []>} : vector<32x64xbf16>, vector<64x192xbf16>, vector<32x192xf32> -> vector<32x192xf32>
    %c0_20 = arith.constant 0 : index
    %c0_21 = arith.constant 0 : index
    %c0_22 = arith.constant 0 : index
    %36 = vector.load %arg6[%c0_20, %c0_21, %c0_22] : memref<2x1x192xf32, #tpu.memory_space<vmem>>, vector<1x1x192xf32>
    %37 = vector.shape_cast %36 : vector<1x1x192xf32> to vector<1x192xf32>
    %38 = vector.broadcast %37 : vector<1x192xf32> to vector<32x192xf32>
    %39 = arith.addf %35, %38 : vector<32x192xf32>
    %c0_23 = arith.constant 0 : index
    %c0_24 = arith.constant 0 : index
    %c0_25 = arith.constant 0 : index
    %40 = vector.load %arg7[%c0_23, %c0_24, %c0_25] : memref<2x64x64xbf16, #tpu.memory_space<vmem>>, vector<1x64x64xbf16>
    %41 = vector.shape_cast %40 : vector<1x64x64xbf16> to vector<64x64xbf16>
    %cst_26 = arith.constant 0.000000e+00 : f32
    %42 = vector.broadcast %cst_26 : f32 to vector<32x64xf32>
    %43 = vector.extract_strided_slice %39 {offsets = [0, 0], sizes = [32, 16], strides = [1, 1]} : vector<32x192xf32> to vector<32x16xf32>
    %44 = vector.shape_cast %43 : vector<32x16xf32> to vector<2x16x16xf32>
    %45 = vector.extract_strided_slice %39 {offsets = [0, 64], sizes = [32, 16], strides = [1, 1]} : vector<32x192xf32> to vector<32x16xf32>
    %46 = vector.shape_cast %45 : vector<32x16xf32> to vector<2x16x16xf32>
    %47 = vector.extract_strided_slice %39 {offsets = [0, 128], sizes = [32, 16], strides = [1, 1]} : vector<32x192xf32> to vector<32x16xf32>
    %48 = vector.shape_cast %47 : vector<32x16xf32> to vector<2x16x16xf32>
    %49 = arith.truncf %44 : vector<2x16x16xf32> to vector<2x16x16xbf16>
    %50 = arith.truncf %46 : vector<2x16x16xf32> to vector<2x16x16xbf16>
    %cst_27 = arith.constant dense<0.000000e+00> : vector<2x16x16xf32>
    %51 = tpu.matmul %49, %50, %cst_27 {dimension_numbers = #tpu.dot_dimension_numbers<[2], [2], [1], [1], [0, 0, 0, 1, 1, 1], [0], [0]>} : vector<2x16x16xbf16>, vector<2x16x16xbf16>, vector<2x16x16xf32> -> vector<2x16x16xf32>
    %cst_28 = arith.constant dense<0xFF800000> : vector<2x16xf32>
    %52 = vector.multi_reduction <maximumf>, %51, %cst_28 [2] : vector<2x16x16xf32> to vector<2x16xf32>
    %53 = vector.shape_cast %52 : vector<2x16xf32> to vector<2x16x1xf32>
    %54 = vector.broadcast %53 : vector<2x16x1xf32> to vector<2x16x16xf32>
    %55 = arith.subf %51, %54 : vector<2x16x16xf32>
    %56 = math.exp %55 : vector<2x16x16xf32>
    %cst_29 = arith.constant dense<0.000000e+00> : vector<2x16xf32>
    %57 = vector.multi_reduction <add>, %56, %cst_29 [2] : vector<2x16x16xf32> to vector<2x16xf32>
    %58 = vector.shape_cast %57 : vector<2x16xf32> to vector<2x16x1xf32>
    %59 = tpu.reciprocal %58 {approx = true} : vector<2x16x1xf32> -> vector<2x16x1xf32>
    %60 = vector.broadcast %59 : vector<2x16x1xf32> to vector<2x16x16xf32>
    %61 = arith.mulf %56, %60 : vector<2x16x16xf32>
    %62 = arith.truncf %61 : vector<2x16x16xf32> to vector<2x16x16xbf16>
    %63 = arith.truncf %48 : vector<2x16x16xf32> to vector<2x16x16xbf16>
    %cst_30 = arith.constant dense<0.000000e+00> : vector<2x16x16xf32>
    %64 = tpu.matmul %62, %63, %cst_30 {dimension_numbers = #tpu.dot_dimension_numbers<[2], [1], [1], [2], [0, 0, 0, 1, 1, 2], [0], [0]>} : vector<2x16x16xbf16>, vector<2x16x16xbf16>, vector<2x16x16xf32> -> vector<2x16x16xf32>
    %65 = vector.shape_cast %64 : vector<2x16x16xf32> to vector<32x16xf32>
    %66 = arith.truncf %65 : vector<32x16xf32> to vector<32x16xbf16>
    %67 = vector.extract_strided_slice %41 {offsets = [0, 0], sizes = [16, 64], strides = [1, 1]} : vector<64x64xbf16> to vector<16x64xbf16>
    %cst_31 = arith.constant dense<0.000000e+00> : vector<32x64xf32>
    %68 = tpu.matmul %66, %67, %cst_31 {dimension_numbers = #tpu.dot_dimension_numbers<[1], [0], [0], [1], [0, 0, 1, 1], [], []>} : vector<32x16xbf16>, vector<16x64xbf16>, vector<32x64xf32> -> vector<32x64xf32>
    %69 = arith.addf %42, %68 : vector<32x64xf32>
    %70 = vector.extract_strided_slice %39 {offsets = [0, 16], sizes = [32, 16], strides = [1, 1]} : vector<32x192xf32> to vector<32x16xf32>
    %71 = vector.shape_cast %70 : vector<32x16xf32> to vector<2x16x16xf32>
    %72 = vector.extract_strided_slice %39 {offsets = [0, 80], sizes = [32, 16], strides = [1, 1]} : vector<32x192xf32> to vector<32x16xf32>
    %73 = vector.shape_cast %72 : vector<32x16xf32> to vector<2x16x16xf32>
    %74 = vector.extract_strided_slice %39 {offsets = [0, 144], sizes = [32, 16], strides = [1, 1]} : vector<32x192xf32> to vector<32x16xf32>
    %75 = vector.shape_cast %74 : vector<32x16xf32> to vector<2x16x16xf32>
    %76 = arith.truncf %71 : vector<2x16x16xf32> to vector<2x16x16xbf16>
    %77 = arith.truncf %73 : vector<2x16x16xf32> to vector<2x16x16xbf16>
    %cst_32 = arith.constant dense<0.000000e+00> : vector<2x16x16xf32>
    %78 = tpu.matmul %76, %77, %cst_32 {dimension_numbers = #tpu.dot_dimension_numbers<[2], [2], [1], [1], [0, 0, 0, 1, 1, 1], [0], [0]>} : vector<2x16x16xbf16>, vector<2x16x16xbf16>, vector<2x16x16xf32> -> vector<2x16x16xf32>
    %cst_33 = arith.constant dense<0xFF800000> : vector<2x16xf32>
    %79 = vector.multi_reduction <maximumf>, %78, %cst_33 [2] : vector<2x16x16xf32> to vector<2x16xf32>
    %80 = vector.shape_cast %79 : vector<2x16xf32> to vector<2x16x1xf32>
    %81 = vector.broadcast %80 : vector<2x16x1xf32> to vector<2x16x16xf32>
    %82 = arith.subf %78, %81 : vector<2x16x16xf32>
    %83 = math.exp %82 : vector<2x16x16xf32>
    %cst_34 = arith.constant dense<0.000000e+00> : vector<2x16xf32>
    %84 = vector.multi_reduction <add>, %83, %cst_34 [2] : vector<2x16x16xf32> to vector<2x16xf32>
    %85 = vector.shape_cast %84 : vector<2x16xf32> to vector<2x16x1xf32>
    %86 = tpu.reciprocal %85 {approx = true} : vector<2x16x1xf32> -> vector<2x16x1xf32>
    %87 = vector.broadcast %86 : vector<2x16x1xf32> to vector<2x16x16xf32>
    %88 = arith.mulf %83, %87 : vector<2x16x16xf32>
    %89 = arith.truncf %88 : vector<2x16x16xf32> to vector<2x16x16xbf16>
    %90 = arith.truncf %75 : vector<2x16x16xf32> to vector<2x16x16xbf16>
    %cst_35 = arith.constant dense<0.000000e+00> : vector<2x16x16xf32>
    %91 = tpu.matmul %89, %90, %cst_35 {dimension_numbers = #tpu.dot_dimension_numbers<[2], [1], [1], [2], [0, 0, 0, 1, 1, 2], [0], [0]>} : vector<2x16x16xbf16>, vector<2x16x16xbf16>, vector<2x16x16xf32> -> vector<2x16x16xf32>
    %92 = vector.shape_cast %91 : vector<2x16x16xf32> to vector<32x16xf32>
    %93 = arith.truncf %92 : vector<32x16xf32> to vector<32x16xbf16>
    %94 = vector.extract_strided_slice %41 {offsets = [16, 0], sizes = [16, 64], strides = [1, 1]} : vector<64x64xbf16> to vector<16x64xbf16>
    %cst_36 = arith.constant dense<0.000000e+00> : vector<32x64xf32>
    %95 = tpu.matmul %93, %94, %cst_36 {dimension_numbers = #tpu.dot_dimension_numbers<[1], [0], [0], [1], [0, 0, 1, 1], [], []>} : vector<32x16xbf16>, vector<16x64xbf16>, vector<32x64xf32> -> vector<32x64xf32>
    %96 = arith.addf %69, %95 : vector<32x64xf32>
    %97 = vector.extract_strided_slice %39 {offsets = [0, 32], sizes = [32, 16], strides = [1, 1]} : vector<32x192xf32> to vector<32x16xf32>
    %98 = vector.shape_cast %97 : vector<32x16xf32> to vector<2x16x16xf32>
    %99 = vector.extract_strided_slice %39 {offsets = [0, 96], sizes = [32, 16], strides = [1, 1]} : vector<32x192xf32> to vector<32x16xf32>
    %100 = vector.shape_cast %99 : vector<32x16xf32> to vector<2x16x16xf32>
    %101 = vector.extract_strided_slice %39 {offsets = [0, 160], sizes = [32, 16], strides = [1, 1]} : vector<32x192xf32> to vector<32x16xf32>
    %102 = vector.shape_cast %101 : vector<32x16xf32> to vector<2x16x16xf32>
    %103 = arith.truncf %98 : vector<2x16x16xf32> to vector<2x16x16xbf16>
    %104 = arith.truncf %100 : vector<2x16x16xf32> to vector<2x16x16xbf16>
    %cst_37 = arith.constant dense<0.000000e+00> : vector<2x16x16xf32>
    %105 = tpu.matmul %103, %104, %cst_37 {dimension_numbers = #tpu.dot_dimension_numbers<[2], [2], [1], [1], [0, 0, 0, 1, 1, 1], [0], [0]>} : vector<2x16x16xbf16>, vector<2x16x16xbf16>, vector<2x16x16xf32> -> vector<2x16x16xf32>
    %cst_38 = arith.constant dense<0xFF800000> : vector<2x16xf32>
    %106 = vector.multi_reduction <maximumf>, %105, %cst_38 [2] : vector<2x16x16xf32> to vector<2x16xf32>
    %107 = vector.shape_cast %106 : vector<2x16xf32> to vector<2x16x1xf32>
    %108 = vector.broadcast %107 : vector<2x16x1xf32> to vector<2x16x16xf32>
    %109 = arith.subf %105, %108 : vector<2x16x16xf32>
    %110 = math.exp %109 : vector<2x16x16xf32>
    %cst_39 = arith.constant dense<0.000000e+00> : vector<2x16xf32>
    %111 = vector.multi_reduction <add>, %110, %cst_39 [2] : vector<2x16x16xf32> to vector<2x16xf32>
    %112 = vector.shape_cast %111 : vector<2x16xf32> to vector<2x16x1xf32>
    %113 = tpu.reciprocal %112 {approx = true} : vector<2x16x1xf32> -> vector<2x16x1xf32>
    %114 = vector.broadcast %113 : vector<2x16x1xf32> to vector<2x16x16xf32>
    %115 = arith.mulf %110, %114 : vector<2x16x16xf32>
    %116 = arith.truncf %115 : vector<2x16x16xf32> to vector<2x16x16xbf16>
    %117 = arith.truncf %102 : vector<2x16x16xf32> to vector<2x16x16xbf16>
    %cst_40 = arith.constant dense<0.000000e+00> : vector<2x16x16xf32>
    %118 = tpu.matmul %116, %117, %cst_40 {dimension_numbers = #tpu.dot_dimension_numbers<[2], [1], [1], [2], [0, 0, 0, 1, 1, 2], [0], [0]>} : vector<2x16x16xbf16>, vector<2x16x16xbf16>, vector<2x16x16xf32> -> vector<2x16x16xf32>
    %119 = vector.shape_cast %118 : vector<2x16x16xf32> to vector<32x16xf32>
    %120 = arith.truncf %119 : vector<32x16xf32> to vector<32x16xbf16>
    %121 = vector.extract_strided_slice %41 {offsets = [32, 0], sizes = [16, 64], strides = [1, 1]} : vector<64x64xbf16> to vector<16x64xbf16>
    %cst_41 = arith.constant dense<0.000000e+00> : vector<32x64xf32>
    %122 = tpu.matmul %120, %121, %cst_41 {dimension_numbers = #tpu.dot_dimension_numbers<[1], [0], [0], [1], [0, 0, 1, 1], [], []>} : vector<32x16xbf16>, vector<16x64xbf16>, vector<32x64xf32> -> vector<32x64xf32>
    %123 = arith.addf %96, %122 : vector<32x64xf32>
    %124 = vector.extract_strided_slice %39 {offsets = [0, 48], sizes = [32, 16], strides = [1, 1]} : vector<32x192xf32> to vector<32x16xf32>
    %125 = vector.shape_cast %124 : vector<32x16xf32> to vector<2x16x16xf32>
    %126 = vector.extract_strided_slice %39 {offsets = [0, 112], sizes = [32, 16], strides = [1, 1]} : vector<32x192xf32> to vector<32x16xf32>
    %127 = vector.shape_cast %126 : vector<32x16xf32> to vector<2x16x16xf32>
    %128 = vector.extract_strided_slice %39 {offsets = [0, 176], sizes = [32, 16], strides = [1, 1]} : vector<32x192xf32> to vector<32x16xf32>
    %129 = vector.shape_cast %128 : vector<32x16xf32> to vector<2x16x16xf32>
    %130 = arith.truncf %125 : vector<2x16x16xf32> to vector<2x16x16xbf16>
    %131 = arith.truncf %127 : vector<2x16x16xf32> to vector<2x16x16xbf16>
    %cst_42 = arith.constant dense<0.000000e+00> : vector<2x16x16xf32>
    %132 = tpu.matmul %130, %131, %cst_42 {dimension_numbers = #tpu.dot_dimension_numbers<[2], [2], [1], [1], [0, 0, 0, 1, 1, 1], [0], [0]>} : vector<2x16x16xbf16>, vector<2x16x16xbf16>, vector<2x16x16xf32> -> vector<2x16x16xf32>
    %cst_43 = arith.constant dense<0xFF800000> : vector<2x16xf32>
    %133 = vector.multi_reduction <maximumf>, %132, %cst_43 [2] : vector<2x16x16xf32> to vector<2x16xf32>
    %134 = vector.shape_cast %133 : vector<2x16xf32> to vector<2x16x1xf32>
    %135 = vector.broadcast %134 : vector<2x16x1xf32> to vector<2x16x16xf32>
    %136 = arith.subf %132, %135 : vector<2x16x16xf32>
    %137 = math.exp %136 : vector<2x16x16xf32>
    %cst_44 = arith.constant dense<0.000000e+00> : vector<2x16xf32>
    %138 = vector.multi_reduction <add>, %137, %cst_44 [2] : vector<2x16x16xf32> to vector<2x16xf32>
    %139 = vector.shape_cast %138 : vector<2x16xf32> to vector<2x16x1xf32>
    %140 = tpu.reciprocal %139 {approx = true} : vector<2x16x1xf32> -> vector<2x16x1xf32>
    %141 = vector.broadcast %140 : vector<2x16x1xf32> to vector<2x16x16xf32>
    %142 = arith.mulf %137, %141 : vector<2x16x16xf32>
    %143 = arith.truncf %142 : vector<2x16x16xf32> to vector<2x16x16xbf16>
    %144 = arith.truncf %129 : vector<2x16x16xf32> to vector<2x16x16xbf16>
    %cst_45 = arith.constant dense<0.000000e+00> : vector<2x16x16xf32>
    %145 = tpu.matmul %143, %144, %cst_45 {dimension_numbers = #tpu.dot_dimension_numbers<[2], [1], [1], [2], [0, 0, 0, 1, 1, 2], [0], [0]>} : vector<2x16x16xbf16>, vector<2x16x16xbf16>, vector<2x16x16xf32> -> vector<2x16x16xf32>
    %146 = vector.shape_cast %145 : vector<2x16x16xf32> to vector<32x16xf32>
    %147 = arith.truncf %146 : vector<32x16xf32> to vector<32x16xbf16>
    %148 = vector.extract_strided_slice %41 {offsets = [48, 0], sizes = [16, 64], strides = [1, 1]} : vector<64x64xbf16> to vector<16x64xbf16>
    %cst_46 = arith.constant dense<0.000000e+00> : vector<32x64xf32>
    %149 = tpu.matmul %147, %148, %cst_46 {dimension_numbers = #tpu.dot_dimension_numbers<[1], [0], [0], [1], [0, 0, 1, 1], [], []>} : vector<32x16xbf16>, vector<16x64xbf16>, vector<32x64xf32> -> vector<32x64xf32>
    %150 = arith.addf %123, %149 : vector<32x64xf32>
    %151 = arith.addf %5, %150 : vector<32x64xf32>
    %c0_47 = arith.constant 0 : index
    %c0_48 = arith.constant 0 : index
    %c0_49 = arith.constant 0 : index
    %152 = vector.load %arg8[%c0_47, %c0_48, %c0_49] : memref<2x1x64xf32, #tpu.memory_space<vmem>>, vector<1x1x64xf32>
    %153 = vector.shape_cast %152 : vector<1x1x64xf32> to vector<1x64xf32>
    %154 = vector.broadcast %153 : vector<1x64xf32> to vector<32x64xf32>
    %155 = arith.addf %151, %154 : vector<32x64xf32>
    %c0_50 = arith.constant 0 : index
    %c0_51 = arith.constant 0 : index
    %c0_52 = arith.constant 0 : index
    %156 = vector.load %arg9[%c0_50, %c0_51, %c0_52] : memref<2x1x64xf32, #tpu.memory_space<vmem>>, vector<1x1x64xf32>
    %157 = vector.shape_cast %156 : vector<1x1x64xf32> to vector<1x64xf32>
    %c0_53 = arith.constant 0 : index
    %c0_54 = arith.constant 0 : index
    %c0_55 = arith.constant 0 : index
    %158 = vector.load %arg10[%c0_53, %c0_54, %c0_55] : memref<2x1x64xf32, #tpu.memory_space<vmem>>, vector<1x1x64xf32>
    %159 = vector.shape_cast %158 : vector<1x1x64xf32> to vector<1x64xf32>
    %cst_56 = arith.constant dense<0.000000e+00> : vector<32xf32>
    %160 = vector.multi_reduction <add>, %155, %cst_56 [1] : vector<32x64xf32> to vector<32xf32>
    %161 = vector.shape_cast %160 : vector<32xf32> to vector<32x1xf32>
    %cst_57 = arith.constant 6.400000e+01 : f32
    %162 = vector.broadcast %cst_57 : f32 to vector<32x1xf32>
    %163 = arith.divf %161, %162 : vector<32x1xf32>
    %164 = vector.broadcast %163 : vector<32x1xf32> to vector<32x64xf32>
    %165 = arith.subf %155, %164 : vector<32x64xf32>
    %166 = arith.mulf %165, %165 : vector<32x64xf32>
    %cst_58 = arith.constant dense<0.000000e+00> : vector<32xf32>
    %167 = vector.multi_reduction <add>, %166, %cst_58 [1] : vector<32x64xf32> to vector<32xf32>
    %168 = vector.shape_cast %167 : vector<32xf32> to vector<32x1xf32>
    %cst_59 = arith.constant 6.400000e+01 : f32
    %169 = vector.broadcast %cst_59 : f32 to vector<32x1xf32>
    %170 = arith.divf %168, %169 : vector<32x1xf32>
    %171 = vector.broadcast %163 : vector<32x1xf32> to vector<32x64xf32>
    %172 = arith.subf %155, %171 : vector<32x64xf32>
    %cst_60 = arith.constant 9.99999974E-6 : f32
    %173 = vector.broadcast %cst_60 : f32 to vector<32x1xf32>
    %174 = arith.addf %170, %173 : vector<32x1xf32>
    %175 = math.rsqrt %174 : vector<32x1xf32>
    %176 = vector.broadcast %175 : vector<32x1xf32> to vector<32x64xf32>
    %177 = arith.mulf %172, %176 : vector<32x64xf32>
    %178 = vector.broadcast %157 : vector<1x64xf32> to vector<32x64xf32>
    %179 = arith.mulf %177, %178 : vector<32x64xf32>
    %180 = vector.broadcast %159 : vector<1x64xf32> to vector<32x64xf32>
    %181 = arith.addf %179, %180 : vector<32x64xf32>
    %182 = arith.truncf %181 : vector<32x64xf32> to vector<32x64xbf16>
    %c0_61 = arith.constant 0 : index
    %c0_62 = arith.constant 0 : index
    %c0_63 = arith.constant 0 : index
    %183 = vector.load %arg11[%c0_61, %c0_62, %c0_63] : memref<2x64x256xbf16, #tpu.memory_space<vmem>>, vector<1x64x256xbf16>
    %184 = vector.shape_cast %183 : vector<1x64x256xbf16> to vector<64x256xbf16>
    %cst_64 = arith.constant dense<0.000000e+00> : vector<32x256xf32>
    %185 = tpu.matmul %182, %184, %cst_64 {dimension_numbers = #tpu.dot_dimension_numbers<[1], [0], [0], [1], [0, 0, 1, 1], [], []>} : vector<32x64xbf16>, vector<64x256xbf16>, vector<32x256xf32> -> vector<32x256xf32>
    %c0_65 = arith.constant 0 : index
    %c0_66 = arith.constant 0 : index
    %c0_67 = arith.constant 0 : index
    %186 = vector.load %arg12[%c0_65, %c0_66, %c0_67] : memref<2x1x256xf32, #tpu.memory_space<vmem>>, vector<1x1x256xf32>
    %187 = vector.shape_cast %186 : vector<1x1x256xf32> to vector<1x256xf32>
    %188 = vector.broadcast %187 : vector<1x256xf32> to vector<32x256xf32>
    %189 = arith.addf %185, %188 : vector<32x256xf32>
    %cst_68 = arith.constant 5.000000e-01 : f32
    %190 = vector.broadcast %cst_68 : f32 to vector<32x256xf32>
    %191 = arith.mulf %190, %189 : vector<32x256xf32>
    %cst_69 = arith.constant 0.707106769 : f32
    %192 = vector.broadcast %cst_69 : f32 to vector<32x256xf32>
    %193 = arith.mulf %189, %192 : vector<32x256xf32>
    %cst_70 = arith.constant 0.000000e+00 : f32
    %194 = vector.broadcast %cst_70 : f32 to vector<32x256xf32>
    %195 = arith.cmpf oge, %193, %194 : vector<32x256xf32>
    %cst_71 = arith.constant 1.000000e+00 : f32
    %cst_72 = arith.constant -1.000000e+00 : f32
    %196 = vector.broadcast %cst_71 : f32 to vector<32x256xf32>
    %197 = vector.broadcast %cst_72 : f32 to vector<32x256xf32>
    %198 = arith.select %195, %196, %197 : vector<32x256xi1>, vector<32x256xf32>
    %199 = math.absf %193 : vector<32x256xf32>
    %cst_73 = arith.constant 0.327591091 : f32
    %200 = vector.broadcast %cst_73 : f32 to vector<32x256xf32>
    %201 = arith.mulf %200, %199 : vector<32x256xf32>
    %cst_74 = arith.constant 1.000000e+00 : f32
    %202 = vector.broadcast %cst_74 : f32 to vector<32x256xf32>
    %203 = arith.addf %202, %201 : vector<32x256xf32>
    %cst_75 = arith.constant 1.000000e+00 : f32
    %204 = vector.broadcast %cst_75 : f32 to vector<32x256xf32>
    %205 = arith.divf %204, %203 : vector<32x256xf32>
    %cst_76 = arith.constant 1.06140542 : f32
    %206 = vector.broadcast %cst_76 : f32 to vector<32x256xf32>
    %207 = arith.mulf %206, %205 : vector<32x256xf32>
    %cst_77 = arith.constant -1.45315206 : f32
    %208 = vector.broadcast %cst_77 : f32 to vector<32x256xf32>
    %209 = arith.addf %207, %208 : vector<32x256xf32>
    %210 = arith.mulf %209, %205 : vector<32x256xf32>
    %cst_78 = arith.constant 1.42141378 : f32
    %211 = vector.broadcast %cst_78 : f32 to vector<32x256xf32>
    %212 = arith.addf %210, %211 : vector<32x256xf32>
    %213 = arith.mulf %212, %205 : vector<32x256xf32>
    %cst_79 = arith.constant -0.284496725 : f32
    %214 = vector.broadcast %cst_79 : f32 to vector<32x256xf32>
    %215 = arith.addf %213, %214 : vector<32x256xf32>
    %216 = arith.mulf %215, %205 : vector<32x256xf32>
    %cst_80 = arith.constant 0.254829586 : f32
    %217 = vector.broadcast %cst_80 : f32 to vector<32x256xf32>
    %218 = arith.addf %216, %217 : vector<32x256xf32>
    %219 = arith.mulf %218, %205 : vector<32x256xf32>
    %cst_81 = arith.constant 0.000000e+00 : f32
    %220 = vector.broadcast %cst_81 : f32 to vector<32x256xf32>
    %221 = arith.subf %220, %199 : vector<32x256xf32>
    %222 = arith.mulf %221, %199 : vector<32x256xf32>
    %223 = math.exp %222 : vector<32x256xf32>
    %224 = arith.mulf %219, %223 : vector<32x256xf32>
    %cst_82 = arith.constant 1.000000e+00 : f32
    %225 = vector.broadcast %cst_82 : f32 to vector<32x256xf32>
    %226 = arith.subf %225, %224 : vector<32x256xf32>
    %227 = arith.mulf %198, %226 : vector<32x256xf32>
    %cst_83 = arith.constant 1.000000e+00 : f32
    %228 = vector.broadcast %cst_83 : f32 to vector<32x256xf32>
    %229 = arith.addf %228, %227 : vector<32x256xf32>
    %230 = arith.mulf %191, %229 : vector<32x256xf32>
    %231 = arith.truncf %230 : vector<32x256xf32> to vector<32x256xbf16>
    %c0_84 = arith.constant 0 : index
    %c0_85 = arith.constant 0 : index
    %c0_86 = arith.constant 0 : index
    %232 = vector.load %arg13[%c0_84, %c0_85, %c0_86] : memref<2x256x64xbf16, #tpu.memory_space<vmem>>, vector<1x256x64xbf16>
    %233 = vector.shape_cast %232 : vector<1x256x64xbf16> to vector<256x64xbf16>
    %cst_87 = arith.constant dense<0.000000e+00> : vector<32x64xf32>
    %234 = tpu.matmul %231, %233, %cst_87 {dimension_numbers = #tpu.dot_dimension_numbers<[1], [0], [0], [1], [0, 0, 1, 1], [], []>} : vector<32x256xbf16>, vector<256x64xbf16>, vector<32x64xf32> -> vector<32x64xf32>
    %c0_88 = arith.constant 0 : index
    %c0_89 = arith.constant 0 : index
    %c0_90 = arith.constant 0 : index
    %235 = vector.load %arg14[%c0_88, %c0_89, %c0_90] : memref<2x1x64xf32, #tpu.memory_space<vmem>>, vector<1x1x64xf32>
    %236 = vector.shape_cast %235 : vector<1x1x64xf32> to vector<1x64xf32>
    %237 = vector.broadcast %236 : vector<1x64xf32> to vector<32x64xf32>
    %238 = arith.addf %234, %237 : vector<32x64xf32>
    %239 = arith.addf %155, %238 : vector<32x64xf32>
    %c1 = arith.constant 1 : index
    %c0_91 = arith.constant 0 : index
    %c0_92 = arith.constant 0 : index
    %240 = vector.load %arg3[%c1, %c0_91, %c0_92] : memref<2x1x64xf32, #tpu.memory_space<vmem>>, vector<1x1x64xf32>
    %241 = vector.shape_cast %240 : vector<1x1x64xf32> to vector<1x64xf32>
    %c1_93 = arith.constant 1 : index
    %c0_94 = arith.constant 0 : index
    %c0_95 = arith.constant 0 : index
    %242 = vector.load %arg4[%c1_93, %c0_94, %c0_95] : memref<2x1x64xf32, #tpu.memory_space<vmem>>, vector<1x1x64xf32>
    %243 = vector.shape_cast %242 : vector<1x1x64xf32> to vector<1x64xf32>
    %cst_96 = arith.constant dense<0.000000e+00> : vector<32xf32>
    %244 = vector.multi_reduction <add>, %239, %cst_96 [1] : vector<32x64xf32> to vector<32xf32>
    %245 = vector.shape_cast %244 : vector<32xf32> to vector<32x1xf32>
    %cst_97 = arith.constant 6.400000e+01 : f32
    %246 = vector.broadcast %cst_97 : f32 to vector<32x1xf32>
    %247 = arith.divf %245, %246 : vector<32x1xf32>
    %248 = vector.broadcast %247 : vector<32x1xf32> to vector<32x64xf32>
    %249 = arith.subf %239, %248 : vector<32x64xf32>
    %250 = arith.mulf %249, %249 : vector<32x64xf32>
    %cst_98 = arith.constant dense<0.000000e+00> : vector<32xf32>
    %251 = vector.multi_reduction <add>, %250, %cst_98 [1] : vector<32x64xf32> to vector<32xf32>
    %252 = vector.shape_cast %251 : vector<32xf32> to vector<32x1xf32>
    %cst_99 = arith.constant 6.400000e+01 : f32
    %253 = vector.broadcast %cst_99 : f32 to vector<32x1xf32>
    %254 = arith.divf %252, %253 : vector<32x1xf32>
    %255 = vector.broadcast %247 : vector<32x1xf32> to vector<32x64xf32>
    %256 = arith.subf %239, %255 : vector<32x64xf32>
    %cst_100 = arith.constant 9.99999974E-6 : f32
    %257 = vector.broadcast %cst_100 : f32 to vector<32x1xf32>
    %258 = arith.addf %254, %257 : vector<32x1xf32>
    %259 = math.rsqrt %258 : vector<32x1xf32>
    %260 = vector.broadcast %259 : vector<32x1xf32> to vector<32x64xf32>
    %261 = arith.mulf %256, %260 : vector<32x64xf32>
    %262 = vector.broadcast %241 : vector<1x64xf32> to vector<32x64xf32>
    %263 = arith.mulf %261, %262 : vector<32x64xf32>
    %264 = vector.broadcast %243 : vector<1x64xf32> to vector<32x64xf32>
    %265 = arith.addf %263, %264 : vector<32x64xf32>
    %266 = arith.truncf %265 : vector<32x64xf32> to vector<32x64xbf16>
    %c1_101 = arith.constant 1 : index
    %c0_102 = arith.constant 0 : index
    %c0_103 = arith.constant 0 : index
    %267 = vector.load %arg5[%c1_101, %c0_102, %c0_103] : memref<2x64x192xbf16, #tpu.memory_space<vmem>>, vector<1x64x192xbf16>
    %268 = vector.shape_cast %267 : vector<1x64x192xbf16> to vector<64x192xbf16>
    %cst_104 = arith.constant dense<0.000000e+00> : vector<32x192xf32>
    %269 = tpu.matmul %266, %268, %cst_104 {dimension_numbers = #tpu.dot_dimension_numbers<[1], [0], [0], [1], [0, 0, 1, 1], [], []>} : vector<32x64xbf16>, vector<64x192xbf16>, vector<32x192xf32> -> vector<32x192xf32>
    %c1_105 = arith.constant 1 : index
    %c0_106 = arith.constant 0 : index
    %c0_107 = arith.constant 0 : index
    %270 = vector.load %arg6[%c1_105, %c0_106, %c0_107] : memref<2x1x192xf32, #tpu.memory_space<vmem>>, vector<1x1x192xf32>
    %271 = vector.shape_cast %270 : vector<1x1x192xf32> to vector<1x192xf32>
    %272 = vector.broadcast %271 : vector<1x192xf32> to vector<32x192xf32>
    %273 = arith.addf %269, %272 : vector<32x192xf32>
    %c1_108 = arith.constant 1 : index
    %c0_109 = arith.constant 0 : index
    %c0_110 = arith.constant 0 : index
    %274 = vector.load %arg7[%c1_108, %c0_109, %c0_110] : memref<2x64x64xbf16, #tpu.memory_space<vmem>>, vector<1x64x64xbf16>
    %275 = vector.shape_cast %274 : vector<1x64x64xbf16> to vector<64x64xbf16>
    %cst_111 = arith.constant 0.000000e+00 : f32
    %276 = vector.broadcast %cst_111 : f32 to vector<32x64xf32>
    %277 = vector.extract_strided_slice %273 {offsets = [0, 0], sizes = [32, 16], strides = [1, 1]} : vector<32x192xf32> to vector<32x16xf32>
    %278 = vector.shape_cast %277 : vector<32x16xf32> to vector<2x16x16xf32>
    %279 = vector.extract_strided_slice %273 {offsets = [0, 64], sizes = [32, 16], strides = [1, 1]} : vector<32x192xf32> to vector<32x16xf32>
    %280 = vector.shape_cast %279 : vector<32x16xf32> to vector<2x16x16xf32>
    %281 = vector.extract_strided_slice %273 {offsets = [0, 128], sizes = [32, 16], strides = [1, 1]} : vector<32x192xf32> to vector<32x16xf32>
    %282 = vector.shape_cast %281 : vector<32x16xf32> to vector<2x16x16xf32>
    %283 = arith.truncf %278 : vector<2x16x16xf32> to vector<2x16x16xbf16>
    %284 = arith.truncf %280 : vector<2x16x16xf32> to vector<2x16x16xbf16>
    %cst_112 = arith.constant dense<0.000000e+00> : vector<2x16x16xf32>
    %285 = tpu.matmul %283, %284, %cst_112 {dimension_numbers = #tpu.dot_dimension_numbers<[2], [2], [1], [1], [0, 0, 0, 1, 1, 1], [0], [0]>} : vector<2x16x16xbf16>, vector<2x16x16xbf16>, vector<2x16x16xf32> -> vector<2x16x16xf32>
    %cst_113 = arith.constant dense<0xFF800000> : vector<2x16xf32>
    %286 = vector.multi_reduction <maximumf>, %285, %cst_113 [2] : vector<2x16x16xf32> to vector<2x16xf32>
    %287 = vector.shape_cast %286 : vector<2x16xf32> to vector<2x16x1xf32>
    %288 = vector.broadcast %287 : vector<2x16x1xf32> to vector<2x16x16xf32>
    %289 = arith.subf %285, %288 : vector<2x16x16xf32>
    %290 = math.exp %289 : vector<2x16x16xf32>
    %cst_114 = arith.constant dense<0.000000e+00> : vector<2x16xf32>
    %291 = vector.multi_reduction <add>, %290, %cst_114 [2] : vector<2x16x16xf32> to vector<2x16xf32>
    %292 = vector.shape_cast %291 : vector<2x16xf32> to vector<2x16x1xf32>
    %293 = tpu.reciprocal %292 {approx = true} : vector<2x16x1xf32> -> vector<2x16x1xf32>
    %294 = vector.broadcast %293 : vector<2x16x1xf32> to vector<2x16x16xf32>
    %295 = arith.mulf %290, %294 : vector<2x16x16xf32>
    %296 = arith.truncf %295 : vector<2x16x16xf32> to vector<2x16x16xbf16>
    %297 = arith.truncf %282 : vector<2x16x16xf32> to vector<2x16x16xbf16>
    %cst_115 = arith.constant dense<0.000000e+00> : vector<2x16x16xf32>
    %298 = tpu.matmul %296, %297, %cst_115 {dimension_numbers = #tpu.dot_dimension_numbers<[2], [1], [1], [2], [0, 0, 0, 1, 1, 2], [0], [0]>} : vector<2x16x16xbf16>, vector<2x16x16xbf16>, vector<2x16x16xf32> -> vector<2x16x16xf32>
    %299 = vector.shape_cast %298 : vector<2x16x16xf32> to vector<32x16xf32>
    %300 = arith.truncf %299 : vector<32x16xf32> to vector<32x16xbf16>
    %301 = vector.extract_strided_slice %275 {offsets = [0, 0], sizes = [16, 64], strides = [1, 1]} : vector<64x64xbf16> to vector<16x64xbf16>
    %cst_116 = arith.constant dense<0.000000e+00> : vector<32x64xf32>
    %302 = tpu.matmul %300, %301, %cst_116 {dimension_numbers = #tpu.dot_dimension_numbers<[1], [0], [0], [1], [0, 0, 1, 1], [], []>} : vector<32x16xbf16>, vector<16x64xbf16>, vector<32x64xf32> -> vector<32x64xf32>
    %303 = arith.addf %276, %302 : vector<32x64xf32>
    %304 = vector.extract_strided_slice %273 {offsets = [0, 16], sizes = [32, 16], strides = [1, 1]} : vector<32x192xf32> to vector<32x16xf32>
    %305 = vector.shape_cast %304 : vector<32x16xf32> to vector<2x16x16xf32>
    %306 = vector.extract_strided_slice %273 {offsets = [0, 80], sizes = [32, 16], strides = [1, 1]} : vector<32x192xf32> to vector<32x16xf32>
    %307 = vector.shape_cast %306 : vector<32x16xf32> to vector<2x16x16xf32>
    %308 = vector.extract_strided_slice %273 {offsets = [0, 144], sizes = [32, 16], strides = [1, 1]} : vector<32x192xf32> to vector<32x16xf32>
    %309 = vector.shape_cast %308 : vector<32x16xf32> to vector<2x16x16xf32>
    %310 = arith.truncf %305 : vector<2x16x16xf32> to vector<2x16x16xbf16>
    %311 = arith.truncf %307 : vector<2x16x16xf32> to vector<2x16x16xbf16>
    %cst_117 = arith.constant dense<0.000000e+00> : vector<2x16x16xf32>
    %312 = tpu.matmul %310, %311, %cst_117 {dimension_numbers = #tpu.dot_dimension_numbers<[2], [2], [1], [1], [0, 0, 0, 1, 1, 1], [0], [0]>} : vector<2x16x16xbf16>, vector<2x16x16xbf16>, vector<2x16x16xf32> -> vector<2x16x16xf32>
    %cst_118 = arith.constant dense<0xFF800000> : vector<2x16xf32>
    %313 = vector.multi_reduction <maximumf>, %312, %cst_118 [2] : vector<2x16x16xf32> to vector<2x16xf32>
    %314 = vector.shape_cast %313 : vector<2x16xf32> to vector<2x16x1xf32>
    %315 = vector.broadcast %314 : vector<2x16x1xf32> to vector<2x16x16xf32>
    %316 = arith.subf %312, %315 : vector<2x16x16xf32>
    %317 = math.exp %316 : vector<2x16x16xf32>
    %cst_119 = arith.constant dense<0.000000e+00> : vector<2x16xf32>
    %318 = vector.multi_reduction <add>, %317, %cst_119 [2] : vector<2x16x16xf32> to vector<2x16xf32>
    %319 = vector.shape_cast %318 : vector<2x16xf32> to vector<2x16x1xf32>
    %320 = tpu.reciprocal %319 {approx = true} : vector<2x16x1xf32> -> vector<2x16x1xf32>
    %321 = vector.broadcast %320 : vector<2x16x1xf32> to vector<2x16x16xf32>
    %322 = arith.mulf %317, %321 : vector<2x16x16xf32>
    %323 = arith.truncf %322 : vector<2x16x16xf32> to vector<2x16x16xbf16>
    %324 = arith.truncf %309 : vector<2x16x16xf32> to vector<2x16x16xbf16>
    %cst_120 = arith.constant dense<0.000000e+00> : vector<2x16x16xf32>
    %325 = tpu.matmul %323, %324, %cst_120 {dimension_numbers = #tpu.dot_dimension_numbers<[2], [1], [1], [2], [0, 0, 0, 1, 1, 2], [0], [0]>} : vector<2x16x16xbf16>, vector<2x16x16xbf16>, vector<2x16x16xf32> -> vector<2x16x16xf32>
    %326 = vector.shape_cast %325 : vector<2x16x16xf32> to vector<32x16xf32>
    %327 = arith.truncf %326 : vector<32x16xf32> to vector<32x16xbf16>
    %328 = vector.extract_strided_slice %275 {offsets = [16, 0], sizes = [16, 64], strides = [1, 1]} : vector<64x64xbf16> to vector<16x64xbf16>
    %cst_121 = arith.constant dense<0.000000e+00> : vector<32x64xf32>
    %329 = tpu.matmul %327, %328, %cst_121 {dimension_numbers = #tpu.dot_dimension_numbers<[1], [0], [0], [1], [0, 0, 1, 1], [], []>} : vector<32x16xbf16>, vector<16x64xbf16>, vector<32x64xf32> -> vector<32x64xf32>
    %330 = arith.addf %303, %329 : vector<32x64xf32>
    %331 = vector.extract_strided_slice %273 {offsets = [0, 32], sizes = [32, 16], strides = [1, 1]} : vector<32x192xf32> to vector<32x16xf32>
    %332 = vector.shape_cast %331 : vector<32x16xf32> to vector<2x16x16xf32>
    %333 = vector.extract_strided_slice %273 {offsets = [0, 96], sizes = [32, 16], strides = [1, 1]} : vector<32x192xf32> to vector<32x16xf32>
    %334 = vector.shape_cast %333 : vector<32x16xf32> to vector<2x16x16xf32>
    %335 = vector.extract_strided_slice %273 {offsets = [0, 160], sizes = [32, 16], strides = [1, 1]} : vector<32x192xf32> to vector<32x16xf32>
    %336 = vector.shape_cast %335 : vector<32x16xf32> to vector<2x16x16xf32>
    %337 = arith.truncf %332 : vector<2x16x16xf32> to vector<2x16x16xbf16>
    %338 = arith.truncf %334 : vector<2x16x16xf32> to vector<2x16x16xbf16>
    %cst_122 = arith.constant dense<0.000000e+00> : vector<2x16x16xf32>
    %339 = tpu.matmul %337, %338, %cst_122 {dimension_numbers = #tpu.dot_dimension_numbers<[2], [2], [1], [1], [0, 0, 0, 1, 1, 1], [0], [0]>} : vector<2x16x16xbf16>, vector<2x16x16xbf16>, vector<2x16x16xf32> -> vector<2x16x16xf32>
    %cst_123 = arith.constant dense<0xFF800000> : vector<2x16xf32>
    %340 = vector.multi_reduction <maximumf>, %339, %cst_123 [2] : vector<2x16x16xf32> to vector<2x16xf32>
    %341 = vector.shape_cast %340 : vector<2x16xf32> to vector<2x16x1xf32>
    %342 = vector.broadcast %341 : vector<2x16x1xf32> to vector<2x16x16xf32>
    %343 = arith.subf %339, %342 : vector<2x16x16xf32>
    %344 = math.exp %343 : vector<2x16x16xf32>
    %cst_124 = arith.constant dense<0.000000e+00> : vector<2x16xf32>
    %345 = vector.multi_reduction <add>, %344, %cst_124 [2] : vector<2x16x16xf32> to vector<2x16xf32>
    %346 = vector.shape_cast %345 : vector<2x16xf32> to vector<2x16x1xf32>
    %347 = tpu.reciprocal %346 {approx = true} : vector<2x16x1xf32> -> vector<2x16x1xf32>
    %348 = vector.broadcast %347 : vector<2x16x1xf32> to vector<2x16x16xf32>
    %349 = arith.mulf %344, %348 : vector<2x16x16xf32>
    %350 = arith.truncf %349 : vector<2x16x16xf32> to vector<2x16x16xbf16>
    %351 = arith.truncf %336 : vector<2x16x16xf32> to vector<2x16x16xbf16>
    %cst_125 = arith.constant dense<0.000000e+00> : vector<2x16x16xf32>
    %352 = tpu.matmul %350, %351, %cst_125 {dimension_numbers = #tpu.dot_dimension_numbers<[2], [1], [1], [2], [0, 0, 0, 1, 1, 2], [0], [0]>} : vector<2x16x16xbf16>, vector<2x16x16xbf16>, vector<2x16x16xf32> -> vector<2x16x16xf32>
    %353 = vector.shape_cast %352 : vector<2x16x16xf32> to vector<32x16xf32>
    %354 = arith.truncf %353 : vector<32x16xf32> to vector<32x16xbf16>
    %355 = vector.extract_strided_slice %275 {offsets = [32, 0], sizes = [16, 64], strides = [1, 1]} : vector<64x64xbf16> to vector<16x64xbf16>
    %cst_126 = arith.constant dense<0.000000e+00> : vector<32x64xf32>
    %356 = tpu.matmul %354, %355, %cst_126 {dimension_numbers = #tpu.dot_dimension_numbers<[1], [0], [0], [1], [0, 0, 1, 1], [], []>} : vector<32x16xbf16>, vector<16x64xbf16>, vector<32x64xf32> -> vector<32x64xf32>
    %357 = arith.addf %330, %356 : vector<32x64xf32>
    %358 = vector.extract_strided_slice %273 {offsets = [0, 48], sizes = [32, 16], strides = [1, 1]} : vector<32x192xf32> to vector<32x16xf32>
    %359 = vector.shape_cast %358 : vector<32x16xf32> to vector<2x16x16xf32>
    %360 = vector.extract_strided_slice %273 {offsets = [0, 112], sizes = [32, 16], strides = [1, 1]} : vector<32x192xf32> to vector<32x16xf32>
    %361 = vector.shape_cast %360 : vector<32x16xf32> to vector<2x16x16xf32>
    %362 = vector.extract_strided_slice %273 {offsets = [0, 176], sizes = [32, 16], strides = [1, 1]} : vector<32x192xf32> to vector<32x16xf32>
    %363 = vector.shape_cast %362 : vector<32x16xf32> to vector<2x16x16xf32>
    %364 = arith.truncf %359 : vector<2x16x16xf32> to vector<2x16x16xbf16>
    %365 = arith.truncf %361 : vector<2x16x16xf32> to vector<2x16x16xbf16>
    %cst_127 = arith.constant dense<0.000000e+00> : vector<2x16x16xf32>
    %366 = tpu.matmul %364, %365, %cst_127 {dimension_numbers = #tpu.dot_dimension_numbers<[2], [2], [1], [1], [0, 0, 0, 1, 1, 1], [0], [0]>} : vector<2x16x16xbf16>, vector<2x16x16xbf16>, vector<2x16x16xf32> -> vector<2x16x16xf32>
    %cst_128 = arith.constant dense<0xFF800000> : vector<2x16xf32>
    %367 = vector.multi_reduction <maximumf>, %366, %cst_128 [2] : vector<2x16x16xf32> to vector<2x16xf32>
    %368 = vector.shape_cast %367 : vector<2x16xf32> to vector<2x16x1xf32>
    %369 = vector.broadcast %368 : vector<2x16x1xf32> to vector<2x16x16xf32>
    %370 = arith.subf %366, %369 : vector<2x16x16xf32>
    %371 = math.exp %370 : vector<2x16x16xf32>
    %cst_129 = arith.constant dense<0.000000e+00> : vector<2x16xf32>
    %372 = vector.multi_reduction <add>, %371, %cst_129 [2] : vector<2x16x16xf32> to vector<2x16xf32>
    %373 = vector.shape_cast %372 : vector<2x16xf32> to vector<2x16x1xf32>
    %374 = tpu.reciprocal %373 {approx = true} : vector<2x16x1xf32> -> vector<2x16x1xf32>
    %375 = vector.broadcast %374 : vector<2x16x1xf32> to vector<2x16x16xf32>
    %376 = arith.mulf %371, %375 : vector<2x16x16xf32>
    %377 = arith.truncf %376 : vector<2x16x16xf32> to vector<2x16x16xbf16>
    %378 = arith.truncf %363 : vector<2x16x16xf32> to vector<2x16x16xbf16>
    %cst_130 = arith.constant dense<0.000000e+00> : vector<2x16x16xf32>
    %379 = tpu.matmul %377, %378, %cst_130 {dimension_numbers = #tpu.dot_dimension_numbers<[2], [1], [1], [2], [0, 0, 0, 1, 1, 2], [0], [0]>} : vector<2x16x16xbf16>, vector<2x16x16xbf16>, vector<2x16x16xf32> -> vector<2x16x16xf32>
    %380 = vector.shape_cast %379 : vector<2x16x16xf32> to vector<32x16xf32>
    %381 = arith.truncf %380 : vector<32x16xf32> to vector<32x16xbf16>
    %382 = vector.extract_strided_slice %275 {offsets = [48, 0], sizes = [16, 64], strides = [1, 1]} : vector<64x64xbf16> to vector<16x64xbf16>
    %cst_131 = arith.constant dense<0.000000e+00> : vector<32x64xf32>
    %383 = tpu.matmul %381, %382, %cst_131 {dimension_numbers = #tpu.dot_dimension_numbers<[1], [0], [0], [1], [0, 0, 1, 1], [], []>} : vector<32x16xbf16>, vector<16x64xbf16>, vector<32x64xf32> -> vector<32x64xf32>
    %384 = arith.addf %357, %383 : vector<32x64xf32>
    %385 = arith.addf %239, %384 : vector<32x64xf32>
    %c1_132 = arith.constant 1 : index
    %c0_133 = arith.constant 0 : index
    %c0_134 = arith.constant 0 : index
    %386 = vector.load %arg8[%c1_132, %c0_133, %c0_134] : memref<2x1x64xf32, #tpu.memory_space<vmem>>, vector<1x1x64xf32>
    %387 = vector.shape_cast %386 : vector<1x1x64xf32> to vector<1x64xf32>
    %388 = vector.broadcast %387 : vector<1x64xf32> to vector<32x64xf32>
    %389 = arith.addf %385, %388 : vector<32x64xf32>
    %c1_135 = arith.constant 1 : index
    %c0_136 = arith.constant 0 : index
    %c0_137 = arith.constant 0 : index
    %390 = vector.load %arg9[%c1_135, %c0_136, %c0_137] : memref<2x1x64xf32, #tpu.memory_space<vmem>>, vector<1x1x64xf32>
    %391 = vector.shape_cast %390 : vector<1x1x64xf32> to vector<1x64xf32>
    %c1_138 = arith.constant 1 : index
    %c0_139 = arith.constant 0 : index
    %c0_140 = arith.constant 0 : index
    %392 = vector.load %arg10[%c1_138, %c0_139, %c0_140] : memref<2x1x64xf32, #tpu.memory_space<vmem>>, vector<1x1x64xf32>
    %393 = vector.shape_cast %392 : vector<1x1x64xf32> to vector<1x64xf32>
    %cst_141 = arith.constant dense<0.000000e+00> : vector<32xf32>
    %394 = vector.multi_reduction <add>, %389, %cst_141 [1] : vector<32x64xf32> to vector<32xf32>
    %395 = vector.shape_cast %394 : vector<32xf32> to vector<32x1xf32>
    %cst_142 = arith.constant 6.400000e+01 : f32
    %396 = vector.broadcast %cst_142 : f32 to vector<32x1xf32>
    %397 = arith.divf %395, %396 : vector<32x1xf32>
    %398 = vector.broadcast %397 : vector<32x1xf32> to vector<32x64xf32>
    %399 = arith.subf %389, %398 : vector<32x64xf32>
    %400 = arith.mulf %399, %399 : vector<32x64xf32>
    %cst_143 = arith.constant dense<0.000000e+00> : vector<32xf32>
    %401 = vector.multi_reduction <add>, %400, %cst_143 [1] : vector<32x64xf32> to vector<32xf32>
    %402 = vector.shape_cast %401 : vector<32xf32> to vector<32x1xf32>
    %cst_144 = arith.constant 6.400000e+01 : f32
    %403 = vector.broadcast %cst_144 : f32 to vector<32x1xf32>
    %404 = arith.divf %402, %403 : vector<32x1xf32>
    %405 = vector.broadcast %397 : vector<32x1xf32> to vector<32x64xf32>
    %406 = arith.subf %389, %405 : vector<32x64xf32>
    %cst_145 = arith.constant 9.99999974E-6 : f32
    %407 = vector.broadcast %cst_145 : f32 to vector<32x1xf32>
    %408 = arith.addf %404, %407 : vector<32x1xf32>
    %409 = math.rsqrt %408 : vector<32x1xf32>
    %410 = vector.broadcast %409 : vector<32x1xf32> to vector<32x64xf32>
    %411 = arith.mulf %406, %410 : vector<32x64xf32>
    %412 = vector.broadcast %391 : vector<1x64xf32> to vector<32x64xf32>
    %413 = arith.mulf %411, %412 : vector<32x64xf32>
    %414 = vector.broadcast %393 : vector<1x64xf32> to vector<32x64xf32>
    %415 = arith.addf %413, %414 : vector<32x64xf32>
    %416 = arith.truncf %415 : vector<32x64xf32> to vector<32x64xbf16>
    %c1_146 = arith.constant 1 : index
    %c0_147 = arith.constant 0 : index
    %c0_148 = arith.constant 0 : index
    %417 = vector.load %arg11[%c1_146, %c0_147, %c0_148] : memref<2x64x256xbf16, #tpu.memory_space<vmem>>, vector<1x64x256xbf16>
    %418 = vector.shape_cast %417 : vector<1x64x256xbf16> to vector<64x256xbf16>
    %cst_149 = arith.constant dense<0.000000e+00> : vector<32x256xf32>
    %419 = tpu.matmul %416, %418, %cst_149 {dimension_numbers = #tpu.dot_dimension_numbers<[1], [0], [0], [1], [0, 0, 1, 1], [], []>} : vector<32x64xbf16>, vector<64x256xbf16>, vector<32x256xf32> -> vector<32x256xf32>
    %c1_150 = arith.constant 1 : index
    %c0_151 = arith.constant 0 : index
    %c0_152 = arith.constant 0 : index
    %420 = vector.load %arg12[%c1_150, %c0_151, %c0_152] : memref<2x1x256xf32, #tpu.memory_space<vmem>>, vector<1x1x256xf32>
    %421 = vector.shape_cast %420 : vector<1x1x256xf32> to vector<1x256xf32>
    %422 = vector.broadcast %421 : vector<1x256xf32> to vector<32x256xf32>
    %423 = arith.addf %419, %422 : vector<32x256xf32>
    %cst_153 = arith.constant 5.000000e-01 : f32
    %424 = vector.broadcast %cst_153 : f32 to vector<32x256xf32>
    %425 = arith.mulf %424, %423 : vector<32x256xf32>
    %cst_154 = arith.constant 0.707106769 : f32
    %426 = vector.broadcast %cst_154 : f32 to vector<32x256xf32>
    %427 = arith.mulf %423, %426 : vector<32x256xf32>
    %cst_155 = arith.constant 0.000000e+00 : f32
    %428 = vector.broadcast %cst_155 : f32 to vector<32x256xf32>
    %429 = arith.cmpf oge, %427, %428 : vector<32x256xf32>
    %cst_156 = arith.constant 1.000000e+00 : f32
    %cst_157 = arith.constant -1.000000e+00 : f32
    %430 = vector.broadcast %cst_156 : f32 to vector<32x256xf32>
    %431 = vector.broadcast %cst_157 : f32 to vector<32x256xf32>
    %432 = arith.select %429, %430, %431 : vector<32x256xi1>, vector<32x256xf32>
    %433 = math.absf %427 : vector<32x256xf32>
    %cst_158 = arith.constant 0.327591091 : f32
    %434 = vector.broadcast %cst_158 : f32 to vector<32x256xf32>
    %435 = arith.mulf %434, %433 : vector<32x256xf32>
    %cst_159 = arith.constant 1.000000e+00 : f32
    %436 = vector.broadcast %cst_159 : f32 to vector<32x256xf32>
    %437 = arith.addf %436, %435 : vector<32x256xf32>
    %cst_160 = arith.constant 1.000000e+00 : f32
    %438 = vector.broadcast %cst_160 : f32 to vector<32x256xf32>
    %439 = arith.divf %438, %437 : vector<32x256xf32>
    %cst_161 = arith.constant 1.06140542 : f32
    %440 = vector.broadcast %cst_161 : f32 to vector<32x256xf32>
    %441 = arith.mulf %440, %439 : vector<32x256xf32>
    %cst_162 = arith.constant -1.45315206 : f32
    %442 = vector.broadcast %cst_162 : f32 to vector<32x256xf32>
    %443 = arith.addf %441, %442 : vector<32x256xf32>
    %444 = arith.mulf %443, %439 : vector<32x256xf32>
    %cst_163 = arith.constant 1.42141378 : f32
    %445 = vector.broadcast %cst_163 : f32 to vector<32x256xf32>
    %446 = arith.addf %444, %445 : vector<32x256xf32>
    %447 = arith.mulf %446, %439 : vector<32x256xf32>
    %cst_164 = arith.constant -0.284496725 : f32
    %448 = vector.broadcast %cst_164 : f32 to vector<32x256xf32>
    %449 = arith.addf %447, %448 : vector<32x256xf32>
    %450 = arith.mulf %449, %439 : vector<32x256xf32>
    %cst_165 = arith.constant 0.254829586 : f32
    %451 = vector.broadcast %cst_165 : f32 to vector<32x256xf32>
    %452 = arith.addf %450, %451 : vector<32x256xf32>
    %453 = arith.mulf %452, %439 : vector<32x256xf32>
    %cst_166 = arith.constant 0.000000e+00 : f32
    %454 = vector.broadcast %cst_166 : f32 to vector<32x256xf32>
    %455 = arith.subf %454, %433 : vector<32x256xf32>
    %456 = arith.mulf %455, %433 : vector<32x256xf32>
    %457 = math.exp %456 : vector<32x256xf32>
    %458 = arith.mulf %453, %457 : vector<32x256xf32>
    %cst_167 = arith.constant 1.000000e+00 : f32
    %459 = vector.broadcast %cst_167 : f32 to vector<32x256xf32>
    %460 = arith.subf %459, %458 : vector<32x256xf32>
    %461 = arith.mulf %432, %460 : vector<32x256xf32>
    %cst_168 = arith.constant 1.000000e+00 : f32
    %462 = vector.broadcast %cst_168 : f32 to vector<32x256xf32>
    %463 = arith.addf %462, %461 : vector<32x256xf32>
    %464 = arith.mulf %425, %463 : vector<32x256xf32>
    %465 = arith.truncf %464 : vector<32x256xf32> to vector<32x256xbf16>
    %c1_169 = arith.constant 1 : index
    %c0_170 = arith.constant 0 : index
    %c0_171 = arith.constant 0 : index
    %466 = vector.load %arg13[%c1_169, %c0_170, %c0_171] : memref<2x256x64xbf16, #tpu.memory_space<vmem>>, vector<1x256x64xbf16>
    %467 = vector.shape_cast %466 : vector<1x256x64xbf16> to vector<256x64xbf16>
    %cst_172 = arith.constant dense<0.000000e+00> : vector<32x64xf32>
    %468 = tpu.matmul %465, %467, %cst_172 {dimension_numbers = #tpu.dot_dimension_numbers<[1], [0], [0], [1], [0, 0, 1, 1], [], []>} : vector<32x256xbf16>, vector<256x64xbf16>, vector<32x64xf32> -> vector<32x64xf32>
    %c1_173 = arith.constant 1 : index
    %c0_174 = arith.constant 0 : index
    %c0_175 = arith.constant 0 : index
    %469 = vector.load %arg14[%c1_173, %c0_174, %c0_175] : memref<2x1x64xf32, #tpu.memory_space<vmem>>, vector<1x1x64xf32>
    %470 = vector.shape_cast %469 : vector<1x1x64xf32> to vector<1x64xf32>
    %471 = vector.broadcast %470 : vector<1x64xf32> to vector<32x64xf32>
    %472 = arith.addf %468, %471 : vector<32x64xf32>
    %473 = arith.addf %389, %472 : vector<32x64xf32>
    %c0_176 = arith.constant 0 : index
    %c0_177 = arith.constant 0 : index
    %474 = vector.load %arg15[%c0_176, %c0_177] : memref<1x64xf32, #tpu.memory_space<vmem>>, vector<1x64xf32>
    %c0_178 = arith.constant 0 : index
    %c0_179 = arith.constant 0 : index
    %475 = vector.load %arg16[%c0_178, %c0_179] : memref<1x64xf32, #tpu.memory_space<vmem>>, vector<1x64xf32>
    %cst_180 = arith.constant dense<0.000000e+00> : vector<32xf32>
    %476 = vector.multi_reduction <add>, %473, %cst_180 [1] : vector<32x64xf32> to vector<32xf32>
    %477 = vector.shape_cast %476 : vector<32xf32> to vector<32x1xf32>
    %cst_181 = arith.constant 6.400000e+01 : f32
    %478 = vector.broadcast %cst_181 : f32 to vector<32x1xf32>
    %479 = arith.divf %477, %478 : vector<32x1xf32>
    %480 = vector.broadcast %479 : vector<32x1xf32> to vector<32x64xf32>
    %481 = arith.subf %473, %480 : vector<32x64xf32>
    %482 = arith.mulf %481, %481 : vector<32x64xf32>
    %cst_182 = arith.constant dense<0.000000e+00> : vector<32xf32>
    %483 = vector.multi_reduction <add>, %482, %cst_182 [1] : vector<32x64xf32> to vector<32xf32>
    %484 = vector.shape_cast %483 : vector<32xf32> to vector<32x1xf32>
    %cst_183 = arith.constant 6.400000e+01 : f32
    %485 = vector.broadcast %cst_183 : f32 to vector<32x1xf32>
    %486 = arith.divf %484, %485 : vector<32x1xf32>
    %487 = vector.broadcast %479 : vector<32x1xf32> to vector<32x64xf32>
    %488 = arith.subf %473, %487 : vector<32x64xf32>
    %cst_184 = arith.constant 9.99999974E-6 : f32
    %489 = vector.broadcast %cst_184 : f32 to vector<32x1xf32>
    %490 = arith.addf %486, %489 : vector<32x1xf32>
    %491 = math.rsqrt %490 : vector<32x1xf32>
    %492 = vector.broadcast %491 : vector<32x1xf32> to vector<32x64xf32>
    %493 = arith.mulf %488, %492 : vector<32x64xf32>
    %494 = vector.broadcast %474 : vector<1x64xf32> to vector<32x64xf32>
    %495 = arith.mulf %493, %494 : vector<32x64xf32>
    %496 = vector.broadcast %475 : vector<1x64xf32> to vector<32x64xf32>
    %497 = arith.addf %495, %496 : vector<32x64xf32>
    %c0_185 = arith.constant 0 : index
    %c0_186 = arith.constant 0 : index
    %498 = vector.load %arg17[%c0_185, %c0_186] : memref<32x64xf32, #tpu.memory_space<vmem>>, vector<32x64xf32>
    tpu.vector_store %arg17[%c0_185, %c0_186], %497 {strides = array<i32>} : memref<32x64xf32, #tpu.memory_space<vmem>>, vector<32x64xf32>,
    return
  }
}

</mosaic_0001>

<bundles_post_ra>
// kernel: _lambda_.1
= control target key start
LH: loop header
LB: loop body
LE: loop exit
PB: predicated region body
PF: predicated region fallthrough
CT: control target
= control target key end

     0   :  { %s6768_s0 = inlined_call_operand.vmem [shape: f32[32,192], index: 0, kind: input, shape index: {}]   ;;  %s6769_s1 = inlined_call_operand.vmem [shape: f32[32,64], index: 1, kind: input, shape index: {}]   ;;  %s6770_s2 = inlined_call_operand.vmem [shape: bf16[192,64], index: 2, kind: input, shape index: {}]   ;;  %s6771_s3 = inlined_call_operand.vmem [shape: f32[2,1,64], index: 3, kind: input, shape index: {}, may-alias: {3,9}]   ;;  %s6772_s4 = inlined_call_operand.vmem [shape: f32[2,1,64], index: 4, kind: input, shape index: {}, may-alias: {4,8,10,14}]   ;;  %s6773_s5 = inlined_call_operand.vmem [shape: bf16[2,64,192], index: 5, kind: input, shape index: {}]   ;;  %s6774_s6 = inlined_call_operand.vmem [shape: f32[2,1,192], index: 6, kind: input, shape index: {}]   ;;  %s6775_s7 = inlined_call_operand.vmem [shape: bf16[2,64,64], index: 7, kind: input, shape index: {}]   ;;  %s6776_s8 = inlined_call_operand.vmem [shape: f32[2,1,64], index: 8, kind: input, shape index: {}, may-alias: {4,8,10,14}]   ;;  %s6777_s9 = inlined_call_operand.vmem [shape: f32[2,1,64], index: 9, kind: input, shape index: {}, may-alias: {3,9}]   ;;  %s6778_s10 = inlined_call_operand.vmem [shape: f32[2,1,64], index: 10, kind: input, shape index: {}, may-alias: {4,8,10,14}]   ;;  %s6779_s11 = inlined_call_operand.vmem [shape: bf16[2,64,256], index: 11, kind: input, shape index: {}]   ;;  %s6780_s12 = inlined_call_operand.vmem [shape: f32[2,1,256], index: 12, kind: input, shape index: {}]   ;;  %s6781_s13 = inlined_call_operand.vmem [shape: bf16[2,256,64], index: 13, kind: input, shape index: {}]   ;;  %s6782_s14 = inlined_call_operand.vmem [shape: f32[2,1,64], index: 14, kind: input, shape index: {}, may-alias: {4,8,10,14}]   ;;  %s6783_s15 = inlined_call_operand.vmem [shape: f32[1,64], index: 15, kind: input, shape index: {}]   ;;  %s6784_s16 = inlined_call_operand.vmem [shape: f32[1,64], index: 16, kind: input, shape index: {}]   ;;  %s6785_s17 = inlined_call_operand.hbm [shape: f32[32,64], index: 17, kind: output, shape index: {}]  }
   0x1   :  { %6790 = sst [smem:[#allocation5_spill]] %s6768_s0 }
   0x2   :  { %6791 = sst [smem:[#allocation6_spill]] %s6769_s1 }
   0x3   :  { %v5054_v0 = vld [vmem:[%s6770_s2 + $0x38] sm:$0xff]   ;;  %v5408_v1 = vmov 0   ;;  %v5055_v2 = vld [vmem:[%s6770_s2 + $0x30] sm:$0xff]   ;;  %v5056_v3 = vld [vmem:[%s6770_s2 + $0x28] sm:$0xff]   ;;  %s6792_s1 = sld [smem:[#allocation5_spill]]  ;;  %vm170_vm0 = vcmask 523264  }
   0x4   :  { %177 = vmatprep.subr.bf16.mxu0 %v5408_v1  ;;  %411 = vmatprep.mubr.bf16.mxu1 %v5408_v1  ;;  %v5057_v4 = vld [vmem:[%s6770_s2 + $0x20] sm:$0xff]   ;;  %v5058_v8 = vld [vmem:[%s6770_s2 + $0x18] sm:$0xff]   ;;  %v5059_v9 = vld [vmem:[%s6770_s2 + $0x10] sm:$0xff]  }
   0x5   :  { %178 = vmatpush1.bf16.msra.mxu0 %v5054_v0  ;;  %v5060_v10 = vld [vmem:[%s6770_s2 + $0x8] sm:$0xff]   ;;  %v5061_v11 = vld [vmem:[%s6770_s2] sm:$0xff]   ;;  %v5062_v12 = vld [vmem:[%s6770_s2 + $0x58] sm:$0xff]  }
   0x6   :  { %179 = vmatprep.subr.bf16.mxu0 %v5408_v1  ;;  %v5063_v13 = vld [vmem:[%s6770_s2 + $0x50] sm:$0xff]   ;;  %v5064_v14 = vld [vmem:[%s6770_s2 + $0x48] sm:$0xff]   ;;  %v5065_v15 = vld [vmem:[%s6770_s2 + $0x40] sm:$0xff]  }
   0x9   :  { %180 = vmatpush1.bf16.msra.mxu0 %v5055_v2  ;;  %v59_v5 = vld [vmem:[%s6792_s1 + $0x8] sm:$0xff]  ;;  %v61_v6 = vld [vmem:[%s6792_s1 + $0x18] sm:$0xff]  ;;  %v58_v16 = vld [vmem:[%s6792_s1] sm:$0xff] }
   0xa   :  { %181 = vmatprep.subr.bf16.mxu0 %v5408_v1  ;;  %v67_v7 = vpack.c.bf16 %v61_v6, %v59_v5  ;;  %v60_v17 = vld [vmem:[%s6792_s1 + $0x10] sm:$0xff]  ;;  %v63_v18 = vld [vmem:[%s6792_s1 + $0x28] sm:$0xff]  ;;  %v65_v19 = vld [vmem:[%s6792_s1 + $0x38] sm:$0xff] }
   0xb   :  { %v66_v20 = vpack.c.bf16 %v60_v17, %v58_v16  ;;  %v69_v21 = vpack.c.bf16 %v65_v19, %v63_v18  ;;  %v62_v22 = vld [vmem:[%s6792_s1 + $0x20] sm:$0xff]  ;;  %v64_v23 = vld [vmem:[%s6792_s1 + $0x30] sm:$0xff] }
   0xc   :  { %4440 = vmatprep.mubr.msk.bf16.mxu0 %vm170_vm0, %v67_v7 }
   0xd   :  { %182 = vmatpush1.bf16.msra.mxu0 %v5056_v3 }
   0xe   :  { %183 = vmatprep.subr.bf16.mxu0 %v5408_v1 }
  0x11   :  { %184 = vmatpush1.bf16.msra.mxu0 %v5057_v4 }
  0x12   :  { %185 = vmatprep.subr.bf16.mxu0 %v5408_v1 }
  0x15   :  { %186 = vmatpush1.bf16.msra.mxu0 %v5058_v8 }
  0x16   :  { %187 = vmatprep.subr.bf16.mxu0 %v5408_v1 }
  0x19   :  { %188 = vmatpush1.bf16.msra.mxu0 %v5059_v9 }
  0x1a   :  { %189 = vmatprep.subr.bf16.mxu0 %v5408_v1 }
  0x1d   :  { %190 = vmatpush1.bf16.msra.mxu0 %v5060_v10 }
  0x1e   :  { %191 = vmatprep.subr.bf16.mxu0 %v5408_v1 }
  0x21   :  { %192 = vmatpush1.bf16.msra.mxu0 %v5061_v11 }
  0x22   :  { %201 = vmatprep.subr.bf16.mxu0 %v5408_v1 }
  0x25   :  { %202 = vmatpush2.bf16.msra.mxu0 %v5062_v12 }
  0x26   :  { %203 = vmatprep.subr.bf16.mxu0 %v5408_v1 }
  0x29   :  { %204 = vmatpush2.bf16.msra.mxu0 %v5063_v13 }
  0x2a   :  { %205 = vmatprep.subr.bf16.mxu0 %v5408_v1 }
  0x2d   :  { %206 = vmatpush2.bf16.msra.mxu0 %v5064_v14 }
  0x2e   :  { %207 = vmatprep.subr.bf16.mxu0 %v5408_v1 }
  0x31   :  { %208 = vmatpush2.bf16.msra.mxu0 %v5065_v15 }
  0x34   :  { %210 = vmatmul.mubr.bf16.vlgmr.msra.gmra.mxu0 %v66_v20 }
  0x35   :  { %4441 = vmatprep.mubr.msk.bf16.mxu0 %vm170_vm0, %v69_v21 }
  0x36   :  { %22 = vsyncpa [#allocation3], 0  ;;  %v68_v24 = vpack.c.bf16 %v64_v23, %v62_v22  ;;  %s6793_s23 = sld [smem:[#allocation6_spill]]  ;;  %v5068_v2 = vld [vmem:[%s6773_s5 + $0x34] ss:$8 sps:$4 sm:$0xff]   ;;  %vm5410_vm1 = vmmov 0  }
  0x37   :  { %v5066_v3 = vld [vmem:[%s6773_s5 + $0x30] ss:$8 sps:$4 sm:$0xff]   ;;  %377 = vmatprep.subr.bf16.mxu0 %v5068_v2  ;;  %5032 = vmatprep.subr.bf16.mxu1 %v5068_v2  ;;  %v5071_v4 = vld [vmem:[%s6773_s5 + $0x24] ss:$8 sps:$4 sm:$0xff]   ;;  %v5069_v5 = vld [vmem:[%s6773_s5 + $0x20] ss:$8 sps:$4 sm:$0xff]  }
  0x38   :  { %378 = vmatpush1.bf16.msra.mxu0 %v5066_v3  ;;  %5036 = vmatpush1.bf16.msra.mxu1 %v5066_v3  ;;  %v5074_v6 = vld [vmem:[%s6773_s5 + $0x14] ss:$8 sps:$4 sm:$0xff]   ;;  %v5072_v7 = vld [vmem:[%s6773_s5 + $0x10] ss:$8 sps:$4 sm:$0xff]   ;;  %v5075_v8 = vld [vmem:[%s6773_s5] ss:$8 sps:$4 sm:$0xff]  }
  0x39   :  { %379 = vmatprep.subr.bf16.mxu0 %v5071_v4  ;;  %5033 = vmatprep.subr.bf16.mxu1 %v5071_v4  ;;  %v5077_v9 = vld [vmem:[%s6773_s5 + $0x4] ss:$8 sps:$4 sm:$0xff]   ;;  %s5411_s20 = smov 64   ;;  %vm435_vm2 = vcmask 130048   ;;  %s5412_s21 = smov 48  }
  0x3a   :  { %s5413_s22 = smov 112   ;;  %s5415_s24 = smov 96  }
  0x3b   :  { %s5416_s28 = smov 16   ;;  %s6788_s29 = smov 80  }
  0x3c   :  { %218 = vmatmul.mubr.bf16.gmra.mxu0 %v68_v24  ;;  %v94_v25 = vld [vmem:[%s6793_s23] sm:$0xff]  ;;  %v95_v29 = vld [vmem:[%s6793_s23 + $0x8] sm:$0xff]  ;;  %v96_v34 = vld [vmem:[%s6793_s23 + $0x10] sm:$0xff]  ;;  %5037 = vmatpush1.bf16.msra.mxu1 %v5069_v5 }
  0x3d   :  { %401 = vmatprep.mubr.bf16.mxu0 %v5408_v1  ;;  %v97_v39 = vld [vmem:[%s6793_s23 + $0x18] sm:$0xff]  ;;  %380 = vmatpush1.bf16.msra.mxu0 %v5069_v5  ;;  %v4442_v24 = vld [vmem:[%s6771_s3] ss:$0 sm:$0xff]  ;;  %s5414_s23 = smov 32  }
  0x3e   :  { %381 = vmatprep.subr.bf16.mxu0 %v5074_v6  ;;  %5034 = vmatprep.subr.bf16.mxu1 %v5074_v6 }
  0x40   :  { %5038 = vmatpush1.bf16.msra.mxu1 %v5072_v7 }
  0x41   :  { %382 = vmatpush1.bf16.msra.mxu0 %v5072_v7  ;;  %5035 = vmatprep.subr.bf16.mxu1 %v5077_v9 }
  0x42   :  { %383 = vmatprep.subr.bf16.mxu0 %v5077_v9 }
  0x44   :  { %5039 = vmatpush1.bf16.msra.mxu1 %v5075_v8 }
  0x45   :  { %384 = vmatpush1.bf16.msra.mxu0 %v5075_v8 }
  0xf4   :  { %v211_v26 = vpop.f32.mrf.mxu0 }
  0xf5   :  { %v5591_v27 = vadd.f32 %v211_v26, %v94_v25 }
  0xf6   :  { %v213_v28 = vpop.f32.mrf.mxu0 }
  0xf7   :  { %v228_v30 = vsel %vm170_vm0, %v5591_v27, 0.0 }
  0xf8   :  { %v214_v31 = vpop.f32.mrf.mxu0  ;;  %229 = vadd.xlane.f32.xlu0 %v228_v30 }
  0xf9   :  { %v5598_v32 = vadd.f32 %v214_v31, %v95_v29  ;;  %v4443_v29 = vld [vmem:[%s6772_s4] ss:$0 sm:$0xff] }
  0xfa   :  { %v216_v33 = vpop.f32.mrf.mxu0 }
  0xfb   :  { %v231_v35 = vsel %vm170_vm0, %v5598_v32, 0.0 }
  0xfc   :  { %v219_v36 = vpop.f32.mrf.mxu0  ;;  %232 = vadd.xlane.f32.xlu0 %v231_v35 }
  0xfd   :  { %v5605_v37 = vadd.f32 %v219_v36, %v96_v34 }
  0xfe   :  { %v221_v38 = vpop.f32.mrf.mxu0 }
  0xff   :  { %v234_v40 = vsel %vm170_vm0, %v5605_v37, 0.0 }
 0x100   :  { %v222_v41 = vpop.f32.mrf.mxu0  ;;  %235 = vadd.xlane.f32.xlu1 %v234_v40 }
 0x101   :  { %v5612_v42 = vadd.f32 %v222_v41, %v97_v39 }
 0x102   :  { %v224_v43 = vpop.f32.mrf.mxu0 }
 0x103   :  { %v237_v44 = vsel %vm170_vm0, %v5612_v42, 0.0 }
 0x104   :  { %238 = vadd.xlane.f32.xlu1 %v237_v44 }
 0x181   :  { %v230_v45 = vpop.xlane.xlu0 %229 }
 0x182   :  { %v241_v46 = vmul.f32 0.015625, %v230_v45 }
 0x184   :  { %v5617_v47 = vsub.f32 %v5591_v27, %v241_v46  ;;  %v313_v46 = vlaneseq }
 0x185   :  { %v233_v48 = vpop.xlane.xlu0 %232 }
 0x186   :  { %v242_v49 = vmul.f32 0.015625, %v233_v48  ;;  %v249_v50 = vmul.f32 %v5617_v47, %v5617_v47  ;;  %v5409_v48 = vmov 0.0  }
 0x187   :  { %4792 = vmatprep.subr.bf16.mxu1 %v5409_v48  ;;  %4816 = vmatprep.subr.bf16.mxu0 %v5409_v48 }
 0x188   :  { %v5622_v51 = vsub.f32 %v5598_v32, %v242_v49  ;;  %v253_v52 = vsel %vm170_vm0, %v249_v50, 0.0  ;;  %v311_v50 = vld [vmem:[%s6774_s6] sm:$0x3] }
 0x189   :  { %v236_v53 = vpop.xlane.xlu1 %235  ;;  %254 = vadd.xlane.f32.xlu0 %v253_v52 }
 0x18a   :  { %v243_v54 = vmul.f32 0.015625, %v236_v53  ;;  %v250_v55 = vmul.f32 %v5622_v51, %v5622_v51 }
 0x18c   :  { %v5628_v56 = vsub.f32 %v5605_v37, %v243_v54  ;;  %v256_v57 = vsel %vm170_vm0, %v250_v55, 0.0 }
 0x18d   :  { %v239_v58 = vpop.xlane.xlu1 %238  ;;  %257 = vadd.xlane.f32.xlu1 %v256_v57 }
 0x18e   :  { %v244_v59 = vmul.f32 0.015625, %v239_v58  ;;  %v251_v60 = vmul.f32 %v5628_v56, %v5628_v56 }
 0x190   :  { %v248_v61 = vsub.f32 %v5612_v42, %v244_v59  ;;  %v259_v62 = vsel %vm170_vm0, %v251_v60, 0.0 }
 0x191   :  { %260 = vadd.xlane.f32.xlu0 %v259_v62 }
 0x192   :  { %v252_v63 = vmul.f32 %v248_v61, %v248_v61 }
 0x194   :  { %v262_v0 = vsel %vm170_vm0, %v252_v63, 0.0 }
 0x195   :  { %263 = vadd.xlane.f32.xlu1 %v262_v0 }
 0x212   :  { %v255_v10 = vpop.xlane.xlu0 %254 }
 0x213   :  { %v265_v11 = vmul.f32 0.015625, %v255_v10 }
 0x215   :  { %v269_v12 = vadd.f32 1e-05, %v265_v11 }
 0x216   :  { %v258_v13 = vpop.xlane.xlu1 %257 }
 0x217   :  { %5154 = vrsqrt.f32 %v269_v12  ;;  %v266_v14 = vmul.f32 0.015625, %v258_v13 }
 0x219   :  { %v270_v15 = vadd.f32 1e-05, %v266_v14 }
 0x21a   :  { %v261_v16 = vpop.xlane.xlu0 %260 }
 0x21b   :  { %5156 = vrsqrt.f32 %v270_v15  ;;  %v267_v17 = vmul.f32 0.015625, %v261_v16 }
 0x21d   :  { %v271_v18 = vadd.f32 1e-05, %v267_v17 }
 0x21e   :  { %v264_v19 = vpop.xlane.xlu1 %263 }
 0x21f   :  { %5158 = vrsqrt.f32 %v271_v18  ;;  %v268_v20 = vmul.f32 0.015625, %v264_v19 }
 0x221   :  { %v272_v21 = vadd.f32 1e-05, %v268_v20 }
 0x223   :  { %5160 = vrsqrt.f32 %v272_v21 }
 0x224   :  { %v5155_v22 = vpop.eup %5154 }
 0x225   :  { %v277_v23 = vmul.f32 %v5155_v22, %v5617_v47  ;;  %v314_v47 = vshrl.u32 %v313_v46, 7 }
 0x227   :  { %v287_v26 = vmul.f32 %v4442_v24, %v277_v23  ;;  %v5673_v49 = vsub.s32 0, %v314_v47 }
 0x228   :  { %v5157_v25 = vpop.eup %5156 }
 0x229   :  { %v278_v28 = vmul.f32 %v5157_v25, %v5622_v51  ;;  %v297_v33 = vadd.f32 %v4443_v29, %v287_v26  ;;  %v316_v52 = vrot.slane %v311_v50, %v5673_v49 }
 0x22b   :  { %v288_v30 = vmul.f32 %v4442_v24, %v278_v28 }
 0x22c   :  { %v5159_v31 = vpop.eup %5158 }
 0x22d   :  { %v298_v34 = vadd.f32 %v4443_v29, %v288_v30  ;;  %v279_v35 = vmul.f32 %v5159_v31, %v5628_v56  ;;  %v5683_v56 = vsub.s32 1, %v314_v47 }
 0x22f   :  { %v301_v36 = vpack.c.bf16 %v298_v34, %v297_v33  ;;  %v289_v40 = vmul.f32 %v4442_v24, %v279_v35  ;;  %v320_v60 = vrot.slane %v311_v50, %v5683_v56 }
 0x230   :  { %v5161_v38 = vpop.eup %5160 }
 0x231   :  { %4452 = vmatmul.mubr.msk.bf16.vlgmr.msra.gmra.mxu0 %vm170_vm0, %v301_v36  ;;  %v280_v39 = vmul.f32 %v5161_v38, %v248_v61  ;;  %v299_v43 = vadd.f32 %v4443_v29, %v289_v40 }
 0x232   :  { %4818 = vmatprep.mubr.msk.bf16.mxu0 %vm5410_vm1, %v5409_v48 }
 0x233   :  { %v290_v41 = vmul.f32 %v4442_v24, %v280_v39 }
 0x235   :  { %v300_v44 = vadd.f32 %v4443_v29, %v290_v41 }
 0x237   :  { %v302_v45 = vpack.c.bf16 %v300_v44, %v299_v43 }
 0x239   :  { %4453 = vmatmul.mubr.msk.bf16.vlgmr.msra.gmra.mxu1 %vm170_vm0, %v302_v45 }
 0x23a   :  { %4794 = vmatprep.mubr.msk.bf16.mxu1 %vm5410_vm1, %v5409_v48 }
 0x2f1   :  { %v403_v51 = vpop.f32.mrf.mxu0 }
 0x2f2   :  { %v404_v55 = vadd.f32 %v403_v51, %v316_v52 }
 0x2f3   :  { %v405_v53 = vpop.f32.mrf.mxu0 }
 0x2f4   :  { %v406_v13 = vadd.f32 %v405_v53, %v320_v60 }
 0x2f5   :  { %v407_v54 = vpop.f32.mrf.mxu0 }
 0x2f6   :  { %v408_v57 = vadd.f32 %v407_v54, %v316_v52 }
 0x2f7   :  { %v409_v10 = vpop.f32.mrf.mxu0 }
 0x2f8   :  { %v5685_v58 = vpack.c.bf16 %v408_v57, %v404_v55  ;;  %v410_v12 = vadd.f32 %v409_v10, %v320_v60 }
 0x2f9   :  { %v413_v59 = vpop.f32.mrf.mxu1 }
 0x2fa   :  { %433 = vrot.lane.b32.xlu0 %v5685_v58, %s5411_s20  ;;  %v414_v0 = vadd.f32 %v413_v59, %v316_v52  ;;  %v5704_v14 = vpack.c.bf16 %v410_v12, %v406_v13 }
 0x2fb   :  { %v415_v61 = vpop.f32.mrf.mxu1 }
 0x2fc   :  { %v416_v62 = vadd.f32 %v415_v61, %v320_v60 }
 0x2fd   :  { %v417_v63 = vpop.f32.mrf.mxu1 }
 0x2fe   :  { %v418_v2 = vadd.f32 %v417_v63, %v316_v52 }
 0x2ff   :  { %v419_v3 = vpop.f32.mrf.mxu1 }
 0x300   :  { %v5690_v4 = vpack.c.bf16 %v418_v2, %v414_v0  ;;  %v420_v5 = vadd.f32 %v419_v3, %v320_v60 }
 0x302   :  { %v5692_v6 = vpack.c.bf16 %v420_v5, %v416_v62  ;;  %484 = vrot.lane.b32.xlu1 %v5690_v4, %s5411_s20 }
 0x36c   :  { %v434_v7 = vpop.permute.xlu0 %433 }
 0x36d   :  { %v440_v8 = vsel %vm435_vm2, %v434_v7, 0 }
 0x36e   :  { %4793 = vmatpush3.bf16.xpose.msra.mxu1 %v440_v8 }
 0x36f   :  { %4798 = vmatprep.subr.bf16.mxu1 %v5409_v48 }
 0x374   :  { %v485_v9 = vpop.permute.xlu1 %484 }
 0x375   :  { %v490_v11 = vsel %vm435_vm2, %v485_v9, 0  ;;  %4795 = vmatmul.mubr.msk.bf16.vlgmr.msra.gmra.mxu1 %vm435_vm2, %v5685_v58 }
 0x376   :  { %4799 = vmatpush3.bf16.xpose.msra.mxu1 %v490_v11  ;;  %4800 = vmatprep.mubr.msk.bf16.mxu1 %vm5410_vm1, %v5409_v48 }
 0x377   :  { %4804 = vmatprep.subr.bf16.mxu1 %v5409_v48 }
 0x37d   :  { %4801 = vmatmul.mubr.msk.bf16.vlgmr.msra.gmra.mxu1 %vm435_vm2, %v5690_v4 }
 0x37e   :  { %4805 = vmatpush3.bf16.msra.mxu1 %v5704_v14  ;;  %4806 = vmatprep.mubr.msk.bf16.mxu1 %vm5410_vm1, %v5409_v48 }
 0x37f   :  { %4810 = vmatprep.subr.bf16.mxu1 %v5409_v48 }
 0x435   :  { %v476_v15 = vpop.f32.mrf.mxu1 }
 0x436   :  { %v533_v16 = vsel %vm435_vm2, %v476_v15, -inf }
 0x437   :  { %534 = vmax.xlane.f32.xlu1 %v533_v16  ;;  %v4796_v17 = vpop.f32.mrf.mxu1 }
 0x439   :  { %v479_v18 = vpop.f32.mrf.mxu1 }
 0x43a   :  { %v536_v19 = vsel %vm435_vm2, %v479_v18, -inf }
 0x43b   :  { %537 = vmax.xlane.f32.xlu0 %v536_v19  ;;  %v4797_v20 = vpop.f32.mrf.mxu1 }
 0x43d   :  { %v526_v21 = vpop.f32.mrf.mxu1 }
 0x43e   :  { %v539_v22 = vsel %vm435_vm2, %v526_v21, -inf }
 0x43f   :  { %540 = vmax.xlane.f32.xlu0 %v539_v22  ;;  %v4802_v23 = vpop.f32.mrf.mxu1 }
 0x441   :  { %v529_v24 = vpop.f32.mrf.mxu1 }
 0x442   :  { %v542_v25 = vsel %vm435_vm2, %v529_v24, -inf }
 0x443   :  { %543 = vmax.xlane.f32.xlu1 %v542_v25  ;;  %v4803_v26 = vpop.f32.mrf.mxu1 }
 0x4c0   :  { %v535_v28 = vpop.xlane.xlu1 %534 }
 0x4c1   :  { %v545_v29 = vsub.f32 %v476_v15, %v535_v28 }
 0x4c3   :  { %v549_v30 = vmul.f32 1.442695, %v545_v29 }
 0x4c4   :  { %v538_v31 = vpop.xlane.xlu0 %537 }
 0x4c5   :  { %5162 = vpow2.f32 %v549_v30  ;;  %v546_v33 = vsub.f32 %v479_v18, %v538_v31 }
 0x4c7   :  { %v551_v34 = vmul.f32 1.442695, %v546_v33 }
 0x4c8   :  { %v541_v35 = vpop.xlane.xlu0 %540 }
 0x4c9   :  { %5164 = vpow2.f32 %v551_v34  ;;  %v547_v36 = vsub.f32 %v526_v21, %v541_v35 }
 0x4cb   :  { %v553_v38 = vmul.f32 1.442695, %v547_v36 }
 0x4cc   :  { %v544_v46 = vpop.xlane.xlu1 %543 }
 0x4cd   :  { %5166 = vpow2.f32 %v553_v38  ;;  %v548_v47 = vsub.f32 %v529_v24, %v544_v46 }
 0x4cf   :  { %v555_v50 = vmul.f32 1.442695, %v548_v47 }
 0x4d1   :  { %5168 = vpow2.f32 %v555_v50 }
 0x4d2   :  { %v5163_v39 = vpop.eup %5162 }
 0x4d3   :  { %v557_v40 = vsel %vm435_vm2, %v5163_v39, 0.0 }
 0x4d4   :  { %558 = vadd.xlane.f32.xlu0 %v557_v40 }
 0x4d6   :  { %v5165_v41 = vpop.eup %5164 }
 0x4d7   :  { %v560_v43 = vsel %vm435_vm2, %v5165_v41, 0.0 }
 0x4d8   :  { %561 = vadd.xlane.f32.xlu1 %v560_v43 }
 0x4da   :  { %v5167_v44 = vpop.eup %5166 }
 0x4db   :  { %v563_v45 = vsel %vm435_vm2, %v5167_v44, 0.0 }
 0x4dc   :  { %564 = vadd.xlane.f32.xlu0 %v563_v45 }
 0x4de   :  { %v5169_v51 = vpop.eup %5168 }
 0x4df   :  { %v566_v52 = vsel %vm435_vm2, %v5169_v51, 0.0 }
 0x4e9   :  { %724 = vrot.lane.b32.xlu1 %v5690_v4, %s5412_s21 }
 0x4f2   :  { %673 = vrot.lane.b32.xlu0 %v5685_v58, %s5412_s21 }
 0x50d   :  { %567 = vadd.xlane.f32.xlu1 %v566_v52 }
 0x51e   :  { %671 = vrot.lane.b32.xlu1 %v5685_v58, %s5413_s22 }
 0x522   :  { %722 = vrot.lane.b32.xlu1 %v5690_v4, %s5413_s22 }
 0x55d   :  { %v559_v53 = vpop.xlane.xlu0 %558 }
 0x55e   :  { %5170 = vrcp.f32 %v559_v53 }
 0x561   :  { %v562_v54 = vpop.xlane.xlu1 %561 }
 0x562   :  { %5172 = vrcp.f32 %v562_v54 }
 0x565   :  { %v565_v55 = vpop.xlane.xlu0 %564  ;;  %v725_v2 = vpop.permute.xlu1 %724 }
 0x566   :  { %5174 = vrcp.f32 %v565_v55  ;;  %v730_v12 = vsel %vm435_vm2, %v725_v2, 0 }
 0x569   :  { %v674_v57 = vpop.permute.xlu0 %673 }
 0x56a   :  { %v679_v59 = vsel %vm435_vm2, %v674_v57, 0 }
 0x56b   :  { %4817 = vmatpush3.bf16.xpose.msra.mxu0 %v679_v59  ;;  %v5171_v60 = vpop.eup %5170 }
 0x56c   :  { %4828 = vmatprep.subr.bf16.mxu0 %v5409_v48  ;;  %v573_v62 = vmul.f32 %v5171_v60, %v5163_v39 }
 0x56f   :  { %v5173_v61 = vpop.eup %5172 }
 0x570   :  { %v574_v63 = vmul.f32 %v5173_v61, %v5165_v41 }
 0x572   :  { %v577_v0 = vpack.c.bf16 %v574_v63, %v573_v62 }
 0x573   :  { %v5175_v7 = vpop.eup %5174 }
 0x574   :  { %4807 = vmatmul.mubr.msk.bf16.vlgmr.msra.gmra.mxu1 %vm435_vm2, %v577_v0  ;;  %v575_v9 = vmul.f32 %v5175_v7, %v5167_v44 }
 0x575   :  { %4811 = vmatpush3.bf16.msra.mxu1 %v5692_v6  ;;  %4812 = vmatprep.mubr.msk.bf16.mxu1 %vm5410_vm1, %v5409_v48 }
 0x576   :  { %4822 = vmatprep.subr.bf16.mxu1 %v5409_v48 }
 0x596   :  { %v568_v3 = vpop.xlane.xlu1 %567 }
 0x597   :  { %5176 = vrcp.f32 %v568_v3 }
 0x59a   :  { %v672_v5 = vpop.permute.xlu1 %671 }
 0x59b   :  { %4819 = vmatmul.mubr.msk.bf16.vlgmr.msra.gmra.mxu0 %vm435_vm2, %v672_v5 }
 0x59c   :  { %4830 = vmatprep.mubr.msk.bf16.mxu0 %vm5410_vm1, %v5409_v48 }
 0x59e   :  { %v723_v13 = vpop.permute.xlu1 %722 }
 0x5a4   :  { %v5177_v8 = vpop.eup %5176 }
 0x5a5   :  { %v576_v10 = vmul.f32 %v5177_v8, %v5169_v51 }
 0x5a7   :  { %v578_v11 = vpack.c.bf16 %v576_v10, %v575_v9 }
 0x5a9   :  { %4813 = vmatmul.mubr.msk.bf16.vlgmr.msra.gmra.mxu1 %vm435_vm2, %v578_v11 }
 0x5aa   :  { %4823 = vmatpush3.bf16.xpose.msra.mxu1 %v730_v12  ;;  %4824 = vmatprep.mubr.msk.bf16.mxu1 %vm5410_vm1, %v5409_v48 }
 0x5ab   :  { %4834 = vmatprep.subr.bf16.mxu1 %v5409_v48 }
 0x5b1   :  { %4825 = vmatmul.mubr.msk.bf16.vlgmr.msra.gmra.mxu1 %vm435_vm2, %v723_v13 }
 0x5b2   :  { %4836 = vmatprep.mubr.msk.bf16.mxu1 %vm5410_vm1, %v5409_v48 }
 0x634   :  { %v5746_v15 = vpop.f32.mrf.mxu1 }
 0x636   :  { %v4808_v16 = vpop.f32.mrf.mxu1 }
 0x637   :  { %v5078_v16 = vld [vmem:[%s6775_s7] sm:$0xff]  }
 0x638   :  { %v5748_v17 = vpop.f32.mrf.mxu1 }
 0x639   :  { %v669_v18 = vpack.c.bf16 %v5748_v17, %v5746_v15  ;;  %v5079_v17 = vld [vmem:[%s6775_s7 + $0x8] sm:$0xff]  }
 0x63a   :  { %v4809_v19 = vpop.f32.mrf.mxu1 }
 0x65b   :  { %v715_v20 = vpop.f32.mrf.mxu0 }
 0x65c   :  { %v773_v21 = vsel %vm435_vm2, %v715_v20, -inf }
 0x65d   :  { %774 = vmax.xlane.f32.xlu0 %v773_v21  ;;  %v4820_v22 = vpop.f32.mrf.mxu0 }
 0x65f   :  { %v718_v23 = vpop.f32.mrf.mxu0 }
 0x660   :  { %v776_v24 = vsel %vm435_vm2, %v718_v23, -inf }
 0x661   :  { %777 = vmax.xlane.f32.xlu1 %v776_v24  ;;  %v4821_v25 = vpop.f32.mrf.mxu0 }
 0x669   :  { %v5754_v26 = vpop.f32.mrf.mxu1 }
 0x66b   :  { %v4814_v28 = vpop.f32.mrf.mxu1 }
 0x66d   :  { %v5756_v29 = vpop.f32.mrf.mxu1 }
 0x66e   :  { %v670_v30 = vpack.c.bf16 %v5756_v29, %v5754_v26 }
 0x66f   :  { %v4815_v31 = vpop.f32.mrf.mxu1 }
 0x671   :  { %v766_v33 = vpop.f32.mrf.mxu1 }
 0x672   :  { %v779_v34 = vsel %vm435_vm2, %v766_v33, -inf }
 0x673   :  { %780 = vmax.xlane.f32.xlu0 %v779_v34  ;;  %v4826_v35 = vpop.f32.mrf.mxu1 }
 0x675   :  { %v769_v36 = vpop.f32.mrf.mxu1 }
 0x676   :  { %v782_v38 = vsel %vm435_vm2, %v769_v36, -inf }
 0x677   :  { %783 = vmax.xlane.f32.xlu0 %v782_v38  ;;  %v4827_v39 = vpop.f32.mrf.mxu1 }
 0x6e6   :  { %v775_v40 = vpop.xlane.xlu0 %774 }
 0x6e7   :  { %v785_v41 = vsub.f32 %v715_v20, %v775_v40 }
 0x6e9   :  { %v789_v43 = vmul.f32 1.442695, %v785_v41 }
 0x6ea   :  { %v778_v44 = vpop.xlane.xlu1 %777 }
 0x6eb   :  { %5178 = vpow2.f32 %v789_v43  ;;  %v786_v45 = vsub.f32 %v718_v23, %v778_v44 }
 0x6ed   :  { %v791_v46 = vmul.f32 1.442695, %v786_v45 }
 0x6ef   :  { %5180 = vpow2.f32 %v791_v46 }
 0x6f8   :  { %v5179_v47 = vpop.eup %5178 }
 0x6f9   :  { %v797_v50 = vsel %vm435_vm2, %v5179_v47, 0.0 }
 0x6fa   :  { %798 = vadd.xlane.f32.xlu0 %v797_v50 }
 0x6fc   :  { %v5181_v51 = vpop.eup %5180  ;;  %v781_v52 = vpop.xlane.xlu0 %780 }
 0x6fd   :  { %v787_v53 = vsub.f32 %v766_v33, %v781_v52  ;;  %v800_v54 = vsel %vm435_vm2, %v5181_v51, 0.0 }
 0x6fe   :  { %801 = vadd.xlane.f32.xlu1 %v800_v54 }
 0x6ff   :  { %v793_v55 = vmul.f32 1.442695, %v787_v53 }
 0x700   :  { %v784_v57 = vpop.xlane.xlu0 %783 }
 0x701   :  { %5182 = vpow2.f32 %v793_v55  ;;  %v788_v59 = vsub.f32 %v769_v36, %v784_v57 }
 0x703   :  { %v795_v60 = vmul.f32 1.442695, %v788_v59 }
 0x705   :  { %5184 = vpow2.f32 %v795_v60 }
 0x70e   :  { %v5183_v61 = vpop.eup %5182 }
 0x70f   :  { %v803_v62 = vsel %vm435_vm2, %v5183_v61, 0.0 }
 0x710   :  { %804 = vadd.xlane.f32.xlu0 %v803_v62 }
 0x712   :  { %v5185_v63 = vpop.eup %5184 }
 0x713   :  { %v806_v0 = vsel %vm435_vm2, %v5185_v63, 0.0 }
 0x714   :  { %807 = vadd.xlane.f32.xlu1 %v806_v0 }
 0x725   :  { %868 = vrot.lane.b32.xlu1 %v5692_v6, %s5413_s22 }
 0x726   :  { %820 = vrot.lane.b32.xlu0 %v5704_v14, %s5413_s22 }
 0x729   :  { %1041 = vrot.lane.b32.xlu1 %v5685_v58, %s5414_s23 }
 0x72a   :  { %1039 = vrot.lane.b32.xlu0 %v5685_v58, %s5415_s24 }
 0x72d   :  { %1092 = vrot.lane.b32.xlu1 %v5690_v4, %s5414_s23 }
 0x731   :  { %1090 = vrot.lane.b32.xlu1 %v5690_v4, %s5415_s24 }
 0x783   :  { %v799_v3 = vpop.xlane.xlu0 %798 }
 0x787   :  { %v802_v2 = vpop.xlane.xlu1 %801 }
 0x788   :  { %5186 = vrcp.f32 %v802_v2 }
 0x789   :  { %5188 = vrcp.f32 %v799_v3 }
 0x795   :  { %v5187_v5 = vpop.eup %5186 }
 0x796   :  { %v5189_v8 = vpop.eup %5188  ;;  %v814_v9 = vmul.f32 %v5187_v5, %v5181_v51 }
 0x797   :  { %v813_v12 = vmul.f32 %v5189_v8, %v5179_v47 }
 0x799   :  { %v805_v7 = vpop.xlane.xlu0 %804  ;;  %v817_v13 = vpack.c.bf16 %v814_v9, %v813_v12 }
 0x79a   :  { %5190 = vrcp.f32 %v805_v7 }
 0x79d   :  { %v808_v10 = vpop.xlane.xlu1 %807  ;;  %v821_v11 = vpop.permute.xlu0 %820 }
 0x79e   :  { %5192 = vrcp.f32 %v808_v10  ;;  %4829 = vmatpush3.bf16.msra.mxu0 %v821_v11 }
 0x79f   :  { %4840 = vmatprep.subr.bf16.mxu0 %v5079_v17 }
 0x7a1   :  { %v869_v19 = vpop.permute.xlu1 %868  ;;  %4831 = vmatmul.mubr.msk.bf16.vlgmr.msra.gmra.mxu0 %vm435_vm2, %v817_v13  ;;  %v1040_v45 = vpop.permute.xlu0 %1039 }
 0x7a2   :  { %4835 = vmatpush3.bf16.msra.mxu1 %v869_v19  ;;  %4841 = vmatpush3.bf16.msra.mxu0 %v5079_v17 }
 0x7a3   :  { %4846 = vmatprep.subr.bf16.mxu1 %v5078_v16  ;;  %4852 = vmatprep.subr.bf16.mxu0 %v5409_v48 }
 0x7a5   :  { %v1042_v25 = vpop.permute.xlu1 %1041 }
 0x7a6   :  { %v1047_v40 = vsel %vm435_vm2, %v1042_v25, 0 }
 0x7a7   :  { %v5191_v20 = vpop.eup %5190 }
 0x7a8   :  { %v815_v22 = vmul.f32 %v5191_v20, %v5183_v61 }
 0x7a9   :  { %v1093_v28 = vpop.permute.xlu1 %1092 }
 0x7aa   :  { %v1098_v31 = vsel %vm435_vm2, %v1093_v28, 0 }
 0x7ab   :  { %v5193_v21 = vpop.eup %5192 }
 0x7ac   :  { %v816_v23 = vmul.f32 %v5193_v21, %v5185_v63 }
 0x7ad   :  { %v1091_v15 = vpop.permute.xlu1 %1090 }
 0x7ae   :  { %v818_v24 = vpack.c.bf16 %v816_v23, %v815_v22 }
 0x7b0   :  { %4837 = vmatmul.mubr.msk.bf16.vlgmr.msra.gmra.mxu1 %vm435_vm2, %v818_v24 }
 0x7b1   :  { %4848 = vmatprep.mubr.msk.bf16.mxu1 %vm435_vm2, %v669_v18  ;;  %4847 = vmatpush3.bf16.msra.mxu1 %v5078_v16 }
 0x7b2   :  { %4858 = vmatprep.subr.bf16.mxu1 %v5409_v48 }
 0x7b8   :  { %4849 = vmatmul.mubr.msk.bf16.vlgmr.msra.gmra.mxu1 %vm435_vm2, %v670_v30 }
 0x7b9   :  { %4859 = vmatpush3.bf16.xpose.msra.mxu1 %v1098_v31  ;;  %4860 = vmatprep.mubr.msk.bf16.mxu1 %vm5410_vm1, %v5409_v48 }
 0x7ba   :  { %4870 = vmatprep.subr.bf16.mxu1 %v5409_v48 }
 0x7c0   :  { %4861 = vmatmul.mubr.msk.bf16.vlgmr.msra.gmra.mxu1 %vm435_vm2, %v1091_v15 }
 0x7c1   :  { %4872 = vmatprep.mubr.msk.bf16.mxu1 %vm5410_vm1, %v5409_v48 }
 0x861   :  { %v860_v18 = vpop.f32.mrf.mxu0 }
 0x863   :  { %v4832_v26 = vpop.f32.mrf.mxu0 }
 0x865   :  { %v863_v29 = vpop.f32.mrf.mxu0 }
 0x866   :  { %v915_v30 = vpack.c.bf16 %v863_v29, %v860_v18 }
 0x867   :  { %v4833_v33 = vpop.f32.mrf.mxu0 }
 0x868   :  { %4842 = vmatprep.mubr.msk.bf16.mxu0 %vm435_vm2, %v915_v30 }
 0x870   :  { %v908_v34 = vpop.f32.mrf.mxu1 }
 0x872   :  { %v4838_v35 = vpop.f32.mrf.mxu1 }
 0x874   :  { %v911_v36 = vpop.f32.mrf.mxu1 }
 0x875   :  { %v916_v38 = vpack.c.bf16 %v911_v36, %v908_v34 }
 0x876   :  { %v4839_v39 = vpop.f32.mrf.mxu1 }
 0x877   :  { %4843 = vmatmul.mubr.msk.bf16.vlgmr.msra.gmra.mxu0 %vm435_vm2, %v916_v38 }
 0x878   :  { %4853 = vmatpush3.bf16.xpose.msra.mxu0 %v1047_v40  ;;  %v5806_v41 = vpop.f32.mrf.mxu1  ;;  %4854 = vmatprep.mubr.msk.bf16.mxu0 %vm5410_vm1, %v5409_v48 }
 0x879   :  { %4864 = vmatprep.subr.bf16.mxu0 %v5409_v48 }
 0x87a   :  { %v5811_v43 = vpop.f32.mrf.mxu1 }
 0x87c   :  { %v5813_v44 = vpop.f32.mrf.mxu1 }
 0x87e   :  { %v5815_v46 = vpop.f32.mrf.mxu1 }
 0x87f   :  { %4855 = vmatmul.mubr.msk.bf16.vlgmr.msra.gmra.mxu0 %vm435_vm2, %v1040_v45 }
 0x880   :  { %v1134_v47 = vpop.f32.mrf.mxu1  ;;  %4866 = vmatprep.mubr.msk.bf16.mxu0 %vm5410_vm1, %v5409_v48 }
 0x881   :  { %v1147_v0 = vsel %vm435_vm2, %v1134_v47, -inf }
 0x882   :  { %v4862_v50 = vpop.f32.mrf.mxu1 }
 0x884   :  { %v1137_v51 = vpop.f32.mrf.mxu1 }
 0x885   :  { %v1150_v3 = vsel %vm435_vm2, %v1137_v51, -inf }
 0x886   :  { %v4863_v52 = vpop.f32.mrf.mxu1 }
 0x937   :  { %v5820_v53 = vpop.f32.mrf.mxu0 }
 0x939   :  { %v5822_v54 = vpop.f32.mrf.mxu0 }
 0x93b   :  { %v5824_v55 = vpop.f32.mrf.mxu0 }
 0x93d   :  { %v5826_v57 = vpop.f32.mrf.mxu0 }
 0x93f   :  { %v1083_v59 = vpop.f32.mrf.mxu0 }
 0x940   :  { %v1141_v60 = vsel %vm435_vm2, %v1083_v59, -inf }
 0x941   :  { %1142 = vmax.xlane.f32.xlu0 %v1141_v60  ;;  %v4856_v61 = vpop.f32.mrf.mxu0  ;;  %v5080_v60 = vld [vmem:[%s6775_s7 + $0x10] sm:$0xff]  }
 0x943   :  { %v1086_v62 = vpop.f32.mrf.mxu0 }
 0x944   :  { %v1144_v63 = vsel %vm435_vm2, %v1086_v62, -inf }
 0x945   :  { %1145 = vmax.xlane.f32.xlu1 %v1144_v63  ;;  %v4857_v2 = vpop.f32.mrf.mxu0  ;;  %1148 = vmax.xlane.f32.xlu0 %v1147_v0 }
 0x949   :  { %1151 = vmax.xlane.f32.xlu0 %v1150_v3 }
 0x9ca   :  { %v1143_v5 = vpop.xlane.xlu0 %1142 }
 0x9cb   :  { %v1153_v7 = vsub.f32 %v1083_v59, %v1143_v5 }
 0x9cd   :  { %v1157_v13 = vmul.f32 1.442695, %v1153_v7 }
 0x9ce   :  { %v1146_v8 = vpop.xlane.xlu1 %1145  ;;  %v1149_v9 = vpop.xlane.xlu0 %1148 }
 0x9cf   :  { %v1155_v10 = vsub.f32 %v1134_v47, %v1149_v9  ;;  %v1154_v11 = vsub.f32 %v1086_v62, %v1146_v8 }
 0x9d1   :  { %v1161_v12 = vmul.f32 1.442695, %v1155_v10  ;;  %v1159_v20 = vmul.f32 1.442695, %v1154_v11 }
 0x9d2   :  { %v1152_v16 = vpop.xlane.xlu0 %1151 }
 0x9d3   :  { %v1156_v19 = vsub.f32 %v1137_v51, %v1152_v16  ;;  %5194 = vpow2.f32 %v1161_v12 }
 0x9d4   :  { %5196 = vpow2.f32 %v1157_v13 }
 0x9d5   :  { %v1163_v21 = vmul.f32 1.442695, %v1156_v19 }
 0x9d7   :  { %5198 = vpow2.f32 %v1163_v21 }
 0x9d8   :  { %5200 = vpow2.f32 %v1159_v20 }
 0x9e0   :  { %v5195_v22 = vpop.eup %5194 }
 0x9e1   :  { %v1171_v23 = vsel %vm435_vm2, %v5195_v22, 0.0  ;;  %v5197_v24 = vpop.eup %5196 }
 0x9e2   :  { %1172 = vadd.xlane.f32.xlu0 %v1171_v23  ;;  %v1165_v15 = vsel %vm435_vm2, %v5197_v24, 0.0 }
 0x9e4   :  { %v5199_v25 = vpop.eup %5198 }
 0x9e5   :  { %v1174_v28 = vsel %vm435_vm2, %v5199_v25, 0.0  ;;  %v5201_v31 = vpop.eup %5200 }
 0x9e6   :  { %1175 = vadd.xlane.f32.xlu1 %v1174_v28  ;;  %1166 = vadd.xlane.f32.xlu0 %v1165_v15  ;;  %v1168_v17 = vsel %vm435_vm2, %v5201_v31, 0.0 }
 0x9ea   :  { %1169 = vadd.xlane.f32.xlu1 %v1168_v17 }
 0x9fb   :  { %1234 = vrot.lane.b32.xlu1 %v5692_v6, %s5415_s24 }
 0x9fc   :  { %1187 = vrot.lane.b32.xlu0 %v5704_v14, %s5415_s24 }
 0x9ff   :  { %1350 = vrot.lane.b32.xlu1 %v5685_v58, %s5416_s28 }
 0xa00   :  { %1348 = vrot.lane.b32.xlu0 %v5685_v58, %s6788_s29 }
 0xa03   :  { %1401 = vrot.lane.b32.xlu1 %v5690_v4, %s5416_s28 }
 0xa07   :  { %1399 = vrot.lane.b32.xlu1 %v5690_v4, %s6788_s29 }
 0xa6b   :  { %v1173_v18 = vpop.xlane.xlu0 %1172 }
 0xa6c   :  { %5202 = vrcp.f32 %v1173_v18 }
 0xa6f   :  { %v1176_v26 = vpop.xlane.xlu1 %1175  ;;  %v1167_v29 = vpop.xlane.xlu0 %1166 }
 0xa70   :  { %5204 = vrcp.f32 %v1176_v26  ;;  %v1033_v26 = vadd.f32 %v5806_v41, %v5820_v53 }
 0xa71   :  { %5206 = vrcp.f32 %v1167_v29 }
 0xa73   :  { %v1170_v30 = vpop.xlane.xlu1 %1169  ;;  %v1188_v33 = vpop.permute.xlu0 %1187 }
 0xa74   :  { %5208 = vrcp.f32 %v1170_v30  ;;  %4865 = vmatpush3.bf16.msra.mxu0 %v1188_v33  ;;  %v1025_v30 = vadd.f32 %v5811_v43, %v5822_v54 }
 0xa75   :  { %4876 = vmatprep.subr.bf16.mxu0 %v5080_v60 }
 0xa77   :  { %v1235_v34 = vpop.permute.xlu1 %1234  ;;  %v1349_v59 = vpop.permute.xlu0 %1348 }
 0xa78   :  { %4871 = vmatpush3.bf16.msra.mxu1 %v1235_v34 }
 0xa79   :  { %4882 = vmatprep.subr.bf16.mxu1 %v5409_v48  ;;  %v5203_v58 = vpop.eup %5202 }
 0xa7a   :  { %v1183_v36 = vmul.f32 %v5203_v58, %v5195_v22  ;;  %v1036_v58 = vadd.f32 %v5813_v44, %v5824_v55 }
 0xa7b   :  { %v1351_v4 = vpop.permute.xlu1 %1350 }
 0xa7c   :  { %v1356_v47 = vsel %vm435_vm2, %v1351_v4, 0 }
 0xa7d   :  { %v5205_v35 = vpop.eup %5204 }
 0xa7e   :  { %v1184_v38 = vmul.f32 %v5205_v35, %v5199_v25  ;;  %v5207_v39 = vpop.eup %5206 }
 0xa7f   :  { %v1181_v50 = vmul.f32 %v5207_v39, %v5197_v24  ;;  %v1402_v8 = vpop.permute.xlu1 %1401 }
 0xa80   :  { %v1186_v40 = vpack.c.bf16 %v1184_v38, %v1183_v36  ;;  %v1407_v16 = vsel %vm435_vm2, %v1402_v8, 0  ;;  %v1028_v38 = vadd.f32 %v5815_v46, %v5826_v57 }
 0xa81   :  { %v5209_v45 = vpop.eup %5208 }
 0xa82   :  { %4873 = vmatmul.mubr.msk.bf16.vlgmr.msra.gmra.mxu1 %vm435_vm2, %v1186_v40  ;;  %v1182_v51 = vmul.f32 %v5209_v45, %v5201_v31 }
 0xa83   :  { %4883 = vmatpush3.bf16.xpose.msra.mxu1 %v1356_v47  ;;  %4884 = vmatprep.mubr.msk.bf16.mxu1 %vm5410_vm1, %v5409_v48  ;;  %v1400_v22 = vpop.permute.xlu1 %1399 }
 0xa84   :  { %v1185_v52 = vpack.c.bf16 %v1182_v51, %v1181_v50  ;;  %4894 = vmatprep.subr.bf16.mxu1 %v5409_v48 }
 0xa86   :  { %4867 = vmatmul.mubr.msk.bf16.vlgmr.msra.gmra.mxu0 %vm435_vm2, %v1185_v52 }
 0xa87   :  { %4877 = vmatpush3.bf16.msra.mxu0 %v5080_v60 }
 0xa88   :  { %4888 = vmatprep.subr.bf16.mxu0 %v5409_v48 }
 0xa8a   :  { %4885 = vmatmul.mubr.msk.bf16.vlgmr.msra.gmra.mxu1 %vm435_vm2, %v1349_v59 }
 0xa8b   :  { %4896 = vmatprep.mubr.msk.bf16.mxu1 %vm5410_vm1, %v5409_v48 }
 0xb42   :  { %v1274_v61 = vpop.f32.mrf.mxu1 }
 0xb44   :  { %v4874_v62 = vpop.f32.mrf.mxu1 }
 0xb46   :  { %v1227_v63 = vpop.f32.mrf.mxu0  ;;  %v1277_v0 = vpop.f32.mrf.mxu1 }
 0xb47   :  { %v1282_v11 = vpack.c.bf16 %v1277_v0, %v1274_v61 }
 0xb48   :  { %v4868_v2 = vpop.f32.mrf.mxu0  ;;  %v4875_v3 = vpop.f32.mrf.mxu1 }
 0xb4a   :  { %v1230_v5 = vpop.f32.mrf.mxu0  ;;  %v1392_v7 = vpop.f32.mrf.mxu1 }
 0xb4b   :  { %v1281_v9 = vpack.c.bf16 %v1230_v5, %v1227_v63  ;;  %v1450_v10 = vsel %vm435_vm2, %v1392_v7, -inf }
 0xb4c   :  { %v4869_v12 = vpop.f32.mrf.mxu0  ;;  %1451 = vmax.xlane.f32.xlu0 %v1450_v10  ;;  %v4886_v13 = vpop.f32.mrf.mxu1 }
 0xb4d   :  { %4878 = vmatprep.mubr.msk.bf16.mxu0 %vm435_vm2, %v1281_v9 }
 0xb4e   :  { %4879 = vmatmul.mubr.msk.bf16.vlgmr.msra.gmra.mxu0 %vm435_vm2, %v1282_v11  ;;  %v1395_v19 = vpop.f32.mrf.mxu1 }
 0xb4f   :  { %4889 = vmatpush3.bf16.xpose.msra.mxu0 %v1407_v16  ;;  %v1453_v20 = vsel %vm435_vm2, %v1395_v19, -inf  ;;  %4890 = vmatprep.mubr.msk.bf16.mxu0 %vm5410_vm1, %v5409_v48 }
 0xb50   :  { %1454 = vmax.xlane.f32.xlu1 %v1453_v20  ;;  %v4887_v21 = vpop.f32.mrf.mxu1  ;;  %4900 = vmatprep.subr.bf16.mxu0 %v5409_v48 }
 0xb51   :  { %v5081_v21 = vld [vmem:[%s6775_s7 + $0x18] sm:$0xff]  }
 0xb56   :  { %4891 = vmatmul.mubr.msk.bf16.vlgmr.msra.gmra.mxu0 %vm435_vm2, %v1400_v22 }
 0xb57   :  { %4902 = vmatprep.mubr.msk.bf16.mxu0 %vm5410_vm1, %v5409_v48 }
 0xbd5   :  { %v1452_v15 = vpop.xlane.xlu0 %1451 }
 0xbd6   :  { %v1462_v17 = vsub.f32 %v1392_v7, %v1452_v15 }
 0xbd8   :  { %v1466_v18 = vmul.f32 1.442695, %v1462_v17 }
 0xbd9   :  { %v1455_v23 = vpop.xlane.xlu1 %1454 }
 0xbda   :  { %v1463_v24 = vsub.f32 %v1395_v19, %v1455_v23 }
 0xbdc   :  { %v1468_v25 = vmul.f32 1.442695, %v1463_v24 }
 0xbde   :  { %5210 = vpow2.f32 %v1468_v25 }
 0xbdf   :  { %5212 = vpow2.f32 %v1466_v18 }
 0xbeb   :  { %v5211_v28 = vpop.eup %5210 }
 0xbec   :  { %v1477_v31 = vsel %vm435_vm2, %v5211_v28, 0.0  ;;  %v5213_v44 = vpop.eup %5212 }
 0xbed   :  { %1478 = vadd.xlane.f32.xlu1 %v1477_v31  ;;  %v1474_v47 = vsel %vm435_vm2, %v5213_v44, 0.0 }
 0xc0e   :  { %v4880_v29 = vpop.f32.mrf.mxu0 }
 0xc0f   :  { %v5878_v33 = vadd.f32 %v4880_v29, %v1033_v26 }
 0xc10   :  { %v1329_v34 = vpop.f32.mrf.mxu0 }
 0xc11   :  { %v5882_v35 = vadd.f32 %v1329_v34, %v1025_v30 }
 0xc12   :  { %v4881_v36 = vpop.f32.mrf.mxu0 }
 0xc13   :  { %v5886_v39 = vadd.f32 %v4881_v36, %v1036_v58 }
 0xc14   :  { %v1332_v41 = vpop.f32.mrf.mxu0 }
 0xc15   :  { %v5888_v53 = vadd.f32 %v1332_v41, %v1028_v38 }
 0xc16   :  { %v1443_v4 = vpop.f32.mrf.mxu0 }
 0xc17   :  { %v1456_v43 = vsel %vm435_vm2, %v1443_v4, -inf }
 0xc18   :  { %v4892_v54 = vpop.f32.mrf.mxu0  ;;  %1457 = vmax.xlane.f32.xlu0 %v1456_v43 }
 0xc1a   :  { %v1446_v40 = vpop.f32.mrf.mxu0 }
 0xc1b   :  { %v1459_v45 = vsel %vm435_vm2, %v1446_v40, -inf }
 0xc1c   :  { %v4893_v55 = vpop.f32.mrf.mxu0  ;;  %1460 = vmax.xlane.f32.xlu0 %v1459_v45 }
 0xc20   :  { %1475 = vadd.xlane.f32.xlu0 %v1474_v47 }
 0xc76   :  { %v1479_v2 = vpop.xlane.xlu1 %1478 }
 0xca1   :  { %v1458_v46 = vpop.xlane.xlu0 %1457 }
 0xca2   :  { %v1464_v57 = vsub.f32 %v1443_v4, %v1458_v46  ;;  %v4482_v4 = vld [vmem:[%s6776_s8] ss:$0 sm:$0xff] }
 0xca4   :  { %v1470_v50 = vmul.f32 1.442695, %v1464_v57 }
 0xca5   :  { %v1461_v51 = vpop.xlane.xlu0 %1460 }
 0xca6   :  { %5214 = vpow2.f32 %v1470_v50  ;;  %v1465_v52 = vsub.f32 %v1446_v40, %v1461_v51 }
 0xca8   :  { %v1472_v59 = vmul.f32 1.442695, %v1465_v52 }
 0xca9   :  { %v1476_v0 = vpop.xlane.xlu0 %1475 }
 0xcaa   :  { %5216 = vpow2.f32 %v1472_v59 }
 0xcab   :  { %5218 = vrcp.f32 %v1476_v0 }
 0xcac   :  { %5220 = vrcp.f32 %v1479_v2 }
 0xcb3   :  { %v5215_v60 = vpop.eup %5214 }
 0xcb4   :  { %v1480_v61 = vsel %vm435_vm2, %v5215_v60, 0.0 }
 0xcb5   :  { %1481 = vadd.xlane.f32.xlu0 %v1480_v61 }
 0xcb7   :  { %v5217_v62 = vpop.eup %5216 }
 0xcb8   :  { %v1483_v63 = vsel %vm435_vm2, %v5217_v62, 0.0  ;;  %v5219_v3 = vpop.eup %5218 }
 0xcb9   :  { %1484 = vadd.xlane.f32.xlu1 %v1483_v63  ;;  %v5221_v7 = vpop.eup %5220  ;;  %v1490_v8 = vmul.f32 %v5219_v3, %v5213_v44 }
 0xcba   :  { %v1491_v11 = vmul.f32 %v5221_v7, %v5211_v28 }
 0xcbc   :  { %v1494_v12 = vpack.c.bf16 %v1491_v11, %v1490_v8  ;;  %v5084_v11 = vld [vmem:[%s6779_s11 + $0x34] ss:$8 sps:$4 sm:$0xff]  }
 0xcca   :  { %1543 = vrot.lane.b32.xlu1 %v5692_v6, %s6788_s29 }
 0xccb   :  { %1496 = vrot.lane.b32.xlu0 %v5704_v14, %s6788_s29 }
 0xd3e   :  { %v1482_v5 = vpop.xlane.xlu0 %1481 }
 0xd3f   :  { %5222 = vrcp.f32 %v1482_v5 }
 0xd42   :  { %v1497_v9 = vpop.permute.xlu0 %1496  ;;  %v1485_v10 = vpop.xlane.xlu1 %1484 }
 0xd43   :  { %5224 = vrcp.f32 %v1485_v10  ;;  %4895 = vmatpush3.bf16.msra.mxu1 %v1497_v9 }
 0xd44   :  { %4906 = vmatprep.subr.bf16.mxu1 %v5081_v21 }
 0xd46   :  { %4897 = vmatmul.mubr.msk.bf16.vlgmr.msra.gmra.mxu1 %vm435_vm2, %v1494_v12  ;;  %v1544_v6 = vpop.permute.xlu1 %1543  ;;  %v5082_v12 = vld [vmem:[%s6779_s11 + $0x30] ss:$8 sps:$4 sm:$0xff]  }
 0xd47   :  { %4901 = vmatpush3.bf16.msra.mxu0 %v1544_v6  ;;  %4907 = vmatpush3.bf16.msra.mxu1 %v5081_v21  ;;  %v5087_v6 = vld [vmem:[%s6779_s11 + $0x24] ss:$8 sps:$4 sm:$0xff]  }
 0xd48   :  { %1822 = vmatprep.subr.bf16.mxu0 %v5084_v11  ;;  %v1756_v11 = vld [vmem:[%s6780_s12] sm:$0x3] }
 0xd4c   :  { %v5223_v14 = vpop.eup %5222 }
 0xd4d   :  { %v1492_v16 = vmul.f32 %v5223_v14, %v5215_v60  ;;  %v5085_v14 = vld [vmem:[%s6779_s11 + $0x20] ss:$8 sps:$4 sm:$0xff]  }
 0xd50   :  { %v5225_v13 = vpop.eup %5224 }
 0xd51   :  { %v1493_v19 = vmul.f32 %v5225_v13, %v5217_v62  ;;  %v5090_v13 = vld [vmem:[%s6779_s11 + $0x14] ss:$8 sps:$4 sm:$0xff]  }
 0xd53   :  { %v1495_v20 = vpack.c.bf16 %v1493_v19, %v1492_v16  ;;  %v5088_v16 = vld [vmem:[%s6779_s11 + $0x10] ss:$8 sps:$4 sm:$0xff]   ;;  %v5093_v19 = vld [vmem:[%s6779_s11 + $0x4] ss:$8 sps:$4 sm:$0xff]  }
 0xd55   :  { %4903 = vmatmul.mubr.msk.bf16.vlgmr.msra.gmra.mxu0 %vm435_vm2, %v1495_v20  ;;  %v5091_v20 = vld [vmem:[%s6779_s11] ss:$8 sps:$4 sm:$0xff]  }
 0xd56   :  { %1846 = vmatprep.mubr.bf16.mxu0 %v5408_v1  ;;  %1823 = vmatpush1.bf16.msra.mxu0 %v5082_v12  ;;  %v1761_v12 = vrot.slane %v1756_v11, %v5673_v49 }
 0xd57   :  { %1824 = vmatprep.subr.bf16.mxu0 %v5087_v6  ;;  %v1765_v6 = vrot.slane %v1756_v11, %v5683_v56 }
 0xd5a   :  { %1825 = vmatpush1.bf16.msra.mxu0 %v5085_v14 }
 0xd5b   :  { %1826 = vmatprep.subr.bf16.mxu0 %v5090_v13 }
 0xd5e   :  { %1827 = vmatpush1.bf16.msra.mxu0 %v5088_v16 }
 0xd5f   :  { %1828 = vmatprep.subr.bf16.mxu0 %v5093_v19 }
 0xd62   :  { %1829 = vmatpush1.bf16.msra.mxu0 %v5091_v20 }
 0xe06   :  { %v1536_v22 = vpop.f32.mrf.mxu1 }
 0xe08   :  { %v4898_v23 = vpop.f32.mrf.mxu1 }
 0xe0a   :  { %v1539_v24 = vpop.f32.mrf.mxu1 }
 0xe0b   :  { %v1590_v25 = vpack.c.bf16 %v1539_v24, %v1536_v22 }
 0xe0c   :  { %v4899_v28 = vpop.f32.mrf.mxu1 }
 0xe0d   :  { %4908 = vmatprep.mubr.msk.bf16.mxu1 %vm435_vm2, %v1590_v25 }
 0xe15   :  { %v1583_v31 = vpop.f32.mrf.mxu0 }
 0xe17   :  { %v4904_v15 = vpop.f32.mrf.mxu0 }
 0xe19   :  { %v1586_v17 = vpop.f32.mrf.mxu0 }
 0xe1a   :  { %v1591_v18 = vpack.c.bf16 %v1586_v17, %v1583_v31 }
 0xe1b   :  { %v4905_v26 = vpop.f32.mrf.mxu0 }
 0xe1c   :  { %4909 = vmatmul.mubr.msk.bf16.vlgmr.msra.gmra.mxu1 %vm435_vm2, %v1591_v18 }
 0xedc   :  { %v4910_v29 = vpop.f32.mrf.mxu1 }
 0xedd   :  { %v1655_v36 = vadd.f32 %v4910_v29, %v5878_v33 }
 0xede   :  { %v1638_v30 = vpop.f32.mrf.mxu1 }
 0xedf   :  { %v1653_v34 = vadd.f32 %v1638_v30, %v5882_v35  ;;  %v1659_v35 = vadd.f32 %v1655_v36, %v5605_v37 }
 0xee0   :  { %v4911_v58 = vpop.f32.mrf.mxu1 }
 0xee1   :  { %v1657_v38 = vadd.f32 %v1653_v34, %v5591_v27  ;;  %v1656_v41 = vadd.f32 %v4911_v58, %v5886_v39  ;;  %v5926_v55 = vadd.f32 %v4482_v4, %v1659_v35  ;;  %v4483_v58 = vld [vmem:[%s6777_s9] ss:$0 sm:$0xff] }
 0xee2   :  { %v1641_v43 = vpop.f32.mrf.mxu1 }
 0xee3   :  { %v5914_v54 = vadd.f32 %v4482_v4, %v1657_v38  ;;  %v1660_v40 = vadd.f32 %v1656_v41, %v5612_v42  ;;  %v1654_v45 = vadd.f32 %v1641_v43, %v5888_v53  ;;  %v1680_v37 = vsel %vm170_vm0, %v5926_v55, 0.0 }
 0xee5   :  { %v5919_v44 = vadd.f32 %v4482_v4, %v1660_v40  ;;  %v1658_v33 = vadd.f32 %v1654_v45, %v5598_v32  ;;  %v1674_v27 = vsel %vm170_vm0, %v5914_v54, 0.0 }
 0xee6   :  { %1675 = vadd.xlane.f32.xlu1 %v1674_v27 }
 0xee7   :  { %v5924_v39 = vadd.f32 %v4482_v4, %v1658_v33  ;;  %v1683_v42 = vsel %vm170_vm0, %v5919_v44, 0.0  ;;  %v4484_v4 = vld [vmem:[%s6778_s10] ss:$0 sm:$0xff] }
 0xee9   :  { %v1677_v47 = vsel %vm170_vm0, %v5924_v39, 0.0 }
 0xeea   :  { %1678 = vadd.xlane.f32.xlu0 %v1677_v47  ;;  %1684 = vadd.xlane.f32.xlu1 %v1683_v42 }
 0xeee   :  { %1681 = vadd.xlane.f32.xlu0 %v1680_v37 }
 0xf6f   :  { %v1676_v32 = vpop.xlane.xlu1 %1675 }
 0xf70   :  { %v1686_v53 = vmul.f32 0.015625, %v1676_v32 }
 0xf72   :  { %v1690_v46 = vsub.f32 %v5914_v54, %v1686_v53 }
 0xf73   :  { %v1679_v57 = vpop.xlane.xlu0 %1678  ;;  %v1685_v50 = vpop.xlane.xlu1 %1684 }
 0xf74   :  { %v1687_v51 = vmul.f32 0.015625, %v1679_v57  ;;  %v1689_v52 = vmul.f32 0.015625, %v1685_v50  ;;  %v1694_v59 = vmul.f32 %v1690_v46, %v1690_v46  ;;  %v5094_v50 = vld [vmem:[%s6781_s13 + $0x78] sm:$0xff]  }
 0xf75   :  { %4692 = vmatprep.subr.bf16.mxu1 %v5094_v50 }
 0xf76   :  { %v1691_v60 = vsub.f32 %v5924_v39, %v1687_v51  ;;  %v1693_v61 = vsub.f32 %v5919_v44, %v1689_v52  ;;  %v1698_v62 = vsel %vm170_vm0, %v1694_v59, 0.0  ;;  %v5095_v51 = vld [vmem:[%s6781_s13 + $0x38] sm:$0xff]   ;;  %v5096_v52 = vld [vmem:[%s6781_s13 + $0x70] sm:$0xff]  }
 0xf77   :  { %v1682_v63 = vpop.xlane.xlu0 %1681  ;;  %1699 = vadd.xlane.f32.xlu0 %v1698_v62  ;;  %4693 = vmatpush3.bf16.msra.mxu1 %v5095_v51  ;;  %v5097_v59 = vld [vmem:[%s6781_s13 + $0x30] sm:$0xff]   ;;  %v5100_v62 = vld [vmem:[%s6781_s13 + $0x60] sm:$0xff]  }
 0xf78   :  { %v1688_v0 = vmul.f32 0.015625, %v1682_v63  ;;  %v1695_v2 = vmul.f32 %v1691_v60, %v1691_v60  ;;  %v1697_v7 = vmul.f32 %v1693_v61, %v1693_v61  ;;  %4694 = vmatprep.subr.bf16.mxu1 %v5096_v52  ;;  %v5101_v63 = vld [vmem:[%s6781_s13 + $0x20] sm:$0xff]  }
 0xf7a   :  { %v1692_v3 = vsub.f32 %v5926_v55, %v1688_v0  ;;  %v1701_v5 = vsel %vm170_vm0, %v1695_v2, 0.0  ;;  %v1707_v10 = vsel %vm170_vm0, %v1697_v7, 0.0  ;;  %v5102_v0 = vld [vmem:[%s6781_s13 + $0x58] sm:$0xff]   ;;  %v5106_v7 = vld [vmem:[%s6781_s13 + $0x48] sm:$0xff]  }
 0xf7b   :  { %1702 = vadd.xlane.f32.xlu1 %v1701_v5  ;;  %4695 = vmatpush3.bf16.msra.mxu1 %v5097_v59  ;;  %v5103_v2 = vld [vmem:[%s6781_s13 + $0x18] sm:$0xff]   ;;  %v5105_v5 = vld [vmem:[%s6781_s13 + $0x10] sm:$0xff]  }
 0xf7c   :  { %v1696_v8 = vmul.f32 %v1692_v3, %v1692_v3 }
 0xf7e   :  { %v1704_v9 = vsel %vm170_vm0, %v1696_v8, 0.0  ;;  %v5107_v8 = vld [vmem:[%s6781_s13 + $0x8] sm:$0xff]  }
 0xf7f   :  { %1705 = vadd.xlane.f32.xlu0 %v1704_v9  ;;  %1708 = vadd.xlane.f32.xlu1 %v1707_v10  ;;  %v5108_v9 = vld [vmem:[%s6781_s13 + $0x40] sm:$0xff]  }
 0xf80   :  { %v5109_v10 = vld [vmem:[%s6781_s13] sm:$0xff]  }
0x1000   :  { %v1700_v21 = vpop.xlane.xlu0 %1699 }
0x1001   :  { %v1710_v22 = vmul.f32 0.015625, %v1700_v21 }
0x1003   :  { %v1714_v23 = vadd.f32 1e-05, %v1710_v22 }
0x1004   :  { %v1703_v24 = vpop.xlane.xlu1 %1702 }
0x1005   :  { %5226 = vrsqrt.f32 %v1714_v23  ;;  %v1711_v25 = vmul.f32 0.015625, %v1703_v24 }
0x1007   :  { %v1715_v28 = vadd.f32 1e-05, %v1711_v25 }
0x1008   :  { %v1706_v31 = vpop.xlane.xlu0 %1705  ;;  %v1709_v15 = vpop.xlane.xlu1 %1708 }
0x1009   :  { %5228 = vrsqrt.f32 %v1715_v28  ;;  %v1712_v17 = vmul.f32 0.015625, %v1706_v31  ;;  %v1713_v18 = vmul.f32 0.015625, %v1709_v15 }
0x100b   :  { %v1716_v26 = vadd.f32 1e-05, %v1712_v17  ;;  %v1717_v29 = vadd.f32 1e-05, %v1713_v18 }
0x100d   :  { %5230 = vrsqrt.f32 %v1716_v26 }
0x100e   :  { %5232 = vrsqrt.f32 %v1717_v29 }
0x1012   :  { %v5227_v30 = vpop.eup %5226 }
0x1013   :  { %v1722_v34 = vmul.f32 %v5227_v30, %v1690_v46 }
0x1015   :  { %v1732_v41 = vmul.f32 %v4483_v58, %v1722_v34 }
0x1016   :  { %v5229_v36 = vpop.eup %5228 }
0x1017   :  { %v1723_v38 = vmul.f32 %v5229_v36, %v1691_v60  ;;  %v1742_v35 = vadd.f32 %v4484_v4, %v1732_v41  ;;  %v5098_v60 = vld [vmem:[%s6781_s13 + $0x68] sm:$0xff]  }
0x1018   :  { %4696 = vmatprep.subr.bf16.mxu1 %v5098_v60 }
0x1019   :  { %v1733_v43 = vmul.f32 %v4483_v58, %v1723_v38 }
0x101a   :  { %v5231_v40 = vpop.eup %5230 }
0x101b   :  { %v5233_v45 = vpop.eup %5232  ;;  %v1743_v33 = vadd.f32 %v4484_v4, %v1733_v43  ;;  %v1724_v27 = vmul.f32 %v5231_v40, %v1692_v3  ;;  %v5104_v3 = vld [vmem:[%s6781_s13 + $0x50] sm:$0xff]  }
0x101c   :  { %v1725_v47 = vmul.f32 %v5233_v45, %v1693_v61  ;;  %v5099_v61 = vld [vmem:[%s6781_s13 + $0x28] sm:$0xff]  }
0x101d   :  { %v1746_v42 = vpack.c.bf16 %v1743_v33, %v1742_v35  ;;  %v1734_v37 = vmul.f32 %v4483_v58, %v1724_v27  ;;  %4697 = vmatpush3.bf16.msra.mxu1 %v5099_v61 }
0x101e   :  { %v1735_v32 = vmul.f32 %v4483_v58, %v1725_v47  ;;  %4698 = vmatprep.subr.bf16.mxu1 %v5100_v62 }
0x101f   :  { %4493 = vmatmul.mubr.msk.bf16.vlgmr.msra.gmra.mxu0 %vm170_vm0, %v1746_v42  ;;  %v1744_v53 = vadd.f32 %v4484_v4, %v1734_v37 }
0x1020   :  { %1856 = vmatprep.mubr.bf16.mxu0 %v5408_v1  ;;  %v1745_v46 = vadd.f32 %v4484_v4, %v1735_v32 }
0x1021   :  { %4699 = vmatpush3.bf16.msra.mxu1 %v5101_v63 }
0x1022   :  { %v1747_v57 = vpack.c.bf16 %v1745_v46, %v1744_v53  ;;  %4700 = vmatprep.subr.bf16.mxu1 %v5102_v0 }
0x1025   :  { %4701 = vmatpush3.bf16.msra.mxu1 %v5103_v2 }
0x1026   :  { %4702 = vmatprep.subr.bf16.mxu1 %v5104_v3 }
0x1027   :  { %4494 = vmatmul.mubr.msk.bf16.gmra.mxu0 %vm170_vm0, %v1747_v57 }
0x1028   :  { %2453 = vmatprep.mubr.bf16.mxu0 %v5408_v1 }
0x1029   :  { %4703 = vmatpush3.bf16.msra.mxu1 %v5105_v5 }
0x102a   :  { %4704 = vmatprep.subr.bf16.mxu1 %v5106_v7 }
0x102d   :  { %4705 = vmatpush3.bf16.msra.mxu1 %v5107_v8 }
0x102e   :  { %4706 = vmatprep.subr.bf16.mxu1 %v5108_v9 }
0x1031   :  { %4707 = vmatpush3.bf16.msra.mxu1 %v5109_v10 }
0x1032   :  { %4918 = vmatprep.subr.bf16.mxu1 %v5409_v48 }
0x10df   :  { %v1848_v14 = vpop.f32.mrf.mxu0 }
0x10e0   :  { %v6030_v13 = vadd.f32 %v1848_v14, %v1761_v12 }
0x10e1   :  { %v1850_v16 = vpop.f32.mrf.mxu0 }
0x10e2   :  { %v6033_v19 = vmul.f32 0.70710677, %v6030_v13  ;;  %v6035_v20 = vadd.f32 %v1850_v16, %v1765_v6 }
0x10e3   :  { %v1852_v21 = vpop.f32.mrf.mxu0 }
0x10e4   :  { %v1899_v22 = vand.u32 2147483647, %v6033_v19  ;;  %v6039_v23 = vmul.f32 0.70710677, %v6035_v20  ;;  %v6041_v24 = vadd.f32 %v1852_v21, %v1761_v12  ;;  %vm1883_vm3 = vcmp.ge.f32.partialorder %v6033_v19, 0.0 }
0x10e5   :  { %v1854_v25 = vpop.f32.mrf.mxu0 }
0x10e6   :  { %v1907_v28 = vmul.f32 0.3275911, %v1899_v22  ;;  %v1900_v31 = vand.u32 2147483647, %v6039_v23  ;;  %v6045_v15 = vmul.f32 0.70710677, %v6041_v24  ;;  %v6047_v17 = vadd.f32 %v1854_v25, %v1765_v6 }
0x10e7   :  { %v1858_v18 = vpop.f32.mrf.mxu0  ;;  %v2011_v33 = vsub.f32 0.0, %v1899_v22  ;;  %vm1884_vm4 = vcmp.ge.f32.partialorder %v6039_v23, 0.0 }
0x10e8   :  { %v1915_v26 = vadd.f32 1.0, %v1907_v28  ;;  %v1908_v29 = vmul.f32 0.3275911, %v1900_v31  ;;  %v1901_v30 = vand.u32 2147483647, %v6045_v15  ;;  %v6054_v43 = vadd.f32 %v1858_v18, %v1761_v12 }
0x10e9   :  { %v6051_v34 = vmul.f32 0.70710677, %v6047_v17  ;;  %v1860_v58 = vpop.f32.mrf.mxu0  ;;  %v2012_v37 = vsub.f32 0.0, %v1900_v31  ;;  %v2019_v57 = vmul.f32 %v2011_v33, %v1899_v22  ;;  %vm1885_vm5 = vcmp.ge.f32.partialorder %v6045_v15, 0.0 }
0x10ea   :  { %5234 = vrcp.f32 %v1915_v26  ;;  %v1916_v36 = vadd.f32 1.0, %v1908_v29  ;;  %v1909_v38 = vmul.f32 0.3275911, %v1901_v30  ;;  %v6056_v35 = vadd.f32 %v1860_v58, %v1765_v6 }
0x10eb   :  { %v1902_v41 = vand.u32 2147483647, %v6051_v34  ;;  %v1862_v40 = vpop.f32.mrf.mxu0  ;;  %v6059_v27 = vmul.f32 0.70710677, %v6054_v43  ;;  %v2013_v52 = vsub.f32 0.0, %v1901_v30  ;;  %v2020_v61 = vmul.f32 %v2012_v37, %v1900_v31 }
0x10ec   :  { %5236 = vrcp.f32 %v1916_v36  ;;  %v1917_v4 = vadd.f32 1.0, %v1909_v38  ;;  %v6062_v42 = vmul.f32 0.70710677, %v6056_v35  ;;  %v6065_v53 = vadd.f32 %v1862_v40, %v1761_v12 }
0x10ed   :  { %v1910_v45 = vmul.f32 0.3275911, %v1902_v41  ;;  %v1903_v32 = vand.u32 2147483647, %v6059_v27  ;;  %v1864_v46 = vpop.f32.mrf.mxu0  ;;  %v2027_v5 = vmul.f32 1.442695, %v2019_v57  ;;  %v2021_v9 = vmul.f32 %v2013_v52, %v1901_v30 }
0x10ee   :  { %5238 = vrcp.f32 %v1917_v4  ;;  %v1904_v51 = vand.u32 2147483647, %v6062_v42  ;;  %v6069_v59 = vmul.f32 0.70710677, %v6065_v53  ;;  %v6071_v60 = vadd.f32 %v1864_v46, %v1765_v6 }
0x10ef   :  { %v1918_v47 = vadd.f32 1.0, %v1910_v45  ;;  %v1911_v50 = vmul.f32 0.3275911, %v1903_v32  ;;  %v2014_v10 = vsub.f32 0.0, %v1902_v41  ;;  %v2029_v12 = vmul.f32 1.442695, %v2020_v61 }
0x10f0   :  { %v1912_v63 = vmul.f32 0.3275911, %v1904_v51  ;;  %v1905_v0 = vand.u32 2147483647, %v6069_v59  ;;  %v6075_v2 = vmul.f32 0.70710677, %v6071_v60 }
0x10f1   :  { %5240 = vrcp.f32 %v1918_v47  ;;  %v1919_v62 = vadd.f32 1.0, %v1911_v50  ;;  %v2015_v21 = vsub.f32 0.0, %v1903_v32  ;;  %v2031_v26 = vmul.f32 1.442695, %v2021_v9 }
0x10f2   :  { %v1920_v7 = vadd.f32 1.0, %v1912_v63  ;;  %v1913_v11 = vmul.f32 0.3275911, %v1905_v0  ;;  %v6082_v6 = vand.u32 2147483647, %v6075_v2  ;;  %v2022_v29 = vmul.f32 %v2014_v10, %v1902_v41 }
0x10f3   :  { %5242 = vrcp.f32 %v1919_v62  ;;  %v2016_v36 = vsub.f32 0.0, %v1904_v51  ;;  %v5418_v4 = vmov -1.0   ;;  %v2023_v33 = vmul.f32 %v2015_v21, %v1903_v32 }
0x10f4   :  { %5244 = vrcp.f32 %v1920_v7  ;;  %v1921_v22 = vadd.f32 1.0, %v1913_v11  ;;  %v1914_v28 = vmul.f32 0.3275911, %v6082_v6  ;;  %v6096_v40 = vsel %vm1883_vm3, 1.0, %v5418_v4 }
0x10f5   :  { %5246 = vpow2.f32 %v2027_v5  ;;  %v2017_v46 = vsub.f32 0.0, %v1905_v0  ;;  %v6105_v50 = vsel %vm1884_vm4, 1.0, %v5418_v4  ;;  %v2033_v52 = vmul.f32 1.442695, %v2022_v29 }
0x10f6   :  { %5248 = vrcp.f32 %v1921_v22  ;;  %v1922_v38 = vadd.f32 1.0, %v1914_v28  ;;  %v2024_v62 = vmul.f32 %v2016_v36, %v1904_v51  ;;  %v2035_v7 = vmul.f32 1.442695, %v2023_v33 }
0x10f7   :  { %v6077_v3 = vpop.eup %5234  ;;  %5250 = vpow2.f32 %v2029_v12  ;;  %v2025_v10 = vmul.f32 %v2017_v46, %v1905_v0  ;;  %v1893_v15 = vsel %vm1885_vm5, 1.0, %v5418_v4  ;;  %vm1886_vm6 = vcmp.ge.f32.partialorder %v6051_v34, 0.0 }
0x10f8   :  { %v1939_v8 = vmul.f32 1.0614054, %v6077_v3  ;;  %5252 = vrcp.f32 %v1922_v38  ;;  %vm1887_vm7 = vcmp.ge.f32.partialorder %v6059_v27, 0.0  ;;  %vm1888_vm8 = vcmp.ge.f32.partialorder %v6062_v42, 0.0 }
0x10f9   :  { %v6084_v14 = vpop.eup %5236  ;;  %5254 = vpow2.f32 %v2031_v26  ;;  %vm1889_vm9 = vcmp.ge.f32.partialorder %v6069_v59, 0.0  ;;  %vm1890_vm10 = vcmp.ge.f32.partialorder %v6075_v2, 0.0  ;;  %v1871_v2 = vmul.f32 0.5, %v6054_v43 }
0x10fa   :  { %v1947_v16 = vadd.f32 -1.4531521, %v1939_v8  ;;  %v1940_v25 = vmul.f32 1.0614054, %v6084_v14  ;;  %5256 = vpow2.f32 %v2033_v52  ;;  %v1897_v59 = vsel %vm1889_vm9, 1.0, %v5418_v4 }
0x10fb   :  { %v6089_v31 = vpop.eup %5238  ;;  %5258 = vpow2.f32 %v2035_v7 }
0x10fc   :  { %v1955_v18 = vmul.f32 %v6077_v3, %v1947_v16  ;;  %v1948_v30 = vadd.f32 -1.4531521, %v1940_v25  ;;  %v1941_v58 = vmul.f32 1.0614054, %v6089_v31  ;;  %v2018_v16 = vsub.f32 0.0, %v6082_v6 }
0x10fd   :  { %v2037_v25 = vmul.f32 1.442695, %v2024_v62 }
0x10fe   :  { %v1963_v45 = vadd.f32 1.4214138, %v1955_v18  ;;  %v6098_v47 = vpop.eup %5240  ;;  %v1956_v37 = vmul.f32 %v6084_v14, %v1948_v30  ;;  %v1949_v41 = vadd.f32 -1.4531521, %v1941_v58  ;;  %v2039_v58 = vmul.f32 1.442695, %v2025_v10 }
0x10ff   :  { %v1942_v19 = vmul.f32 1.0614054, %v6098_v47  ;;  %5260 = vpow2.f32 %v2037_v25 }
0x1100   :  { %v1971_v57 = vmul.f32 %v6077_v3, %v1963_v45  ;;  %v1964_v61 = vadd.f32 1.4214138, %v1956_v37  ;;  %v1957_v32 = vmul.f32 %v6089_v31, %v1949_v41  ;;  %v6111_v23 = vpop.eup %5242  ;;  %v2026_v37 = vmul.f32 %v2018_v16, %v6082_v6 }
0x1101   :  { %v1950_v5 = vadd.f32 -1.4531521, %v1942_v19  ;;  %v1943_v22 = vmul.f32 1.0614054, %v6111_v23  ;;  %v6119_v0 = vpop.eup %5244  ;;  %5262 = vpow2.f32 %v2039_v58 }
0x1102   :  { %v1979_v63 = vadd.f32 -0.28449672, %v1971_v57  ;;  %v1972_v8 = vmul.f32 %v6084_v14, %v1964_v61  ;;  %v1965_v9 = vadd.f32 1.4214138, %v1957_v32  ;;  %v5247_v36 = vpop.eup %5246  ;;  %v1944_v33 = vmul.f32 1.0614054, %v6119_v0 }
0x1103   :  { %v1958_v12 = vmul.f32 %v6098_v47, %v1950_v5  ;;  %v1951_v30 = vadd.f32 -1.4531521, %v1943_v22  ;;  %v6126_v41 = vpop.eup %5248 }
0x1104   :  { %v1987_v11 = vmul.f32 %v6077_v3, %v1979_v63  ;;  %v1980_v21 = vadd.f32 -0.28449672, %v1972_v8  ;;  %v1973_v51 = vmul.f32 %v6089_v31, %v1965_v9  ;;  %v1952_v32 = vadd.f32 -1.4531521, %v1944_v33 }
0x1105   :  { %v1966_v18 = vadd.f32 1.4214138, %v1958_v12  ;;  %v1959_v19 = vmul.f32 %v6111_v23, %v1951_v30  ;;  %v1945_v62 = vmul.f32 1.0614054, %v6126_v41 }
0x1106   :  { %v1995_v28 = vadd.f32 0.2548296, %v1987_v11  ;;  %v1988_v26 = vmul.f32 %v6084_v14, %v1980_v21  ;;  %v1981_v29 = vadd.f32 -0.28449672, %v1973_v51  ;;  %v1960_v9 = vmul.f32 %v6119_v0, %v1952_v32 }
0x1107   :  { %v1974_v45 = vmul.f32 %v6098_v47, %v1966_v18  ;;  %v1967_v7 = vadd.f32 1.4214138, %v1959_v19  ;;  %v1953_v10 = vadd.f32 -1.4531521, %v1945_v62  ;;  %v2041_v11 = vmul.f32 1.442695, %v2026_v37 }
0x1108   :  { %v2003_v38 = vmul.f32 %v6077_v3, %v1995_v28  ;;  %v1996_v46 = vadd.f32 0.2548296, %v1988_v26  ;;  %v1989_v57 = vmul.f32 %v6089_v31, %v1981_v29  ;;  %v5251_v3 = vpop.eup %5250  ;;  %v1968_v28 = vadd.f32 1.4214138, %v1960_v9 }
0x1109   :  { %v1982_v61 = vadd.f32 -0.28449672, %v1974_v45  ;;  %v6132_v6 = vpop.eup %5252  ;;  %v1975_v21 = vmul.f32 %v6111_v23, %v1967_v7  ;;  %v1961_v18 = vmul.f32 %v6126_v41, %v1953_v10  ;;  %5264 = vpow2.f32 %v2041_v11 }
0x110a   :  { %v2043_v52 = vmul.f32 %v5247_v36, %v2003_v38  ;;  %v2004_v63 = vmul.f32 %v6084_v14, %v1996_v46  ;;  %v1997_v5 = vadd.f32 0.2548296, %v1989_v57  ;;  %v1946_v51 = vmul.f32 1.0614054, %v6132_v6  ;;  %v5255_v22 = vpop.eup %5254 }
0x110b   :  { %v1990_v8 = vmul.f32 %v6098_v47, %v1982_v61  ;;  %v1983_v30 = vadd.f32 -0.28449672, %v1975_v21  ;;  %v1969_v38 = vadd.f32 1.4214138, %v1961_v18  ;;  %v5257_v45 = vpop.eup %5256 }
0x110c   :  { %v2044_v12 = vmul.f32 %v5251_v3, %v2004_v63  ;;  %v2005_v16 = vmul.f32 %v6089_v31, %v1997_v5  ;;  %v2051_v14 = vsub.f32 1.0, %v2043_v52  ;;  %v1954_v58 = vadd.f32 -1.4531521, %v1946_v51  ;;  %v5259_v32 = vpop.eup %5258 }
0x110d   :  { %v1998_v25 = vadd.f32 0.2548296, %v1990_v8  ;;  %v1976_v31 = vmul.f32 %v6119_v0, %v1968_v28  ;;  %v1991_v37 = vmul.f32 %v6111_v23, %v1983_v30  ;;  %v1977_v61 = vmul.f32 %v6126_v41, %v1969_v38 }
0x110e   :  { %v2052_v26 = vsub.f32 1.0, %v2044_v12  ;;  %v2045_v29 = vmul.f32 %v5255_v22, %v2005_v16  ;;  %v1962_v46 = vmul.f32 %v6132_v6, %v1954_v58  ;;  %v2059_v62 = vmul.f32 %v2051_v14, %v6096_v40  ;;  %v5261_v16 = vpop.eup %5260 }
0x110f   :  { %v2006_v36 = vmul.f32 %v6098_v47, %v1998_v25  ;;  %v1984_v52 = vadd.f32 -0.28449672, %v1976_v31  ;;  %v1999_v3 = vadd.f32 0.2548296, %v1991_v37  ;;  %v1868_v5 = vmul.f32 0.5, %v6035_v20  ;;  %v5263_v28 = vpop.eup %5262 }
0x1110   :  { %v2053_v33 = vsub.f32 1.0, %v2045_v29  ;;  %v2060_v57 = vmul.f32 %v2052_v26, %v6105_v50  ;;  %v1970_v63 = vadd.f32 1.4214138, %v1962_v46  ;;  %v1985_v9 = vadd.f32 -0.28449672, %v1977_v61 }
0x1111   :  { %v2046_v19 = vmul.f32 %v5257_v45, %v2006_v36  ;;  %v1992_v8 = vmul.f32 %v6119_v0, %v1984_v52  ;;  %v1894_v50 = vsel %vm1886_vm6, 1.0, %v5418_v4  ;;  %v2007_v11 = vmul.f32 %v6111_v23, %v1999_v3 }
0x1112   :  { %v2061_v47 = vmul.f32 %v2053_v33, %v1893_v15  ;;  %v1978_v12 = vmul.f32 %v6132_v6, %v1970_v63  ;;  %v2068_v40 = vadd.f32 1.0, %v2060_v57  ;;  %v1993_v51 = vmul.f32 %v6126_v41, %v1985_v9 }
0x1113   :  { %v2054_v7 = vsub.f32 1.0, %v2046_v19  ;;  %v2000_v21 = vadd.f32 0.2548296, %v1992_v8  ;;  %v2067_v20 = vadd.f32 1.0, %v2059_v62  ;;  %v1869_v22 = vmul.f32 0.5, %v6041_v24 }
0x1114   :  { %v2069_v10 = vadd.f32 1.0, %v2061_v47  ;;  %v1870_v14 = vmul.f32 0.5, %v6047_v17  ;;  %v1986_v25 = vadd.f32 -0.28449672, %v1978_v12  ;;  %v2047_v34 = vmul.f32 %v5259_v32, %v2007_v11 }
0x1115   :  { %v2062_v15 = vmul.f32 %v2054_v7, %v1894_v50  ;;  %v2008_v26 = vmul.f32 %v6119_v0, %v2000_v21  ;;  %v2001_v23 = vadd.f32 0.2548296, %v1993_v51  ;;  %v1867_v29 = vmul.f32 0.5, %v6030_v13 }
0x1116   :  { %v2077_v30 = vmul.f32 %v2069_v10, %v1869_v22  ;;  %v1994_v58 = vmul.f32 %v6132_v6, %v1986_v25  ;;  %v2076_v36 = vmul.f32 %v2068_v40, %v1868_v5  ;;  %v2055_v0 = vsub.f32 1.0, %v2047_v34  ;;  %v5265_v19 = vpop.eup %5264 }
0x1117   :  { %v2070_v18 = vadd.f32 1.0, %v2062_v15  ;;  %v2048_v38 = vmul.f32 %v5261_v16, %v2008_v26  ;;  %v2009_v24 = vmul.f32 %v6126_v41, %v2001_v23  ;;  %v2075_v17 = vmul.f32 %v2067_v20, %v1867_v29 }
0x1118   :  { %v2002_v45 = vadd.f32 0.2548296, %v1994_v58  ;;  %v1895_v52 = vsel %vm1887_vm7, 1.0, %v5418_v4  ;;  %v1896_v41 = vsel %vm1888_vm8, 1.0, %v5418_v4  ;;  %v1898_v63 = vsel %vm1890_vm10, 1.0, %v5418_v4 }
0x1119   :  { %v2078_v31 = vmul.f32 %v2070_v18, %v1870_v14  ;;  %v2056_v33 = vsub.f32 1.0, %v2048_v38  ;;  %v2049_v37 = vmul.f32 %v5263_v28, %v2009_v24  ;;  %v2083_v46 = vpack.c.bf16 %v2077_v30, %v2075_v17 }
0x111a   :  { %v2010_v57 = vmul.f32 %v6132_v6, %v2002_v45  ;;  %v2063_v62 = vmul.f32 %v2055_v0, %v1895_v52  ;;  %v1873_v8 = vmul.f32 0.5, %v6065_v53  ;;  %v1872_v9 = vmul.f32 0.5, %v6056_v35  ;;  %v4495_v35 = vld [vmem:[%s6782_s14] ss:$0 sm:$0xff] }
0x111b   :  { %v2084_v13 = vpack.c.bf16 %v2078_v31, %v2076_v36  ;;  %v2057_v61 = vsub.f32 1.0, %v2049_v37  ;;  %v2064_v42 = vmul.f32 %v2056_v33, %v1896_v41  ;;  %v1874_v10 = vmul.f32 0.5, %v6071_v60 }
0x111c   :  { %v2050_v32 = vmul.f32 %v5265_v19, %v2010_v57  ;;  %v2071_v7 = vadd.f32 1.0, %v2063_v62 }
0x111d   :  { %2254 = vmatprep.mubr.bf16.mxu1 %v2084_v13  ;;  %v2065_v47 = vmul.f32 %v2057_v61, %v1897_v59  ;;  %v2072_v5 = vadd.f32 1.0, %v2064_v42 }
0x111e   :  { %2255 = vmatmul.mubr.bf16.vlgmr.msra.gmra.mxu1 %v2083_v46  ;;  %v2058_v3 = vsub.f32 1.0, %v2050_v32  ;;  %v2079_v40 = vmul.f32 %v2071_v7, %v1871_v2  ;;  %v5115_v7 = vld [vmem:[%s6773_s5 + $0x64] ss:$8 sps:$4 sm:$0xff]   ;;  %v5119_v2 = vld [vmem:[%s6773_s5 + $0x40] ss:$8 sps:$4 sm:$0xff]  }
0x111f   :  { %v2073_v6 = vadd.f32 1.0, %v2065_v47  ;;  %v2080_v12 = vmul.f32 %v2072_v5, %v1872_v9  ;;  %v5112_v5 = vld [vmem:[%s6773_s5 + $0x74] ss:$8 sps:$4 sm:$0xff]  }
0x1120   :  { %v2066_v27 = vmul.f32 %v2058_v3, %v1898_v63  ;;  %2429 = vmatprep.subr.bf16.mxu0 %v5112_v5  ;;  %v5118_v9 = vld [vmem:[%s6773_s5 + $0x54] ss:$8 sps:$4 sm:$0xff]  }
0x1121   :  { %v2081_v11 = vmul.f32 %v2073_v6, %v1873_v8  ;;  %v5113_v8 = vld [vmem:[%s6773_s5 + $0x60] ss:$8 sps:$4 sm:$0xff]  }
0x1122   :  { %v2074_v50 = vadd.f32 1.0, %v2066_v27  ;;  %v5110_v27 = vld [vmem:[%s6773_s5 + $0x70] ss:$8 sps:$4 sm:$0xff]  }
0x1123   :  { %v2085_v21 = vpack.c.bf16 %v2081_v11, %v2079_v40  ;;  %2430 = vmatpush1.bf16.msra.mxu0 %v5110_v27 }
0x1124   :  { %v2082_v16 = vmul.f32 %v2074_v50, %v1874_v10  ;;  %2431 = vmatprep.subr.bf16.mxu0 %v5115_v7  ;;  %v5116_v10 = vld [vmem:[%s6773_s5 + $0x50] ss:$8 sps:$4 sm:$0xff]   ;;  %v5121_v50 = vld [vmem:[%s6773_s5 + $0x44] ss:$8 sps:$4 sm:$0xff]  }
0x1126   :  { %v2086_v15 = vpack.c.bf16 %v2082_v16, %v2080_v12 }
0x1127   :  { %2432 = vmatpush1.bf16.msra.mxu0 %v5113_v8 }
0x1128   :  { %2262 = vmatprep.mubr.bf16.mxu1 %v2086_v15  ;;  %2433 = vmatprep.subr.bf16.mxu0 %v5118_v9 }
0x1129   :  { %2263 = vmatmul.mubr.bf16.gmra.mxu1 %v2085_v21 }
0x112a   :  { %4920 = vmatprep.mubr.msk.bf16.mxu1 %vm5410_vm1, %v5409_v48 }
0x112b   :  { %2434 = vmatpush1.bf16.msra.mxu0 %v5116_v10 }
0x112c   :  { %2435 = vmatprep.subr.bf16.mxu0 %v5121_v50 }
0x112f   :  { %2436 = vmatpush1.bf16.msra.mxu0 %v5119_v2 }
0x1130   :  { %4912 = vmatprep.subr.bf16.mxu0 %v5409_v48 }
0x11de   :  { %v4708_v51 = vpop.f32.mrf.mxu1 }
0x11e0   :  { %v4709_v53 = vpop.f32.mrf.mxu1 }
0x11e1   :  { %v4710_v60 = vadd.f32 %v4709_v53, %v4708_v51 }
0x11e2   :  { %v4711_v20 = vpop.f32.mrf.mxu1 }
0x11e3   :  { %v2257_v43 = vadd.f32 %v4710_v60, %v4495_v35 }
0x11e4   :  { %v4712_v22 = vpop.f32.mrf.mxu1 }
0x11e5   :  { %v6183_v14 = vadd.f32 %v2257_v43, %v5914_v54  ;;  %v4713_v25 = vadd.f32 %v4712_v22, %v4711_v20 }
0x11e7   :  { %v2260_v28 = vadd.f32 %v4713_v25, %v4495_v35  ;;  %v2279_v18 = vsel %vm170_vm0, %v6183_v14, 0.0  ;;  %v4514_v25 = vld [vmem:[%s6771_s3 + $0x1] ss:$0 sm:$0xff] }
0x11e8   :  { %2280 = vadd.xlane.f32.xlu0 %v2279_v18 }
0x11e9   :  { %v6188_v34 = vadd.f32 %v2260_v28, %v5924_v39  ;;  %v4714_v26 = vpop.f32.mrf.mxu1 }
0x11eb   :  { %v2282_v23 = vsel %vm170_vm0, %v6188_v34, 0.0  ;;  %v4715_v29 = vpop.f32.mrf.mxu1 }
0x11ec   :  { %2283 = vadd.xlane.f32.xlu1 %v2282_v23  ;;  %v4716_v30 = vadd.f32 %v4715_v29, %v4714_v26  ;;  %v4515_v29 = vld [vmem:[%s6772_s4 + $0x1] ss:$0 sm:$0xff] }
0x11ed   :  { %v4717_v58 = vpop.f32.mrf.mxu1 }
0x11ee   :  { %v2265_v36 = vadd.f32 %v4716_v30, %v4495_v35 }
0x11ef   :  { %v4718_v54 = vpop.f32.mrf.mxu1 }
0x11f0   :  { %v6193_v31 = vadd.f32 %v2265_v36, %v5926_v55  ;;  %v4719_v38 = vadd.f32 %v4718_v54, %v4717_v58 }
0x11f2   :  { %v2268_v24 = vadd.f32 %v4719_v38, %v4495_v35  ;;  %v2285_v17 = vsel %vm170_vm0, %v6193_v31, 0.0 }
0x11f3   :  { %2286 = vadd.xlane.f32.xlu0 %v2285_v17 }
0x11f4   :  { %v6198_v39 = vadd.f32 %v2268_v24, %v5919_v44 }
0x11f6   :  { %v2288_v45 = vsel %vm170_vm0, %v6198_v39, 0.0 }
0x11f7   :  { %2289 = vadd.xlane.f32.xlu1 %v2288_v45 }
0x1271   :  { %v2281_v0 = vpop.xlane.xlu0 %2280 }
0x1272   :  { %v2291_v33 = vmul.f32 0.015625, %v2281_v0 }
0x1274   :  { %v2295_v37 = vsub.f32 %v6183_v14, %v2291_v33 }
0x1275   :  { %v2284_v13 = vpop.xlane.xlu1 %2283 }
0x1276   :  { %v2292_v55 = vmul.f32 0.015625, %v2284_v13  ;;  %v2299_v46 = vmul.f32 %v2295_v37, %v2295_v37 }
0x1278   :  { %v2296_v57 = vsub.f32 %v6188_v34, %v2292_v55  ;;  %v2303_v19 = vsel %vm170_vm0, %v2299_v46, 0.0  ;;  %v4524_v46 = vld [vmem:[%s6774_s6 + $0x2] sm:$0x3] }
0x1279   :  { %2304 = vadd.xlane.f32.xlu0 %v2303_v19  ;;  %v2368_v19 = vrot.slane %v4524_v46, %v5673_v49 }
0x127a   :  { %v2300_v52 = vmul.f32 %v2296_v57, %v2296_v57 }
0x127c   :  { %v2306_v44 = vsel %vm170_vm0, %v2300_v52, 0.0  ;;  %v2287_v41 = vpop.xlane.xlu0 %2286 }
0x127d   :  { %2307 = vadd.xlane.f32.xlu1 %v2306_v44  ;;  %v2293_v61 = vmul.f32 0.015625, %v2287_v41  ;;  %v2372_v44 = vrot.slane %v4524_v46, %v5683_v56 }
0x127f   :  { %v2297_v42 = vsub.f32 %v6193_v31, %v2293_v61 }
0x1280   :  { %v2290_v59 = vpop.xlane.xlu1 %2289 }
0x1281   :  { %v2294_v32 = vmul.f32 0.015625, %v2290_v59  ;;  %v2301_v62 = vmul.f32 %v2297_v42, %v2297_v42 }
0x1283   :  { %v2298_v47 = vsub.f32 %v6198_v39, %v2294_v32  ;;  %v2309_v3 = vsel %vm170_vm0, %v2301_v62, 0.0 }
0x1284   :  { %2310 = vadd.xlane.f32.xlu0 %v2309_v3 }
0x1285   :  { %v2302_v6 = vmul.f32 %v2298_v47, %v2298_v47 }
0x1287   :  { %v2312_v63 = vsel %vm170_vm0, %v2302_v6, 0.0 }
0x1288   :  { %2313 = vadd.xlane.f32.xlu1 %v2312_v63 }
0x1302   :  { %v2305_v11 = vpop.xlane.xlu0 %2304 }
0x1303   :  { %v2315_v12 = vmul.f32 0.015625, %v2305_v11 }
0x1305   :  { %v2319_v16 = vadd.f32 1e-05, %v2315_v12 }
0x1306   :  { %v2308_v40 = vpop.xlane.xlu1 %2307 }
0x1307   :  { %5266 = vrsqrt.f32 %v2319_v16  ;;  %v2316_v15 = vmul.f32 0.015625, %v2308_v40 }
0x1309   :  { %v2320_v21 = vadd.f32 1e-05, %v2316_v15 }
0x130b   :  { %5268 = vrsqrt.f32 %v2320_v21 }
0x130d   :  { %v2311_v51 = vpop.xlane.xlu0 %2310 }
0x130e   :  { %v2317_v35 = vmul.f32 0.015625, %v2311_v51 }
0x1310   :  { %v2321_v53 = vadd.f32 1e-05, %v2317_v35 }
0x1311   :  { %v2314_v60 = vpop.xlane.xlu1 %2313 }
0x1312   :  { %5270 = vrsqrt.f32 %v2321_v53  ;;  %v2318_v43 = vmul.f32 0.015625, %v2314_v60 }
0x1314   :  { %v5267_v20 = vpop.eup %5266  ;;  %v2322_v28 = vadd.f32 1e-05, %v2318_v43 }
0x1315   :  { %v2327_v22 = vmul.f32 %v5267_v20, %v2295_v37 }
0x1316   :  { %5272 = vrsqrt.f32 %v2322_v28 }
0x1317   :  { %v2337_v26 = vmul.f32 %v4514_v25, %v2327_v22 }
0x1318   :  { %v5269_v18 = vpop.eup %5268 }
0x1319   :  { %v2328_v23 = vmul.f32 %v5269_v18, %v2296_v57  ;;  %v2347_v58 = vadd.f32 %v4515_v29, %v2337_v26 }
0x131b   :  { %v2338_v30 = vmul.f32 %v4514_v25, %v2328_v23 }
0x131d   :  { %v2348_v36 = vadd.f32 %v4515_v29, %v2338_v30 }
0x131f   :  { %v2351_v54 = vpack.c.bf16 %v2348_v36, %v2347_v58  ;;  %v5271_v38 = vpop.eup %5270 }
0x1320   :  { %v2329_v24 = vmul.f32 %v5271_v38, %v2297_v42 }
0x1321   :  { %4533 = vmatmul.mubr.msk.bf16.vlgmr.msra.gmra.mxu0 %vm170_vm0, %v2351_v54 }
0x1322   :  { %2463 = vmatprep.mubr.bf16.mxu0 %v5408_v1  ;;  %v2339_v0 = vmul.f32 %v4514_v25, %v2329_v24 }
0x1323   :  { %v5273_v17 = vpop.eup %5272 }
0x1324   :  { %v2330_v45 = vmul.f32 %v5273_v17, %v2298_v47  ;;  %v2349_v37 = vadd.f32 %v4515_v29, %v2339_v0 }
0x1326   :  { %v2340_v33 = vmul.f32 %v4514_v25, %v2330_v45 }
0x1328   :  { %v2350_v13 = vadd.f32 %v4515_v29, %v2340_v33 }
0x132a   :  { %v2352_v55 = vpack.c.bf16 %v2350_v13, %v2349_v37 }
0x132c   :  { %4534 = vmatmul.mubr.msk.bf16.gmra.mxu0 %vm170_vm0, %v2352_v55 }
0x132d   :  { %4914 = vmatprep.mubr.msk.bf16.mxu0 %vm5410_vm1, %v5409_v48 }
0x13e1   :  { %v2455_v57 = vpop.f32.mrf.mxu0 }
0x13e2   :  { %v2456_v61 = vadd.f32 %v2455_v57, %v2368_v19 }
0x13e3   :  { %v2457_v52 = vpop.f32.mrf.mxu0 }
0x13e4   :  { %v2458_v32 = vadd.f32 %v2457_v52, %v2372_v44 }
0x13e5   :  { %v2459_v41 = vpop.f32.mrf.mxu0 }
0x13e6   :  { %v2460_v42 = vadd.f32 %v2459_v41, %v2368_v19 }
0x13e7   :  { %v2461_v59 = vpop.f32.mrf.mxu0 }
0x13e8   :  { %v6251_v62 = vpack.c.bf16 %v2460_v42, %v2456_v61  ;;  %v2462_v47 = vadd.f32 %v2461_v59, %v2372_v44 }
0x13ea   :  { %v6253_v3 = vpack.c.bf16 %v2462_v47, %v2458_v32  ;;  %2486 = vrot.lane.b32.xlu0 %v6251_v62, %s5411_s20 }
0x13ec   :  { %v2465_v6 = vpop.f32.mrf.mxu0 }
0x13ed   :  { %v2466_v27 = vadd.f32 %v2465_v6, %v2368_v19 }
0x13ee   :  { %v2467_v63 = vpop.f32.mrf.mxu0 }
0x13ef   :  { %v2468_v16 = vadd.f32 %v2467_v63, %v2372_v44 }
0x13f0   :  { %v2469_v5 = vpop.f32.mrf.mxu0 }
0x13f1   :  { %v2470_v7 = vadd.f32 %v2469_v5, %v2368_v19 }
0x13f2   :  { %v2471_v2 = vpop.f32.mrf.mxu0 }
0x13f3   :  { %v6257_v8 = vpack.c.bf16 %v2470_v7, %v2466_v27  ;;  %v2472_v12 = vadd.f32 %v2471_v2, %v2372_v44 }
0x13f5   :  { %2536 = vrot.lane.b32.xlu1 %v6257_v8, %s5411_s20  ;;  %v6271_v40 = vpack.c.bf16 %v2472_v12, %v2468_v16 }
0x145c   :  { %v2487_v9 = vpop.permute.xlu0 %2486 }
0x145d   :  { %v2492_v10 = vsel %vm435_vm2, %v2487_v9, 0 }
0x145e   :  { %4913 = vmatpush3.bf16.xpose.msra.mxu0 %v2492_v10 }
0x145f   :  { %4924 = vmatprep.subr.bf16.mxu0 %v5409_v48 }
0x1465   :  { %4915 = vmatmul.mubr.msk.bf16.vlgmr.msra.gmra.mxu0 %vm435_vm2, %v6251_v62 }
0x1466   :  { %4925 = vmatpush3.bf16.msra.mxu0 %v6253_v3  ;;  %4926 = vmatprep.mubr.msk.bf16.mxu0 %vm5410_vm1, %v5409_v48 }
0x1467   :  { %4936 = vmatprep.subr.bf16.mxu0 %v5409_v48  ;;  %v2537_v50 = vpop.permute.xlu1 %2536 }
0x1468   :  { %v2542_v11 = vsel %vm435_vm2, %v2537_v50, 0 }
0x1469   :  { %4919 = vmatpush3.bf16.xpose.msra.mxu1 %v2542_v11 }
0x146a   :  { %4930 = vmatprep.subr.bf16.mxu1 %v5409_v48 }
0x1470   :  { %4921 = vmatmul.mubr.msk.bf16.vlgmr.msra.gmra.mxu1 %vm435_vm2, %v6257_v8 }
0x1471   :  { %4931 = vmatpush3.bf16.msra.mxu1 %v6271_v40  ;;  %4932 = vmatprep.mubr.msk.bf16.mxu1 %vm5410_vm1, %v5409_v48 }
0x1472   :  { %4942 = vmatprep.subr.bf16.mxu1 %v5409_v48 }
0x1525   :  { %v2528_v15 = vpop.f32.mrf.mxu0 }
0x1526   :  { %v2585_v21 = vsel %vm435_vm2, %v2528_v15, -inf }
0x1527   :  { %v4916_v51 = vpop.f32.mrf.mxu0  ;;  %2586 = vmax.xlane.f32.xlu1 %v2585_v21 }
0x1529   :  { %v2531_v35 = vpop.f32.mrf.mxu0 }
0x152a   :  { %v2588_v53 = vsel %vm435_vm2, %v2531_v35, -inf }
0x152b   :  { %2589 = vmax.xlane.f32.xlu0 %v2588_v53  ;;  %v4917_v60 = vpop.f32.mrf.mxu0 }
0x1530   :  { %v2578_v20 = vpop.f32.mrf.mxu1 }
0x1531   :  { %v2591_v43 = vsel %vm435_vm2, %v2578_v20, -inf }
0x1532   :  { %2592 = vmax.xlane.f32.xlu0 %v2591_v43  ;;  %v4922_v22 = vpop.f32.mrf.mxu1 }
0x1534   :  { %v2581_v25 = vpop.f32.mrf.mxu1 }
0x1535   :  { %v2594_v28 = vsel %vm435_vm2, %v2581_v25, -inf }
0x1536   :  { %2595 = vmax.xlane.f32.xlu1 %v2594_v28  ;;  %v4923_v18 = vpop.f32.mrf.mxu1 }
0x15b0   :  { %v2587_v26 = vpop.xlane.xlu1 %2586 }
0x15b1   :  { %v2597_v23 = vsub.f32 %v2528_v15, %v2587_v26 }
0x15b3   :  { %v2601_v29 = vmul.f32 1.442695, %v2597_v23 }
0x15b4   :  { %v2590_v30 = vpop.xlane.xlu0 %2589 }
0x15b5   :  { %5274 = vpow2.f32 %v2601_v29  ;;  %v2598_v58 = vsub.f32 %v2531_v35, %v2590_v30 }
0x15b7   :  { %v2603_v36 = vmul.f32 1.442695, %v2598_v58 }
0x15b9   :  { %5276 = vpow2.f32 %v2603_v36 }
0x15bb   :  { %v2593_v54 = vpop.xlane.xlu0 %2592 }
0x15bc   :  { %v2599_v38 = vsub.f32 %v2578_v20, %v2593_v54 }
0x15be   :  { %v2605_v24 = vmul.f32 1.442695, %v2599_v38 }
0x15bf   :  { %v2596_v55 = vpop.xlane.xlu1 %2595 }
0x15c0   :  { %5278 = vpow2.f32 %v2605_v24  ;;  %v2600_v46 = vsub.f32 %v2581_v25, %v2596_v55 }
0x15c2   :  { %v5275_v17 = vpop.eup %5274  ;;  %v2607_v57 = vmul.f32 1.442695, %v2600_v46 }
0x15c3   :  { %v2609_v45 = vsel %vm435_vm2, %v5275_v17, 0.0 }
0x15c4   :  { %2610 = vadd.xlane.f32.xlu0 %v2609_v45  ;;  %5280 = vpow2.f32 %v2607_v57 }
0x15c6   :  { %v5277_v0 = vpop.eup %5276 }
0x15c7   :  { %v2612_v33 = vsel %vm435_vm2, %v5277_v0, 0.0 }
0x15c8   :  { %2613 = vadd.xlane.f32.xlu1 %v2612_v33 }
0x15cd   :  { %v5279_v37 = vpop.eup %5278 }
0x15ce   :  { %v2615_v13 = vsel %vm435_vm2, %v5279_v37, 0.0 }
0x15cf   :  { %2616 = vadd.xlane.f32.xlu0 %v2615_v13 }
0x15d1   :  { %v5281_v19 = vpop.eup %5280 }
0x15d2   :  { %v2618_v52 = vsel %vm435_vm2, %v5281_v19, 0.0 }
0x15d9   :  { %2776 = vrot.lane.b32.xlu1 %v6257_v8, %s5412_s21 }
0x15e5   :  { %2725 = vrot.lane.b32.xlu0 %v6251_v62, %s5412_s21 }
0x15fd   :  { %2619 = vadd.xlane.f32.xlu1 %v2618_v52 }
0x160e   :  { %2723 = vrot.lane.b32.xlu1 %v6251_v62, %s5413_s22 }
0x1612   :  { %2774 = vrot.lane.b32.xlu1 %v6257_v8, %s5413_s22 }
0x164d   :  { %v2611_v44 = vpop.xlane.xlu0 %2610 }
0x164e   :  { %5282 = vrcp.f32 %v2611_v44 }
0x1651   :  { %v2614_v41 = vpop.xlane.xlu1 %2613 }
0x1652   :  { %5284 = vrcp.f32 %v2614_v41 }
0x1655   :  { %v2777_v27 = vpop.permute.xlu1 %2776 }
0x1656   :  { %v2782_v16 = vsel %vm435_vm2, %v2777_v27, 0 }
0x1658   :  { %v2617_v61 = vpop.xlane.xlu0 %2616 }
0x1659   :  { %5286 = vrcp.f32 %v2617_v61 }
0x165b   :  { %v5283_v42 = vpop.eup %5282 }
0x165c   :  { %v2625_v32 = vmul.f32 %v5283_v42, %v5275_v17  ;;  %v2726_v6 = vpop.permute.xlu0 %2725 }
0x165d   :  { %v2731_v5 = vsel %vm435_vm2, %v2726_v6, 0 }
0x165f   :  { %v5285_v59 = vpop.eup %5284 }
0x1660   :  { %v2626_v47 = vmul.f32 %v5285_v59, %v5277_v0 }
0x1662   :  { %v2629_v63 = vpack.c.bf16 %v2626_v47, %v2625_v32 }
0x1664   :  { %4927 = vmatmul.mubr.msk.bf16.vlgmr.msra.gmra.mxu0 %vm435_vm2, %v2629_v63 }
0x1665   :  { %4937 = vmatpush3.bf16.xpose.msra.mxu0 %v2731_v5  ;;  %4938 = vmatprep.mubr.msk.bf16.mxu0 %vm5410_vm1, %v5409_v48 }
0x1666   :  { %4948 = vmatprep.subr.bf16.mxu0 %v5409_v48  ;;  %v5287_v10 = vpop.eup %5286 }
0x1667   :  { %v2627_v2 = vmul.f32 %v5287_v10, %v5279_v37 }
0x1686   :  { %v2620_v7 = vpop.xlane.xlu1 %2619 }
0x1687   :  { %5288 = vrcp.f32 %v2620_v7 }
0x168a   :  { %v2724_v9 = vpop.permute.xlu1 %2723 }
0x168b   :  { %4939 = vmatmul.mubr.msk.bf16.vlgmr.msra.gmra.mxu0 %vm435_vm2, %v2724_v9 }
0x168c   :  { %4950 = vmatprep.mubr.msk.bf16.mxu0 %vm5410_vm1, %v5409_v48 }
0x168e   :  { %v2775_v15 = vpop.permute.xlu1 %2774 }
0x1694   :  { %v5289_v50 = vpop.eup %5288 }
0x1695   :  { %v2628_v11 = vmul.f32 %v5289_v50, %v5281_v19 }
0x1697   :  { %v2630_v12 = vpack.c.bf16 %v2628_v11, %v2627_v2 }
0x1699   :  { %4933 = vmatmul.mubr.msk.bf16.vlgmr.msra.gmra.mxu1 %vm435_vm2, %v2630_v12 }
0x169a   :  { %4943 = vmatpush3.bf16.xpose.msra.mxu1 %v2782_v16  ;;  %4944 = vmatprep.mubr.msk.bf16.mxu1 %vm5410_vm1, %v5409_v48 }
0x169b   :  { %4954 = vmatprep.subr.bf16.mxu1 %v5409_v48 }
0x16a1   :  { %4945 = vmatmul.mubr.msk.bf16.vlgmr.msra.gmra.mxu1 %vm435_vm2, %v2775_v15 }
0x16a2   :  { %4956 = vmatprep.mubr.msk.bf16.mxu1 %vm5410_vm1, %v5409_v48 }
0x1724   :  { %v6311_v21 = vpop.f32.mrf.mxu0 }
0x1726   :  { %v4928_v51 = vpop.f32.mrf.mxu0 }
0x1728   :  { %v6313_v35 = vpop.f32.mrf.mxu0 }
0x1729   :  { %v2721_v53 = vpack.c.bf16 %v6313_v35, %v6311_v21  ;;  %v5123_v35 = vld [vmem:[%s6775_s7 + $0x28] sm:$0xff]  }
0x172a   :  { %v4929_v60 = vpop.f32.mrf.mxu0 }
0x172b   :  { %v5122_v60 = vld [vmem:[%s6775_s7 + $0x20] sm:$0xff]  }
0x174b   :  { %v2767_v20 = vpop.f32.mrf.mxu0 }
0x174c   :  { %v2825_v43 = vsel %vm435_vm2, %v2767_v20, -inf }
0x174d   :  { %2826 = vmax.xlane.f32.xlu0 %v2825_v43  ;;  %v4940_v22 = vpop.f32.mrf.mxu0 }
0x174f   :  { %v2770_v25 = vpop.f32.mrf.mxu0 }
0x1750   :  { %v2828_v28 = vsel %vm435_vm2, %v2770_v25, -inf }
0x1751   :  { %2829 = vmax.xlane.f32.xlu1 %v2828_v28  ;;  %v4941_v18 = vpop.f32.mrf.mxu0 }
0x1759   :  { %v6319_v26 = vpop.f32.mrf.mxu1 }
0x175b   :  { %v4934_v23 = vpop.f32.mrf.mxu1 }
0x175d   :  { %v6321_v29 = vpop.f32.mrf.mxu1 }
0x175e   :  { %v2722_v30 = vpack.c.bf16 %v6321_v29, %v6319_v26 }
0x175f   :  { %v4935_v58 = vpop.f32.mrf.mxu1 }
0x1761   :  { %v2818_v36 = vpop.f32.mrf.mxu1 }
0x1762   :  { %v2831_v54 = vsel %vm435_vm2, %v2818_v36, -inf }
0x1763   :  { %2832 = vmax.xlane.f32.xlu0 %v2831_v54  ;;  %v4946_v38 = vpop.f32.mrf.mxu1 }
0x1765   :  { %v2821_v24 = vpop.f32.mrf.mxu1 }
0x1766   :  { %v2834_v17 = vsel %vm435_vm2, %v2821_v24, -inf }
0x1767   :  { %2835 = vmax.xlane.f32.xlu0 %v2834_v17  ;;  %v4947_v45 = vpop.f32.mrf.mxu1 }
0x17d6   :  { %v2827_v0 = vpop.xlane.xlu0 %2826 }
0x17d7   :  { %v2837_v33 = vsub.f32 %v2767_v20, %v2827_v0 }
0x17d9   :  { %v2841_v37 = vmul.f32 1.442695, %v2837_v33 }
0x17da   :  { %v2830_v13 = vpop.xlane.xlu1 %2829 }
0x17db   :  { %5290 = vpow2.f32 %v2841_v37  ;;  %v2838_v55 = vsub.f32 %v2770_v25, %v2830_v13 }
0x17dd   :  { %v2843_v46 = vmul.f32 1.442695, %v2838_v55 }
0x17df   :  { %5292 = vpow2.f32 %v2843_v46 }
0x17e8   :  { %v5291_v57 = vpop.eup %5290 }
0x17e9   :  { %v2849_v19 = vsel %vm435_vm2, %v5291_v57, 0.0 }
0x17ea   :  { %2850 = vadd.xlane.f32.xlu0 %v2849_v19 }
0x17ec   :  { %v5293_v52 = vpop.eup %5292  ;;  %v2833_v44 = vpop.xlane.xlu0 %2832 }
0x17ed   :  { %v2839_v41 = vsub.f32 %v2818_v36, %v2833_v44  ;;  %v2852_v61 = vsel %vm435_vm2, %v5293_v52, 0.0 }
0x17ee   :  { %2853 = vadd.xlane.f32.xlu1 %v2852_v61 }
0x17ef   :  { %v2845_v42 = vmul.f32 1.442695, %v2839_v41 }
0x17f0   :  { %v2836_v59 = vpop.xlane.xlu0 %2835 }
0x17f1   :  { %5294 = vpow2.f32 %v2845_v42  ;;  %v2840_v32 = vsub.f32 %v2821_v24, %v2836_v59 }
0x17f3   :  { %v2847_v47 = vmul.f32 1.442695, %v2840_v32 }
0x17f5   :  { %5296 = vpow2.f32 %v2847_v47 }
0x17fe   :  { %v5295_v6 = vpop.eup %5294 }
0x17ff   :  { %v2855_v63 = vsel %vm435_vm2, %v5295_v6, 0.0 }
0x1800   :  { %2856 = vadd.xlane.f32.xlu0 %v2855_v63 }
0x1802   :  { %v5297_v5 = vpop.eup %5296 }
0x1803   :  { %v2858_v27 = vsel %vm435_vm2, %v5297_v5, 0.0 }
0x1804   :  { %2859 = vadd.xlane.f32.xlu1 %v2858_v27 }
0x1815   :  { %2920 = vrot.lane.b32.xlu1 %v6271_v40, %s5413_s22 }
0x1816   :  { %2872 = vrot.lane.b32.xlu0 %v6253_v3, %s5413_s22 }
0x1819   :  { %3093 = vrot.lane.b32.xlu1 %v6251_v62, %s5414_s23 }
0x181a   :  { %3091 = vrot.lane.b32.xlu0 %v6251_v62, %s5415_s24 }
0x181d   :  { %3144 = vrot.lane.b32.xlu1 %v6257_v8, %s5414_s23  ;;  %s6794_s23 = smov 80  }
0x1821   :  { %3142 = vrot.lane.b32.xlu1 %v6257_v8, %s5415_s24 }
0x1873   :  { %v2851_v9 = vpop.xlane.xlu0 %2850 }
0x1877   :  { %v2854_v7 = vpop.xlane.xlu1 %2853 }
0x1878   :  { %5298 = vrcp.f32 %v2854_v7 }
0x1879   :  { %5300 = vrcp.f32 %v2851_v9 }
0x1885   :  { %v5299_v10 = vpop.eup %5298 }
0x1886   :  { %v5301_v2 = vpop.eup %5300  ;;  %v2866_v11 = vmul.f32 %v5299_v10, %v5293_v52 }
0x1887   :  { %v2865_v15 = vmul.f32 %v5301_v2, %v5291_v57 }
0x1889   :  { %v2857_v50 = vpop.xlane.xlu0 %2856  ;;  %v2869_v51 = vpack.c.bf16 %v2866_v11, %v2865_v15 }
0x188a   :  { %5302 = vrcp.f32 %v2857_v50 }
0x188d   :  { %v2873_v12 = vpop.permute.xlu0 %2872  ;;  %v2860_v16 = vpop.xlane.xlu1 %2859 }
0x188e   :  { %5304 = vrcp.f32 %v2860_v16  ;;  %4949 = vmatpush3.bf16.msra.mxu0 %v2873_v12 }
0x188f   :  { %4960 = vmatprep.subr.bf16.mxu0 %v5123_v35 }
0x1891   :  { %4951 = vmatmul.mubr.msk.bf16.vlgmr.msra.gmra.mxu0 %vm435_vm2, %v2869_v51  ;;  %v2921_v20 = vpop.permute.xlu1 %2920  ;;  %v3092_v46 = vpop.permute.xlu0 %3091 }
0x1892   :  { %4955 = vmatpush3.bf16.msra.mxu1 %v2921_v20  ;;  %4961 = vmatpush3.bf16.msra.mxu0 %v5123_v35 }
0x1893   :  { %4966 = vmatprep.subr.bf16.mxu1 %v5122_v60  ;;  %4972 = vmatprep.subr.bf16.mxu0 %v5409_v48 }
0x1895   :  { %v3094_v23 = vpop.permute.xlu1 %3093 }
0x1896   :  { %v3099_v33 = vsel %vm435_vm2, %v3094_v23, 0 }
0x1897   :  { %v5303_v43 = vpop.eup %5302 }
0x1898   :  { %v2867_v25 = vmul.f32 %v5303_v43, %v5295_v6 }
0x1899   :  { %v3145_v58 = vpop.permute.xlu1 %3144 }
0x189a   :  { %v3150_v36 = vsel %vm435_vm2, %v3145_v58, 0 }
0x189b   :  { %v5305_v22 = vpop.eup %5304 }
0x189c   :  { %v2868_v28 = vmul.f32 %v5305_v22, %v5297_v5 }
0x189d   :  { %v3143_v21 = vpop.permute.xlu1 %3142 }
0x189e   :  { %v2870_v18 = vpack.c.bf16 %v2868_v28, %v2867_v25 }
0x18a0   :  { %4957 = vmatmul.mubr.msk.bf16.vlgmr.msra.gmra.mxu1 %vm435_vm2, %v2870_v18 }
0x18a1   :  { %4968 = vmatprep.mubr.msk.bf16.mxu1 %vm435_vm2, %v2721_v53  ;;  %4967 = vmatpush3.bf16.msra.mxu1 %v5122_v60 }
0x18a2   :  { %4978 = vmatprep.subr.bf16.mxu1 %v5409_v48 }
0x18a8   :  { %4969 = vmatmul.mubr.msk.bf16.vlgmr.msra.gmra.mxu1 %vm435_vm2, %v2722_v30 }
0x18a9   :  { %4979 = vmatpush3.bf16.xpose.msra.mxu1 %v3150_v36  ;;  %4980 = vmatprep.mubr.msk.bf16.mxu1 %vm5410_vm1, %v5409_v48 }
0x18aa   :  { %4990 = vmatprep.subr.bf16.mxu1 %v5409_v48 }
0x18b0   :  { %4981 = vmatmul.mubr.msk.bf16.vlgmr.msra.gmra.mxu1 %vm435_vm2, %v3143_v21 }
0x18b1   :  { %4992 = vmatprep.mubr.msk.bf16.mxu1 %vm5410_vm1, %v5409_v48 }
0x1951   :  { %v2912_v53 = vpop.f32.mrf.mxu0 }
0x1953   :  { %v4952_v26 = vpop.f32.mrf.mxu0 }
0x1955   :  { %v2915_v29 = vpop.f32.mrf.mxu0 }
0x1956   :  { %v2967_v30 = vpack.c.bf16 %v2915_v29, %v2912_v53 }
0x1957   :  { %v4953_v54 = vpop.f32.mrf.mxu0 }
0x1958   :  { %4962 = vmatprep.mubr.msk.bf16.mxu0 %vm435_vm2, %v2967_v30 }
0x1960   :  { %v2960_v38 = vpop.f32.mrf.mxu1 }
0x1962   :  { %v4958_v24 = vpop.f32.mrf.mxu1 }
0x1964   :  { %v2963_v17 = vpop.f32.mrf.mxu1 }
0x1965   :  { %v2968_v45 = vpack.c.bf16 %v2963_v17, %v2960_v38 }
0x1966   :  { %v4959_v0 = vpop.f32.mrf.mxu1 }
0x1967   :  { %4963 = vmatmul.mubr.msk.bf16.vlgmr.msra.gmra.mxu0 %vm435_vm2, %v2968_v45 }
0x1968   :  { %4973 = vmatpush3.bf16.xpose.msra.mxu0 %v3099_v33  ;;  %v6371_v37 = vpop.f32.mrf.mxu1  ;;  %4974 = vmatprep.mubr.msk.bf16.mxu0 %vm5410_vm1, %v5409_v48 }
0x1969   :  { %4984 = vmatprep.subr.bf16.mxu0 %v5409_v48 }
0x196a   :  { %v6376_v13 = vpop.f32.mrf.mxu1 }
0x196c   :  { %v6378_v55 = vpop.f32.mrf.mxu1 }
0x196e   :  { %v6380_v57 = vpop.f32.mrf.mxu1 }
0x196f   :  { %4975 = vmatmul.mubr.msk.bf16.vlgmr.msra.gmra.mxu0 %vm435_vm2, %v3092_v46 }
0x1970   :  { %v3186_v19 = vpop.f32.mrf.mxu1  ;;  %4986 = vmatprep.mubr.msk.bf16.mxu0 %vm5410_vm1, %v5409_v48 }
0x1971   :  { %v3199_v7 = vsel %vm435_vm2, %v3186_v19, -inf }
0x1972   :  { %v4982_v52 = vpop.f32.mrf.mxu1 }
0x1974   :  { %v3189_v44 = vpop.f32.mrf.mxu1 }
0x1975   :  { %v3202_v10 = vsel %vm435_vm2, %v3189_v44, -inf }
0x1976   :  { %v4983_v41 = vpop.f32.mrf.mxu1 }
0x1a27   :  { %v6385_v61 = vpop.f32.mrf.mxu0 }
0x1a29   :  { %v6387_v42 = vpop.f32.mrf.mxu0 }
0x1a2b   :  { %v6389_v59 = vpop.f32.mrf.mxu0 }
0x1a2d   :  { %v6391_v32 = vpop.f32.mrf.mxu0 }
0x1a2f   :  { %v3135_v47 = vpop.f32.mrf.mxu0 }
0x1a30   :  { %v3193_v6 = vsel %vm435_vm2, %v3135_v47, -inf }
0x1a31   :  { %3194 = vmax.xlane.f32.xlu0 %v3193_v6  ;;  %v4976_v63 = vpop.f32.mrf.mxu0 }
0x1a32   :  { %v5124_v63 = vld [vmem:[%s6775_s7 + $0x30] sm:$0xff]  }
0x1a33   :  { %v3138_v5 = vpop.f32.mrf.mxu0 }
0x1a34   :  { %v3196_v27 = vsel %vm435_vm2, %v3138_v5, -inf }
0x1a35   :  { %3197 = vmax.xlane.f32.xlu1 %v3196_v27  ;;  %v4977_v9 = vpop.f32.mrf.mxu0  ;;  %3200 = vmax.xlane.f32.xlu0 %v3199_v7 }
0x1a39   :  { %3203 = vmax.xlane.f32.xlu0 %v3202_v10 }
0x1aba   :  { %v3195_v50 = vpop.xlane.xlu0 %3194 }
0x1abb   :  { %v3205_v2 = vsub.f32 %v3135_v47, %v3195_v50 }
0x1abd   :  { %v3209_v15 = vmul.f32 1.442695, %v3205_v2 }
0x1abe   :  { %v3201_v11 = vpop.xlane.xlu0 %3200  ;;  %v3198_v12 = vpop.xlane.xlu1 %3197 }
0x1abf   :  { %v3207_v16 = vsub.f32 %v3186_v19, %v3201_v11  ;;  %v3206_v60 = vsub.f32 %v3138_v5, %v3198_v12 }
0x1ac1   :  { %v3213_v51 = vmul.f32 1.442695, %v3207_v16  ;;  %v3211_v22 = vmul.f32 1.442695, %v3206_v60 }
0x1ac2   :  { %v3204_v20 = vpop.xlane.xlu0 %3203 }
0x1ac3   :  { %5306 = vpow2.f32 %v3213_v51  ;;  %v3208_v43 = vsub.f32 %v3189_v44, %v3204_v20 }
0x1ac4   :  { %5308 = vpow2.f32 %v3209_v15 }
0x1ac5   :  { %v3215_v25 = vmul.f32 1.442695, %v3208_v43 }
0x1ac7   :  { %5310 = vpow2.f32 %v3215_v25 }
0x1ac8   :  { %5312 = vpow2.f32 %v3211_v22 }
0x1ad0   :  { %v5307_v28 = vpop.eup %5306 }
0x1ad1   :  { %v3223_v18 = vsel %vm435_vm2, %v5307_v28, 0.0  ;;  %v5309_v23 = vpop.eup %5308 }
0x1ad2   :  { %3224 = vadd.xlane.f32.xlu0 %v3223_v18  ;;  %v3217_v36 = vsel %vm435_vm2, %v5309_v23, 0.0 }
0x1ad4   :  { %v5311_v58 = vpop.eup %5310 }
0x1ad5   :  { %v3226_v21 = vsel %vm435_vm2, %v5311_v58, 0.0  ;;  %v5313_v35 = vpop.eup %5312 }
0x1ad6   :  { %3218 = vadd.xlane.f32.xlu0 %v3217_v36  ;;  %3227 = vadd.xlane.f32.xlu1 %v3226_v21  ;;  %v3220_v53 = vsel %vm435_vm2, %v5313_v35, 0.0 }
0x1ada   :  { %3221 = vadd.xlane.f32.xlu1 %v3220_v53 }
0x1aeb   :  { %3286 = vrot.lane.b32.xlu1 %v6271_v40, %s5415_s24 }
0x1aec   :  { %3239 = vrot.lane.b32.xlu0 %v6253_v3, %s5415_s24 }
0x1aef   :  { %3402 = vrot.lane.b32.xlu1 %v6251_v62, %s5416_s28 }
0x1af0   :  { %3400 = vrot.lane.b32.xlu0 %v6251_v62, %s6794_s23 }
0x1af3   :  { %3453 = vrot.lane.b32.xlu1 %v6257_v8, %s5416_s28 }
0x1af7   :  { %3451 = vrot.lane.b32.xlu1 %v6257_v8, %s6794_s23 }
0x1b5b   :  { %v3225_v26 = vpop.xlane.xlu0 %3224 }
0x1b5c   :  { %5314 = vrcp.f32 %v3225_v26 }
0x1b5f   :  { %v3219_v29 = vpop.xlane.xlu0 %3218  ;;  %v3228_v30 = vpop.xlane.xlu1 %3227 }
0x1b60   :  { %5316 = vrcp.f32 %v3228_v30  ;;  %v3085_v30 = vadd.f32 %v6371_v37, %v6385_v61 }
0x1b61   :  { %5318 = vrcp.f32 %v3219_v29 }
0x1b63   :  { %v3240_v54 = vpop.permute.xlu0 %3239  ;;  %v3222_v38 = vpop.xlane.xlu1 %3221 }
0x1b64   :  { %5320 = vrcp.f32 %v3222_v38  ;;  %4985 = vmatpush3.bf16.msra.mxu0 %v3240_v54  ;;  %v3077_v38 = vadd.f32 %v6376_v13, %v6387_v42 }
0x1b65   :  { %4996 = vmatprep.subr.bf16.mxu0 %v5124_v63 }
0x1b67   :  { %v3287_v24 = vpop.permute.xlu1 %3286  ;;  %v3401_v6 = vpop.permute.xlu0 %3400 }
0x1b68   :  { %4991 = vmatpush3.bf16.msra.mxu1 %v3287_v24 }
0x1b69   :  { %5002 = vmatprep.subr.bf16.mxu1 %v5409_v48  ;;  %v5315_v62 = vpop.eup %5314 }
0x1b6a   :  { %v3235_v0 = vmul.f32 %v5315_v62, %v5307_v28  ;;  %v3088_v62 = vadd.f32 %v6378_v55, %v6389_v59 }
0x1b6b   :  { %v3403_v8 = vpop.permute.xlu1 %3402 }
0x1b6c   :  { %v3408_v41 = vsel %vm435_vm2, %v3403_v8, 0 }
0x1b6d   :  { %v5317_v17 = vpop.eup %5316 }
0x1b6e   :  { %v5319_v45 = vpop.eup %5318  ;;  %v3236_v33 = vmul.f32 %v5317_v17, %v5311_v58 }
0x1b6f   :  { %v3233_v52 = vmul.f32 %v5319_v45, %v5309_v23  ;;  %v3454_v11 = vpop.permute.xlu1 %3453 }
0x1b70   :  { %v3238_v19 = vpack.c.bf16 %v3236_v33, %v3235_v0  ;;  %v3459_v43 = vsel %vm435_vm2, %v3454_v11, 0  ;;  %v3080_v0 = vadd.f32 %v6380_v57, %v6391_v32 }
0x1b71   :  { %v5321_v46 = vpop.eup %5320 }
0x1b72   :  { %v3234_v44 = vmul.f32 %v5321_v46, %v5313_v35  ;;  %4993 = vmatmul.mubr.msk.bf16.vlgmr.msra.gmra.mxu1 %vm435_vm2, %v3238_v19 }
0x1b73   :  { %5003 = vmatpush3.bf16.xpose.msra.mxu1 %v3408_v41  ;;  %5004 = vmatprep.mubr.msk.bf16.mxu1 %vm5410_vm1, %v5409_v48  ;;  %v3452_v18 = vpop.permute.xlu1 %3451 }
0x1b74   :  { %v3237_v47 = vpack.c.bf16 %v3234_v44, %v3233_v52  ;;  %5014 = vmatprep.subr.bf16.mxu1 %v5409_v48 }
0x1b76   :  { %4987 = vmatmul.mubr.msk.bf16.vlgmr.msra.gmra.mxu0 %vm435_vm2, %v3237_v47 }
0x1b77   :  { %4997 = vmatpush3.bf16.msra.mxu0 %v5124_v63 }
0x1b78   :  { %5008 = vmatprep.subr.bf16.mxu0 %v5409_v48 }
0x1b7a   :  { %5005 = vmatmul.mubr.msk.bf16.vlgmr.msra.gmra.mxu1 %vm435_vm2, %v3401_v6 }
0x1b7b   :  { %5016 = vmatprep.mubr.msk.bf16.mxu1 %vm5410_vm1, %v5409_v48 }
0x1c32   :  { %v3326_v5 = vpop.f32.mrf.mxu1 }
0x1c34   :  { %v4994_v27 = vpop.f32.mrf.mxu1 }
0x1c36   :  { %v3279_v7 = vpop.f32.mrf.mxu0  ;;  %v3329_v9 = vpop.f32.mrf.mxu1 }
0x1c37   :  { %v3334_v15 = vpack.c.bf16 %v3329_v9, %v3326_v5 }
0x1c38   :  { %v4988_v10 = vpop.f32.mrf.mxu0  ;;  %v4995_v50 = vpop.f32.mrf.mxu1 }
0x1c3a   :  { %v3282_v2 = vpop.f32.mrf.mxu0  ;;  %v3444_v16 = vpop.f32.mrf.mxu1 }
0x1c3b   :  { %v3333_v12 = vpack.c.bf16 %v3282_v2, %v3279_v7  ;;  %v3502_v60 = vsel %vm435_vm2, %v3444_v16, -inf }
0x1c3c   :  { %v4989_v51 = vpop.f32.mrf.mxu0  ;;  %3503 = vmax.xlane.f32.xlu0 %v3502_v60  ;;  %v5006_v20 = vpop.f32.mrf.mxu1 }
0x1c3d   :  { %4998 = vmatprep.mubr.msk.bf16.mxu0 %vm435_vm2, %v3333_v12 }
0x1c3e   :  { %4999 = vmatmul.mubr.msk.bf16.vlgmr.msra.gmra.mxu0 %vm435_vm2, %v3334_v15  ;;  %v3447_v22 = vpop.f32.mrf.mxu1 }
0x1c3f   :  { %5009 = vmatpush3.bf16.xpose.msra.mxu0 %v3459_v43  ;;  %5010 = vmatprep.mubr.msk.bf16.mxu0 %vm5410_vm1, %v5409_v48  ;;  %v3505_v25 = vsel %vm435_vm2, %v3447_v22, -inf }
0x1c40   :  { %5020 = vmatprep.subr.bf16.mxu0 %v5409_v48  ;;  %3506 = vmax.xlane.f32.xlu1 %v3505_v25  ;;  %v5007_v28 = vpop.f32.mrf.mxu1 }
0x1c41   :  { %v5125_v28 = vld [vmem:[%s6775_s7 + $0x38] sm:$0xff]  }
0x1c46   :  { %5011 = vmatmul.mubr.msk.bf16.vlgmr.msra.gmra.mxu0 %vm435_vm2, %v3452_v18 }
0x1c47   :  { %5022 = vmatprep.mubr.msk.bf16.mxu0 %vm5410_vm1, %v5409_v48 }
0x1cc5   :  { %v3504_v53 = vpop.xlane.xlu0 %3503 }
0x1cc6   :  { %v3514_v26 = vsub.f32 %v3444_v16, %v3504_v53 }
0x1cc8   :  { %v3518_v29 = vmul.f32 1.442695, %v3514_v26 }
0x1cc9   :  { %v3507_v23 = vpop.xlane.xlu1 %3506 }
0x1cca   :  { %v3515_v58 = vsub.f32 %v3447_v22, %v3507_v23 }
0x1ccc   :  { %v3520_v36 = vmul.f32 1.442695, %v3515_v58 }
0x1cce   :  { %5322 = vpow2.f32 %v3520_v36 }
0x1ccf   :  { %5324 = vpow2.f32 %v3518_v29 }
0x1cdb   :  { %v5323_v21 = vpop.eup %5322 }
0x1cdc   :  { %v3529_v35 = vsel %vm435_vm2, %v5323_v21, 0.0  ;;  %v5325_v55 = vpop.eup %5324 }
0x1cdd   :  { %3530 = vadd.xlane.f32.xlu1 %v3529_v35  ;;  %v3526_v52 = vsel %vm435_vm2, %v5325_v55, 0.0 }
0x1cfe   :  { %v5000_v54 = vpop.f32.mrf.mxu0 }
0x1cff   :  { %v6443_v48 = vadd.f32 %v5000_v54, %v3085_v30 }
0x1d00   :  { %v3381_v24 = vpop.f32.mrf.mxu0 }
0x1d01   :  { %v6447_v17 = vadd.f32 %v3381_v24, %v3077_v38 }
0x1d02   :  { %v5001_v45 = vpop.f32.mrf.mxu0 }
0x1d03   :  { %v6451_v33 = vadd.f32 %v5001_v45, %v3088_v62 }
0x1d04   :  { %v3384_v37 = vpop.f32.mrf.mxu0 }
0x1d05   :  { %v6453_v61 = vadd.f32 %v3384_v37, %v3080_v0 }
0x1d06   :  { %v3495_v8 = vpop.f32.mrf.mxu0 }
0x1d07   :  { %v3508_v13 = vsel %vm435_vm2, %v3495_v8, -inf }
0x1d08   :  { %3509 = vmax.xlane.f32.xlu0 %v3508_v13  ;;  %v5012_v42 = vpop.f32.mrf.mxu0 }
0x1d0a   :  { %v3498_v46 = vpop.f32.mrf.mxu0 }
0x1d0b   :  { %v3511_v19 = vsel %vm435_vm2, %v3498_v46, -inf }
0x1d0c   :  { %3512 = vmax.xlane.f32.xlu0 %v3511_v19  ;;  %v5013_v59 = vpop.f32.mrf.mxu0 }
0x1d10   :  { %3527 = vadd.xlane.f32.xlu0 %v3526_v52 }
0x1d66   :  { %v3531_v10 = vpop.xlane.xlu1 %3530 }
0x1d91   :  { %v3510_v57 = vpop.xlane.xlu0 %3509 }
0x1d92   :  { %v3516_v32 = vsub.f32 %v3495_v8, %v3510_v57  ;;  %v4572_v8 = vld [vmem:[%s6776_s8 + $0x1] ss:$0 sm:$0xff] }
0x1d94   :  { %v3522_v44 = vmul.f32 1.442695, %v3516_v32 }
0x1d95   :  { %v3513_v41 = vpop.xlane.xlu0 %3512 }
0x1d96   :  { %5326 = vpow2.f32 %v3522_v44  ;;  %v3517_v47 = vsub.f32 %v3498_v46, %v3513_v41 }
0x1d98   :  { %v3524_v6 = vmul.f32 1.442695, %v3517_v47 }
0x1d99   :  { %v3528_v9 = vpop.xlane.xlu0 %3527 }
0x1d9a   :  { %5328 = vpow2.f32 %v3524_v6 }
0x1d9b   :  { %5330 = vrcp.f32 %v3528_v9 }
0x1d9c   :  { %5332 = vrcp.f32 %v3531_v10 }
0x1da3   :  { %v5327_v63 = vpop.eup %5326 }
0x1da4   :  { %v3532_v5 = vsel %vm435_vm2, %v5327_v63, 0.0 }
0x1da5   :  { %3533 = vadd.xlane.f32.xlu0 %v3532_v5 }
0x1da7   :  { %v5329_v27 = vpop.eup %5328 }
0x1da8   :  { %v3535_v7 = vsel %vm435_vm2, %v5329_v27, 0.0  ;;  %v5331_v50 = vpop.eup %5330 }
0x1da9   :  { %3536 = vadd.xlane.f32.xlu1 %v3535_v7  ;;  %v5333_v11 = vpop.eup %5332  ;;  %v3542_v12 = vmul.f32 %v5331_v50, %v5325_v55 }
0x1daa   :  { %v3543_v51 = vmul.f32 %v5333_v11, %v5323_v21 }
0x1dac   :  { %v3546_v60 = vpack.c.bf16 %v3543_v51, %v3542_v12  ;;  %v5128_v51 = vld [vmem:[%s6779_s11 + $0x74] ss:$8 sps:$4 sm:$0xff]  }
0x1dba   :  { %3595 = vrot.lane.b32.xlu1 %v6271_v40, %s6794_s23 }
0x1dbb   :  { %3548 = vrot.lane.b32.xlu0 %v6253_v3, %s6794_s23 }
0x1e2e   :  { %v3534_v2 = vpop.xlane.xlu0 %3533 }
0x1e2f   :  { %5334 = vrcp.f32 %v3534_v2 }
0x1e32   :  { %v3549_v16 = vpop.permute.xlu0 %3548  ;;  %v3537_v15 = vpop.xlane.xlu1 %3536 }
0x1e33   :  { %5336 = vrcp.f32 %v3537_v15  ;;  %5015 = vmatpush3.bf16.msra.mxu1 %v3549_v16 }
0x1e34   :  { %5026 = vmatprep.subr.bf16.mxu1 %v5125_v28 }
0x1e36   :  { %5017 = vmatmul.mubr.msk.bf16.vlgmr.msra.gmra.mxu1 %vm435_vm2, %v3546_v60  ;;  %v3596_v40 = vpop.permute.xlu1 %3595  ;;  %v5126_v60 = vld [vmem:[%s6779_s11 + $0x70] ss:$8 sps:$4 sm:$0xff]  }
0x1e37   :  { %5021 = vmatpush3.bf16.msra.mxu0 %v3596_v40  ;;  %5027 = vmatpush3.bf16.msra.mxu1 %v5125_v28  ;;  %v5129_v40 = vld [vmem:[%s6779_s11 + $0x60] ss:$8 sps:$4 sm:$0xff]  }
0x1e38   :  { %3879 = vmatprep.subr.bf16.mxu0 %v5128_v51 }
0x1e3c   :  { %v5335_v3 = vpop.eup %5334 }
0x1e3d   :  { %v3544_v43 = vmul.f32 %v5335_v3, %v5327_v63  ;;  %v5131_v3 = vld [vmem:[%s6779_s11 + $0x64] ss:$8 sps:$4 sm:$0xff]  }
0x1e40   :  { %v5337_v20 = vpop.eup %5336 }
0x1e41   :  { %v3545_v22 = vmul.f32 %v5337_v20, %v5329_v27  ;;  %v5134_v20 = vld [vmem:[%s6779_s11 + $0x54] ss:$8 sps:$4 sm:$0xff]  }
0x1e43   :  { %v3547_v25 = vpack.c.bf16 %v3545_v22, %v3544_v43  ;;  %v5132_v43 = vld [vmem:[%s6779_s11 + $0x50] ss:$8 sps:$4 sm:$0xff]   ;;  %v5137_v22 = vld [vmem:[%s6779_s11 + $0x44] ss:$8 sps:$4 sm:$0xff]  }
0x1e45   :  { %5023 = vmatmul.mubr.msk.bf16.vlgmr.msra.gmra.mxu0 %vm435_vm2, %v3547_v25  ;;  %v5135_v25 = vld [vmem:[%s6779_s11 + $0x40] ss:$8 sps:$4 sm:$0xff]  }
0x1e46   :  { %3903 = vmatprep.mubr.bf16.mxu0 %v5408_v1  ;;  %3880 = vmatpush1.bf16.msra.mxu0 %v5126_v60 }
0x1e47   :  { %3881 = vmatprep.subr.bf16.mxu0 %v5131_v3 }
0x1e4a   :  { %3882 = vmatpush1.bf16.msra.mxu0 %v5129_v40 }
0x1e4b   :  { %3883 = vmatprep.subr.bf16.mxu0 %v5134_v20 }
0x1e4e   :  { %3884 = vmatpush1.bf16.msra.mxu0 %v5132_v43 }
0x1e4f   :  { %3885 = vmatprep.subr.bf16.mxu0 %v5137_v22 }
0x1e52   :  { %3886 = vmatpush1.bf16.msra.mxu0 %v5135_v25 }
0x1ef6   :  { %v3588_v18 = vpop.f32.mrf.mxu1 }
0x1ef8   :  { %v5018_v23 = vpop.f32.mrf.mxu1 }
0x1efa   :  { %v3591_v58 = vpop.f32.mrf.mxu1 }
0x1efb   :  { %v3642_v36 = vpack.c.bf16 %v3591_v58, %v3588_v18 }
0x1efc   :  { %v5019_v21 = vpop.f32.mrf.mxu1 }
0x1efd   :  { %5028 = vmatprep.mubr.msk.bf16.mxu1 %vm435_vm2, %v3642_v36 }
0x1f05   :  { %v3635_v35 = vpop.f32.mrf.mxu0 }
0x1f07   :  { %v5024_v53 = vpop.f32.mrf.mxu0 }
0x1f09   :  { %v3638_v26 = vpop.f32.mrf.mxu0 }
0x1f0a   :  { %v3643_v29 = vpack.c.bf16 %v3638_v26, %v3635_v35 }
0x1f0b   :  { %v5025_v30 = vpop.f32.mrf.mxu0 }
0x1f0c   :  { %5029 = vmatmul.mubr.msk.bf16.vlgmr.msra.gmra.mxu1 %vm435_vm2, %v3643_v29 }
0x1fcc   :  { %v5030_v54 = vpop.f32.mrf.mxu1 }
0x1fcd   :  { %v3707_v45 = vadd.f32 %v5030_v54, %v6443_v48 }
0x1fce   :  { %v3690_v38 = vpop.f32.mrf.mxu1 }
0x1fcf   :  { %v3705_v24 = vadd.f32 %v3690_v38, %v6447_v17  ;;  %v3711_v17 = vadd.f32 %v3707_v45, %v6193_v31 }
0x1fd0   :  { %v5031_v62 = vpop.f32.mrf.mxu1 }
0x1fd1   :  { %v3709_v0 = vadd.f32 %v3705_v24, %v6183_v14  ;;  %v3708_v37 = vadd.f32 %v5031_v62, %v6451_v33  ;;  %v6491_v59 = vadd.f32 %v4572_v8, %v3711_v17  ;;  %v4575_v62 = vld [vmem:[%s6777_s9 + $0x1] ss:$0 sm:$0xff] }
0x1fd2   :  { %v3693_v13 = vpop.f32.mrf.mxu1 }
0x1fd3   :  { %v6479_v42 = vadd.f32 %v4572_v8, %v3709_v0  ;;  %v3712_v46 = vadd.f32 %v3708_v37, %v6198_v39  ;;  %v3706_v19 = vadd.f32 %v3693_v13, %v6453_v61  ;;  %v3735_v31 = vsel %vm170_vm0, %v6491_v59, 0.0 }
0x1fd5   :  { %v6484_v55 = vadd.f32 %v4572_v8, %v3712_v46  ;;  %v3710_v48 = vadd.f32 %v3706_v19, %v6188_v34  ;;  %v3729_v14 = vsel %vm170_vm0, %v6479_v42, 0.0 }
0x1fd6   :  { %3730 = vadd.xlane.f32.xlu1 %v3729_v14 }
0x1fd7   :  { %v6489_v33 = vadd.f32 %v4572_v8, %v3710_v48  ;;  %v3738_v52 = vsel %vm170_vm0, %v6484_v55, 0.0  ;;  %v4576_v8 = vld [vmem:[%s6778_s10 + $0x1] ss:$0 sm:$0xff] }
0x1fd9   :  { %v3732_v39 = vsel %vm170_vm0, %v6489_v33, 0.0 }
0x1fda   :  { %3739 = vadd.xlane.f32.xlu1 %v3738_v52  ;;  %3733 = vadd.xlane.f32.xlu0 %v3732_v39 }
0x1fde   :  { %3736 = vadd.xlane.f32.xlu0 %v3735_v31 }
0x205f   :  { %v3731_v34 = vpop.xlane.xlu1 %3730 }
0x2060   :  { %v3741_v61 = vmul.f32 0.015625, %v3731_v34 }
0x2062   :  { %v3745_v57 = vsub.f32 %v6479_v42, %v3741_v61 }
0x2063   :  { %v3740_v32 = vpop.xlane.xlu1 %3739  ;;  %v3734_v44 = vpop.xlane.xlu0 %3733 }
0x2064   :  { %v3744_v41 = vmul.f32 0.015625, %v3740_v32  ;;  %v3742_v47 = vmul.f32 0.015625, %v3734_v44  ;;  %v3749_v6 = vmul.f32 %v3745_v57, %v3745_v57  ;;  %v5138_v44 = vld [vmem:[%s6781_s13 + $0xf8] sm:$0xff]  }
0x2065   :  { %4764 = vmatprep.subr.bf16.mxu1 %v5138_v44 }
0x2066   :  { %v3748_v63 = vsub.f32 %v6484_v55, %v3744_v41  ;;  %v3746_v5 = vsub.f32 %v6489_v33, %v3742_v47  ;;  %v3753_v27 = vsel %vm170_vm0, %v3749_v6, 0.0  ;;  %v5139_v41 = vld [vmem:[%s6781_s13 + $0xb8] sm:$0xff]   ;;  %v5140_v47 = vld [vmem:[%s6781_s13 + $0xf0] sm:$0xff]   ;;  %v5142_v6 = vld [vmem:[%s6781_s13 + $0xe8] sm:$0xff]  }
0x2067   :  { %3754 = vadd.xlane.f32.xlu0 %v3753_v27  ;;  %v3737_v7 = vpop.xlane.xlu0 %3736  ;;  %4765 = vmatpush3.bf16.msra.mxu1 %v5139_v41  ;;  %v5145_v27 = vld [vmem:[%s6781_s13 + $0xa0] sm:$0xff]  }
0x2068   :  { %v3743_v9 = vmul.f32 0.015625, %v3737_v7  ;;  %v3750_v10 = vmul.f32 %v3746_v5, %v3746_v5  ;;  %v3752_v11 = vmul.f32 %v3748_v63, %v3748_v63  ;;  %4766 = vmatprep.subr.bf16.mxu1 %v5140_v47  ;;  %v5146_v7 = vld [vmem:[%s6781_s13 + $0xd8] sm:$0xff]  }
0x206a   :  { %v3747_v50 = vsub.f32 %v6491_v59, %v3743_v9  ;;  %v3756_v2 = vsel %vm170_vm0, %v3750_v10, 0.0  ;;  %v3762_v16 = vsel %vm170_vm0, %v3752_v11, 0.0  ;;  %v5147_v9 = vld [vmem:[%s6781_s13 + $0x98] sm:$0xff]   ;;  %v5148_v10 = vld [vmem:[%s6781_s13 + $0xd0] sm:$0xff]   ;;  %v5151_v11 = vld [vmem:[%s6781_s13 + $0x88] sm:$0xff]  }
0x206b   :  { %3757 = vadd.xlane.f32.xlu1 %v3756_v2  ;;  %v5150_v2 = vld [vmem:[%s6781_s13 + $0xc8] sm:$0xff]  }
0x206c   :  { %v3751_v12 = vmul.f32 %v3747_v50, %v3747_v50 }
0x206e   :  { %v3759_v15 = vsel %vm170_vm0, %v3751_v12, 0.0  ;;  %v5152_v12 = vld [vmem:[%s6781_s13 + $0xc0] sm:$0xff]  }
0x206f   :  { %3763 = vadd.xlane.f32.xlu1 %v3762_v16  ;;  %3760 = vadd.xlane.f32.xlu0 %v3759_v15  ;;  %v5153_v16 = vld [vmem:[%s6781_s13 + $0x80] sm:$0xff]  }
0x2070   :  { %v4585_v15 = vld [vmem:[%s6780_s12 + $0x2] sm:$0x3] }
0x2071   :  { %v3818_v51 = vrot.slane %v4585_v15, %v5673_v49  ;;  %v3822_v60 = vrot.slane %v4585_v15, %v5683_v56 }
0x20f0   :  { %v3755_v28 = vpop.xlane.xlu0 %3754 }
0x20f1   :  { %v3765_v18 = vmul.f32 0.015625, %v3755_v28 }
0x20f3   :  { %v3769_v23 = vadd.f32 1e-05, %v3765_v18 }
0x20f4   :  { %v3758_v58 = vpop.xlane.xlu1 %3757 }
0x20f5   :  { %5338 = vrsqrt.f32 %v3769_v23  ;;  %v3766_v36 = vmul.f32 0.015625, %v3758_v58 }
0x20f7   :  { %v3770_v21 = vadd.f32 1e-05, %v3766_v36 }
0x20f8   :  { %v3764_v35 = vpop.xlane.xlu1 %3763  ;;  %v3761_v53 = vpop.xlane.xlu0 %3760 }
0x20f9   :  { %5340 = vrsqrt.f32 %v3770_v21  ;;  %v3768_v26 = vmul.f32 0.015625, %v3764_v35  ;;  %v3767_v29 = vmul.f32 0.015625, %v3761_v53 }
0x20fb   :  { %v3772_v30 = vadd.f32 1e-05, %v3768_v26  ;;  %v3771_v54 = vadd.f32 1e-05, %v3767_v29 }
0x20fd   :  { %5342 = vrsqrt.f32 %v3772_v30 }
0x20fe   :  { %5344 = vrsqrt.f32 %v3771_v54 }
0x2102   :  { %v5339_v38 = vpop.eup %5338 }
0x2103   :  { %v3777_v24 = vmul.f32 %v5339_v38, %v3745_v57 }
0x2105   :  { %v3787_v37 = vmul.f32 %v4575_v62, %v3777_v24 }
0x2106   :  { %v5341_v45 = vpop.eup %5340 }
0x2107   :  { %v3778_v0 = vmul.f32 %v5341_v45, %v3746_v5  ;;  %v3797_v17 = vadd.f32 %v4576_v8, %v3787_v37  ;;  %v5144_v5 = vld [vmem:[%s6781_s13 + $0xe0] sm:$0xff]  }
0x2109   :  { %v3788_v13 = vmul.f32 %v4575_v62, %v3778_v0 }
0x210a   :  { %v5343_v46 = vpop.eup %5342 }
0x210b   :  { %v5345_v19 = vpop.eup %5344  ;;  %v3798_v48 = vadd.f32 %v4576_v8, %v3788_v13  ;;  %v3780_v14 = vmul.f32 %v5343_v46, %v3748_v63  ;;  %v5143_v63 = vld [vmem:[%s6781_s13 + $0xa8] sm:$0xff]  }
0x210c   :  { %v3779_v52 = vmul.f32 %v5345_v19, %v3747_v50  ;;  %v5149_v50 = vld [vmem:[%s6781_s13 + $0x90] sm:$0xff]  }
0x210d   :  { %v3801_v39 = vpack.c.bf16 %v3798_v48, %v3797_v17  ;;  %v3790_v31 = vmul.f32 %v4575_v62, %v3780_v14 }
0x210e   :  { %v3789_v34 = vmul.f32 %v4575_v62, %v3779_v52 }
0x210f   :  { %4594 = vmatmul.mubr.msk.bf16.vlgmr.msra.gmra.mxu0 %vm170_vm0, %v3801_v39  ;;  %v3800_v57 = vadd.f32 %v4576_v8, %v3790_v31 }
0x2110   :  { %3913 = vmatprep.mubr.bf16.mxu0 %v5408_v1  ;;  %v3799_v61 = vadd.f32 %v4576_v8, %v3789_v34  ;;  %v5141_v1 = vld [vmem:[%s6781_s13 + $0xb0] sm:$0xff]  }
0x2111   :  { %4767 = vmatpush3.bf16.msra.mxu1 %v5141_v1 }
0x2112   :  { %v3802_v32 = vpack.c.bf16 %v3800_v57, %v3799_v61  ;;  %4768 = vmatprep.subr.bf16.mxu1 %v5142_v6 }
0x2115   :  { %4769 = vmatpush3.bf16.msra.mxu1 %v5143_v63 }
0x2116   :  { %4770 = vmatprep.subr.bf16.mxu1 %v5144_v5 }
0x2117   :  { %4595 = vmatmul.mubr.msk.bf16.gmra.mxu0 %vm170_vm0, %v3802_v32 }
0x2119   :  { %4771 = vmatpush3.bf16.msra.mxu1 %v5145_v27 }
0x211a   :  { %4772 = vmatprep.subr.bf16.mxu1 %v5146_v7 }
0x211d   :  { %4773 = vmatpush3.bf16.msra.mxu1 %v5147_v9 }
0x211e   :  { %4774 = vmatprep.subr.bf16.mxu1 %v5148_v10 }
0x2121   :  { %4775 = vmatpush3.bf16.msra.mxu1 %v5149_v50 }
0x2122   :  { %4776 = vmatprep.subr.bf16.mxu1 %v5150_v2 }
0x2125   :  { %4777 = vmatpush3.bf16.msra.mxu1 %v5151_v11 }
0x2126   :  { %4778 = vmatprep.subr.bf16.mxu1 %v5152_v12 }
0x2129   :  { %4779 = vmatpush3.bf16.msra.mxu1 %v5153_v16 }
0x21cf   :  { %v3905_v40 = vpop.f32.mrf.mxu0 }
0x21d0   :  { %v6593_v3 = vadd.f32 %v3905_v40, %v3818_v51 }
0x21d1   :  { %v3907_v20 = vpop.f32.mrf.mxu0 }
0x21d2   :  { %v6596_v43 = vmul.f32 0.70710677, %v6593_v3  ;;  %v6598_v22 = vadd.f32 %v3907_v20, %v3822_v60 }
0x21d3   :  { %v3909_v25 = vpop.f32.mrf.mxu0 }
0x21d4   :  { %v3956_v28 = vand.u32 2147483647, %v6596_v43  ;;  %v6602_v18 = vmul.f32 0.70710677, %v6598_v22  ;;  %v6604_v23 = vadd.f32 %v3909_v25, %v3818_v51  ;;  %vm3940_vm11 = vcmp.ge.f32.partialorder %v6596_v43, 0.0 }
0x21d5   :  { %v3911_v49 = vpop.f32.mrf.mxu0 }
0x21d6   :  { %v3964_v58 = vmul.f32 0.3275911, %v3956_v28  ;;  %v3957_v56 = vand.u32 2147483647, %v6602_v18  ;;  %v6608_v36 = vmul.f32 0.70710677, %v6604_v23  ;;  %v6610_v21 = vadd.f32 %v3911_v49, %v3822_v60 }
0x21d7   :  { %v3915_v35 = vpop.f32.mrf.mxu0  ;;  %v4068_v46 = vsub.f32 0.0, %v3956_v28  ;;  %vm3941_vm12 = vcmp.ge.f32.partialorder %v6602_v18, 0.0 }
0x21d8   :  { %v3972_v53 = vadd.f32 1.0, %v3964_v58  ;;  %v3965_v26 = vmul.f32 0.3275911, %v3957_v56  ;;  %v3958_v29 = vand.u32 2147483647, %v6608_v36  ;;  %v6617_v0 = vadd.f32 %v3915_v35, %v3818_v51 }
0x21d9   :  { %v6614_v30 = vmul.f32 0.70710677, %v6610_v21  ;;  %v3917_v54 = vpop.f32.mrf.mxu0  ;;  %v4069_v14 = vsub.f32 0.0, %v3957_v56  ;;  %v4076_v34 = vmul.f32 %v4068_v46, %v3956_v28  ;;  %vm3942_vm13 = vcmp.ge.f32.partialorder %v6608_v36, 0.0 }
0x21da   :  { %5346 = vrcp.f32 %v3972_v53  ;;  %v3973_v38 = vadd.f32 1.0, %v3965_v26  ;;  %v3966_v24 = vmul.f32 0.3275911, %v3958_v29  ;;  %v6619_v13 = vadd.f32 %v3917_v54, %v3822_v60 }
0x21db   :  { %v3959_v62 = vand.u32 2147483647, %v6614_v30  ;;  %v3919_v37 = vpop.f32.mrf.mxu0  ;;  %v6622_v19 = vmul.f32 0.70710677, %v6617_v0  ;;  %v4070_v32 = vsub.f32 0.0, %v3958_v29  ;;  %v4077_v47 = vmul.f32 %v4069_v14, %v3957_v56 }
0x21dc   :  { %5348 = vrcp.f32 %v3973_v38  ;;  %v3974_v45 = vadd.f32 1.0, %v3966_v24  ;;  %v6625_v48 = vmul.f32 0.70710677, %v6619_v13  ;;  %v6628_v39 = vadd.f32 %v3919_v37, %v3818_v51 }
0x21dd   :  { %v3967_v8 = vmul.f32 0.3275911, %v3959_v62  ;;  %v3960_v52 = vand.u32 2147483647, %v6622_v19  ;;  %v3921_v31 = vpop.f32.mrf.mxu0  ;;  %v4084_v7 = vmul.f32 1.442695, %v4076_v34  ;;  %v4078_v50 = vmul.f32 %v4070_v32, %v3958_v29 }
0x21de   :  { %5350 = vrcp.f32 %v3974_v45  ;;  %v3961_v57 = vand.u32 2147483647, %v6625_v48  ;;  %v6632_v44 = vmul.f32 0.70710677, %v6628_v39  ;;  %v6634_v41 = vadd.f32 %v3921_v31, %v3822_v60 }
0x21df   :  { %v3975_v17 = vadd.f32 1.0, %v3967_v8  ;;  %v3968_v61 = vmul.f32 0.3275911, %v3960_v52  ;;  %v4071_v2 = vsub.f32 0.0, %v3959_v62  ;;  %v4086_v12 = vmul.f32 1.442695, %v4077_v47 }
0x21e0   :  { %v3969_v6 = vmul.f32 0.3275911, %v3961_v57  ;;  %v3962_v63 = vand.u32 2147483647, %v6632_v44  ;;  %v6638_v5 = vmul.f32 0.70710677, %v6634_v41 }
0x21e1   :  { %5352 = vrcp.f32 %v3975_v17  ;;  %v3976_v1 = vadd.f32 1.0, %v3968_v61  ;;  %v4072_v60 = vsub.f32 0.0, %v3960_v52  ;;  %v4088_v58 = vmul.f32 1.442695, %v4078_v50 }
0x21e2   :  { %v3977_v9 = vadd.f32 1.0, %v3969_v6  ;;  %v3970_v11 = vmul.f32 0.3275911, %v3962_v63  ;;  %v6645_v16 = vand.u32 2147483647, %v6638_v5  ;;  %v4079_v56 = vmul.f32 %v4071_v2, %v3959_v62 }
0x21e3   :  { %5354 = vrcp.f32 %v3976_v1  ;;  %v4073_v26 = vsub.f32 0.0, %v3961_v57  ;;  %v6659_v54 = vsel %vm3940_vm11, 1.0, %v5418_v4  ;;  %v4080_v24 = vmul.f32 %v4072_v60, %v3960_v52 }
0x21e4   :  { %5356 = vrcp.f32 %v3977_v9  ;;  %v3978_v40 = vadd.f32 1.0, %v3970_v11  ;;  %v3971_v25 = vmul.f32 0.3275911, %v6645_v16  ;;  %v4074_v62 = vsub.f32 0.0, %v3962_v63 }
0x21e5   :  { %5358 = vpow2.f32 %v4084_v7  ;;  %v6668_v17 = vsel %vm3941_vm12, 1.0, %v5418_v4  ;;  %v4090_v14 = vmul.f32 1.442695, %v4079_v56  ;;  %v4081_v34 = vmul.f32 %v4073_v26, %v3961_v57 }
0x21e6   :  { %5360 = vrcp.f32 %v3978_v40  ;;  %v3979_v29 = vadd.f32 1.0, %v3971_v25  ;;  %v4092_v47 = vmul.f32 1.442695, %v4080_v24  ;;  %v4082_v7 = vmul.f32 %v4074_v62, %v3962_v63 }
0x21e7   :  { %v6640_v27 = vpop.eup %5346  ;;  %5362 = vpow2.f32 %v4086_v12  ;;  %v4075_v50 = vsub.f32 0.0, %v6645_v16  ;;  %v4094_v12 = vmul.f32 1.442695, %v4081_v34  ;;  %v3950_v36 = vsel %vm3942_vm13, 1.0, %v5418_v4 }
0x21e8   :  { %v3996_v10 = vmul.f32 1.0614054, %v6640_v27  ;;  %5364 = vrcp.f32 %v3979_v29  ;;  %vm3943_vm14 = vcmp.ge.f32.partialorder %v6614_v30, 0.0  ;;  %vm3944_vm15 = vcmp.ge.f32.partialorder %v6622_v19, 0.0 }
0x21e9   :  { %v6647_v15 = vpop.eup %5348  ;;  %5366 = vpow2.f32 %v4088_v58  ;;  %v4083_v26 = vmul.f32 %v4075_v50, %v6645_v16  ;;  %vm3945_vm1 = vcmp.ge.f32.partialorder %v6625_v48, 0.0  ;;  %vm3946_vm2 = vcmp.ge.f32.partialorder %v6632_v44, 0.0 }
0x21ea   :  { %v4004_v51 = vadd.f32 -1.4531521, %v3996_v10  ;;  %v3997_v20 = vmul.f32 1.0614054, %v6647_v15  ;;  %5368 = vpow2.f32 %v4090_v14  ;;  %v3954_v44 = vsel %vm3946_vm2, 1.0, %v5418_v4 }
0x21eb   :  { %v6652_v28 = vpop.eup %5350  ;;  %5370 = vpow2.f32 %v4092_v47  ;;  %v4098_v47 = vmul.f32 1.442695, %v4083_v26  ;;  %vm3947_vm3 = vcmp.ge.f32.partialorder %v6638_v5, 0.0  ;;  %v3928_v5 = vmul.f32 0.5, %v6617_v0 }
0x21ec   :  { %v4012_v49 = vmul.f32 %v6640_v27, %v4004_v51  ;;  %v4005_v35 = vadd.f32 -1.4531521, %v3997_v20  ;;  %v3998_v53 = vmul.f32 1.0614054, %v6652_v28  ;;  %5372 = vpow2.f32 %v4094_v12 }
0x21ee   :  { %v4020_v38 = vadd.f32 1.4214138, %v4012_v49  ;;  %v6661_v45 = vpop.eup %5352  ;;  %v4013_v37 = vmul.f32 %v6647_v15, %v4005_v35  ;;  %v4006_v8 = vadd.f32 -1.4531521, %v3998_v53  ;;  %v4096_v49 = vmul.f32 1.442695, %v4082_v7 }
0x21ef   :  { %v3999_v43 = vmul.f32 1.0614054, %v6661_v45 }
0x21f0   :  { %v4028_v46 = vmul.f32 %v6640_v27, %v4020_v38  ;;  %v4021_v31 = vadd.f32 1.4214138, %v4013_v37  ;;  %v4014_v52 = vmul.f32 %v6652_v28, %v4006_v8  ;;  %v6674_v18 = vpop.eup %5354  ;;  %5374 = vpow2.f32 %v4096_v49 }
0x21f1   :  { %v4007_v32 = vadd.f32 -1.4531521, %v3999_v43  ;;  %v4000_v11 = vmul.f32 1.0614054, %v6674_v18  ;;  %v6682_v63 = vpop.eup %5356  ;;  %5376 = vpow2.f32 %v4098_v47 }
0x21f2   :  { %v4036_v61 = vadd.f32 -0.28449672, %v4028_v46  ;;  %v4029_v1 = vmul.f32 %v6647_v15, %v4021_v31  ;;  %v4022_v6 = vadd.f32 1.4214138, %v4014_v52  ;;  %v5359_v58 = vpop.eup %5358  ;;  %v4001_v53 = vmul.f32 1.0614054, %v6682_v63 }
0x21f3   :  { %v4015_v10 = vmul.f32 %v6661_v45, %v4007_v32  ;;  %v4008_v25 = vadd.f32 -1.4531521, %v4000_v11  ;;  %v6689_v29 = vpop.eup %5360 }
0x21f4   :  { %v4044_v9 = vmul.f32 %v6640_v27, %v4036_v61  ;;  %v4037_v2 = vadd.f32 -0.28449672, %v4029_v1  ;;  %v4030_v57 = vmul.f32 %v6652_v28, %v4022_v6  ;;  %v4009_v46 = vadd.f32 -1.4531521, %v4001_v53 }
0x21f5   :  { %v4023_v60 = vadd.f32 1.4214138, %v4015_v10  ;;  %v4016_v37 = vmul.f32 %v6674_v18, %v4008_v25  ;;  %v4002_v43 = vmul.f32 1.0614054, %v6689_v29 }
0x21f6   :  { %v4052_v51 = vadd.f32 0.2548296, %v4044_v9  ;;  %v4045_v40 = vmul.f32 %v6647_v15, %v4037_v2  ;;  %v4038_v20 = vadd.f32 -0.28449672, %v4030_v57  ;;  %v4017_v61 = vmul.f32 %v6682_v63, %v4009_v46 }
0x21f7   :  { %v4031_v35 = vmul.f32 %v6661_v45, %v4023_v60  ;;  %v4024_v52 = vadd.f32 1.4214138, %v4016_v37  ;;  %v4010_v32 = vadd.f32 -1.4531521, %v4002_v43  ;;  %v3925_v46 = vmul.f32 0.5, %v6598_v22 }
0x21f8   :  { %v4060_v56 = vmul.f32 %v6640_v27, %v4052_v51  ;;  %v4053_v38 = vadd.f32 0.2548296, %v4045_v40  ;;  %v4046_v24 = vmul.f32 %v6652_v28, %v4038_v20  ;;  %v5363_v27 = vpop.eup %5362  ;;  %v4025_v2 = vadd.f32 1.4214138, %v4017_v61 }
0x21f9   :  { %v4039_v62 = vadd.f32 -0.28449672, %v4031_v35  ;;  %v6695_v16 = vpop.eup %5364  ;;  %v4032_v7 = vmul.f32 %v6674_v18, %v4024_v52  ;;  %v4018_v57 = vmul.f32 %v6689_v29, %v4010_v32 }
0x21fa   :  { %v4100_v8 = vmul.f32 %v5359_v58, %v4060_v56  ;;  %v4061_v14 = vmul.f32 %v6647_v15, %v4053_v38  ;;  %v4054_v31 = vadd.f32 0.2548296, %v4046_v24  ;;  %v4003_v9 = vmul.f32 1.0614054, %v6695_v16  ;;  %v5367_v10 = vpop.eup %5366 }
0x21fb   :  { %v4047_v34 = vmul.f32 %v6661_v45, %v4039_v62  ;;  %v4040_v51 = vadd.f32 -0.28449672, %v4032_v7  ;;  %v4026_v20 = vadd.f32 1.4214138, %v4018_v57  ;;  %v5369_v25 = vpop.eup %5368 }
0x21fc   :  { %v4101_v1 = vmul.f32 %v5363_v27, %v4061_v14  ;;  %v4062_v6 = vmul.f32 %v6652_v28, %v4054_v31  ;;  %v4108_v15 = vsub.f32 1.0, %v4100_v8  ;;  %v4011_v60 = vadd.f32 -1.4531521, %v4003_v9  ;;  %v5371_v24 = vpop.eup %5370 }
0x21fd   :  { %v4055_v50 = vadd.f32 0.2548296, %v4047_v34  ;;  %v4033_v28 = vmul.f32 %v6682_v63, %v4025_v2  ;;  %v4048_v58 = vmul.f32 %v6674_v18, %v4040_v51  ;;  %v4034_v38 = vmul.f32 %v6689_v29, %v4026_v20  ;;  %v5373_v61 = vpop.eup %5372 }
0x21fe   :  { %v4109_v11 = vsub.f32 1.0, %v4101_v1  ;;  %v4102_v12 = vmul.f32 %v5367_v10, %v4062_v6  ;;  %v4019_v56 = vmul.f32 %v6695_v16, %v4011_v60  ;;  %v4116_v37 = vmul.f32 %v4108_v15, %v6659_v54  ;;  %v5375_v9 = vpop.eup %5374 }
0x21ff   :  { %v4063_v40 = vmul.f32 %v6661_v45, %v4055_v50  ;;  %v4041_v26 = vadd.f32 -0.28449672, %v4033_v28  ;;  %v4056_v8 = vadd.f32 0.2548296, %v4048_v58  ;;  %v4042_v14 = vadd.f32 -0.28449672, %v4034_v38 }
0x2200   :  { %v4110_v49 = vsub.f32 1.0, %v4102_v12  ;;  %v4117_v35 = vmul.f32 %v4109_v11, %v6668_v17  ;;  %v4027_v62 = vadd.f32 1.4214138, %v4019_v56  ;;  %v3951_v17 = vsel %vm3943_vm14, 1.0, %v5418_v4 }
0x2201   :  { %v4103_v53 = vmul.f32 %v5369_v25, %v4063_v40  ;;  %v4049_v27 = vmul.f32 %v6682_v63, %v4041_v26  ;;  %v4064_v52 = vmul.f32 %v6674_v18, %v4056_v8  ;;  %v4050_v47 = vmul.f32 %v6689_v29, %v4042_v14 }
0x2202   :  { %v4118_v45 = vmul.f32 %v4110_v49, %v3950_v36  ;;  %v4035_v34 = vmul.f32 %v6695_v16, %v4027_v62  ;;  %v4125_v54 = vadd.f32 1.0, %v4117_v35  ;;  %v4124_v22 = vadd.f32 1.0, %v4116_v37  ;;  %v5377_v49 = vpop.eup %5376 }
0x2203   :  { %v4111_v43 = vsub.f32 1.0, %v4103_v53  ;;  %v4057_v32 = vadd.f32 0.2548296, %v4049_v27  ;;  %v3926_v1 = vmul.f32 0.5, %v6604_v23  ;;  %v3927_v6 = vmul.f32 0.5, %v6610_v21 }
0x2204   :  { %v4126_v31 = vadd.f32 1.0, %v4118_v45  ;;  %v4043_v7 = vadd.f32 -0.28449672, %v4035_v34  ;;  %v4104_v30 = vmul.f32 %v5371_v24, %v4064_v52  ;;  %v4058_v18 = vadd.f32 0.2548296, %v4050_v47 }
0x2205   :  { %v4119_v36 = vmul.f32 %v4111_v43, %v3951_v17  ;;  %v4065_v15 = vmul.f32 %v6682_v63, %v4057_v32  ;;  %v3924_v50 = vmul.f32 0.5, %v6593_v3  ;;  %v4133_v11 = vmul.f32 %v4125_v54, %v3925_v46 }
0x2206   :  { %v4134_v2 = vmul.f32 %v4126_v31, %v3926_v1  ;;  %v4051_v57 = vmul.f32 %v6695_v16, %v4043_v7  ;;  %v4066_v23 = vmul.f32 %v6689_v29, %v4058_v18  ;;  %v4112_v63 = vsub.f32 1.0, %v4104_v30 }
0x2207   :  { %v4127_v10 = vadd.f32 1.0, %v4119_v36  ;;  %v4105_v51 = vmul.f32 %v5373_v61, %v4065_v15  ;;  %v4132_v21 = vmul.f32 %v4124_v22, %v3924_v50  ;;  %v3952_v58 = vsel %vm3944_vm15, 1.0, %v5418_v4 }
0x2208   :  { %v4059_v60 = vadd.f32 0.2548296, %v4051_v57  ;;  %v4106_v28 = vmul.f32 %v5375_v9, %v4066_v23  ;;  %v3953_v29 = vsel %vm3945_vm1, 1.0, %v5418_v4  ;;  %v4120_v53 = vmul.f32 %v4112_v63, %v3952_v58 }
0x2209   :  { %v4135_v12 = vmul.f32 %v4127_v10, %v3927_v6  ;;  %v4113_v40 = vsub.f32 1.0, %v4105_v51  ;;  %v4140_v20 = vpack.c.bf16 %v4134_v2, %v4132_v21  ;;  %v3955_v24 = vsel %vm3947_vm3, 1.0, %v5418_v4 }
0x220a   :  { %v4067_v25 = vmul.f32 %v6695_v16, %v4059_v60  ;;  %v4114_v56 = vsub.f32 1.0, %v4106_v28  ;;  %v4128_v45 = vadd.f32 1.0, %v4120_v53  ;;  %v3930_v8 = vmul.f32 0.5, %v6628_v39  ;;  %v4629_v39 = vld [vmem:[%s6782_s14 + $0x1] ss:$0 sm:$0xff] }
0x220b   :  { %v4141_v3 = vpack.c.bf16 %v4135_v12, %v4133_v11  ;;  %v4121_v48 = vmul.f32 %v4113_v40, %v3953_v29  ;;  %v3929_v62 = vmul.f32 0.5, %v6619_v13  ;;  %v3931_v46 = vmul.f32 0.5, %v6634_v41 }
0x220c   :  { %v4107_v35 = vmul.f32 %v5377_v49, %v4067_v25  ;;  %v4122_v26 = vmul.f32 %v4114_v56, %v3954_v44  ;;  %v4136_v17 = vmul.f32 %v4128_v45, %v3928_v5 }
0x220d   :  { %4313 = vmatprep.mubr.bf16.mxu1 %v4141_v3  ;;  %v4129_v37 = vadd.f32 1.0, %v4121_v48 }
0x220e   :  { %4314 = vmatmul.mubr.bf16.vlgmr.msra.gmra.mxu1 %v4140_v20  ;;  %v4115_v38 = vsub.f32 1.0, %v4107_v35  ;;  %v4130_v16 = vadd.f32 1.0, %v4122_v26 }
0x220f   :  { %v4137_v14 = vmul.f32 %v4129_v37, %v3929_v62 }
0x2210   :  { %v4123_v19 = vmul.f32 %v4115_v38, %v3955_v24  ;;  %v4138_v27 = vmul.f32 %v4130_v16, %v3930_v8 }
0x2212   :  { %v4131_v43 = vadd.f32 1.0, %v4123_v19  ;;  %v4142_v34 = vpack.c.bf16 %v4138_v27, %v4136_v17 }
0x2214   :  { %v4139_v31 = vmul.f32 %v4131_v43, %v3931_v46  ;;  %v4646_v43 = vld [vmem:[%s6783_s15] ss:$0 sm:$0xff]  ;;  %s5419_s15 = smov [#allocation2]  }
0x2215   :  { %s4417_s0 = sshll.u32 %s5419_s15, 4  ;;  %s4418_s0 = int_to_ptr.vmem [resolvable:$true] %s4417_s0 }
0x2216   :  { %v4143_v52 = vpack.c.bf16 %v4139_v31, %v4137_v14  ;;  %v4647_v31 = vld [vmem:[%s6784_s16] ss:$0 sm:$0xff]  ;;  %s5386_s16 = scalar_lea.vmem %s4418_s0, 512  ;;  %p5391_p1 = scmp.lt.s32.totalorder %s4418_s0, %s4418_s0 }
0x2217   :  { %p5387_p0 = scmp.ne.s32.totalorder %s4418_s0, %s5386_s16  ;;  %p5392_p2 = scmp.lt.s32.totalorder %s5386_s16, %s5386_s16 }
0x2218   :  { %4321 = vmatprep.mubr.bf16.mxu1 %v4143_v52 }
0x2219   :  { %4322 = vmatmul.mubr.bf16.gmra.mxu1 %v4142_v34  ;;  %p5393_p3 = por %p5392_p2, %p5391_p1 }
0x221b   :  { %p5394_p4 = pnand %p5393_p3, %p5387_p0 }
0x22ce   :  { %v4780_v4 = vpop.f32.mrf.mxu1 }
0x22d0   :  { %v4781_v61 = vpop.f32.mrf.mxu1 }
0x22d1   :  { %v4782_v13 = vadd.f32 %v4781_v61, %v4780_v4 }
0x22d2   :  { %v4783_v54 = vpop.f32.mrf.mxu1 }
0x22d3   :  { %v4316_v41 = vadd.f32 %v4782_v13, %v4629_v39 }
0x22d4   :  { %v4784_v36 = vpop.f32.mrf.mxu1 }
0x22d5   :  { %v4785_v32 = vadd.f32 %v4784_v36, %v4783_v54  ;;  %v4330_v0 = vadd.f32 %v4316_v41, %v6479_v42 }
0x22d7   :  { %v4319_v47 = vadd.f32 %v4785_v32, %v4629_v39  ;;  %v4336_v22 = vsel %vm170_vm0, %v4330_v0, 0.0 }
0x22d8   :  { %4337 = vadd.xlane.f32.xlu0 %v4336_v22 }
0x22d9   :  { %v4331_v1 = vadd.f32 %v4319_v47, %v6489_v33  ;;  %v4786_v6 = vpop.f32.mrf.mxu1 }
0x22db   :  { %v4339_v7 = vsel %vm170_vm0, %v4331_v1, 0.0  ;;  %v4787_v9 = vpop.f32.mrf.mxu1 }
0x22dc   :  { %4340 = vadd.xlane.f32.xlu1 %v4339_v7  ;;  %v4788_v10 = vadd.f32 %v4787_v9, %v4786_v6 }
0x22dd   :  { %v4789_v30 = vpop.f32.mrf.mxu1 }
0x22de   :  { %v4324_v15 = vadd.f32 %v4788_v10, %v4629_v39 }
0x22df   :  { %v4790_v18 = vpop.f32.mrf.mxu1 }
0x22e0   :  { %v4791_v50 = vadd.f32 %v4790_v18, %v4789_v30  ;;  %v4332_v2 = vadd.f32 %v4324_v15, %v6491_v59 }
0x22e2   :  { %v4327_v57 = vadd.f32 %v4791_v50, %v4629_v39  ;;  %v4342_v42 = vsel %vm170_vm0, %v4332_v2, 0.0 }
0x22e3   :  { %4343 = vadd.xlane.f32.xlu0 %v4342_v42 }
0x22e4   :  { %v4333_v11 = vadd.f32 %v4327_v57, %v6484_v55 }
0x22e6   :  { %v4345_v33 = vsel %vm170_vm0, %v4333_v11, 0.0 }
0x22e7   :  { %4346 = vadd.xlane.f32.xlu1 %v4345_v33 }
0x2361   :  { %v4338_v12 = vpop.xlane.xlu0 %4337 }
0x2362   :  { %v4348_v51 = vmul.f32 0.015625, %v4338_v12 }
0x2364   :  { %v4352_v23 = vsub.f32 %v4330_v0, %v4348_v51 }
0x2365   :  { %v4341_v21 = vpop.xlane.xlu1 %4340 }
0x2366   :  { %v4349_v60 = vmul.f32 0.015625, %v4341_v21  ;;  %v4356_v63 = vmul.f32 %v4352_v23, %v4352_v23 }
0x2368   :  { %v4353_v40 = vsub.f32 %v4331_v1, %v4349_v60  ;;  %v4360_v28 = vsel %vm170_vm0, %v4356_v63, 0.0 }
0x2369   :  { %4361 = vadd.xlane.f32.xlu0 %v4360_v28 }
0x236a   :  { %v4357_v59 = vmul.f32 %v4353_v40, %v4353_v40 }
0x236c   :  { %v4363_v3 = vsel %vm170_vm0, %v4357_v59, 0.0  ;;  %v4344_v20 = vpop.xlane.xlu0 %4343 }
0x236d   :  { %4364 = vadd.xlane.f32.xlu1 %v4363_v3  ;;  %v4350_v25 = vmul.f32 0.015625, %v4344_v20 }
0x236f   :  { %v4354_v55 = vsub.f32 %v4332_v2, %v4350_v25 }
0x2370   :  { %v4347_v49 = vpop.xlane.xlu1 %4346 }
0x2371   :  { %v4351_v58 = vmul.f32 0.015625, %v4347_v49  ;;  %v4358_v29 = vmul.f32 %v4354_v55, %v4354_v55 }
0x2373   :  { %v4355_v56 = vsub.f32 %v4333_v11, %v4351_v58  ;;  %v4366_v48 = vsel %vm170_vm0, %v4358_v29, 0.0 }
0x2374   :  { %4367 = vadd.xlane.f32.xlu0 %v4366_v48 }
0x2375   :  { %v4359_v44 = vmul.f32 %v4355_v56, %v4355_v56 }
0x2377   :  { %v4369_v35 = vsel %vm170_vm0, %v4359_v44, 0.0 }
0x2378   :  { %4370 = vadd.xlane.f32.xlu1 %v4369_v35 }
0x23f2   :  { %v4362_v53 = vpop.xlane.xlu0 %4361 }
0x23f3   :  { %v4372_v26 = vmul.f32 0.015625, %v4362_v53 }
0x23f5   :  { %v4376_v38 = vadd.f32 1e-05, %v4372_v26 }
0x23f6   :  { %v4365_v16 = vpop.xlane.xlu1 %4364 }
0x23f7   :  { %5378 = vrsqrt.f32 %v4376_v38  ;;  %v4373_v24 = vmul.f32 0.015625, %v4365_v16 }
0x23f9   :  { %v4377_v37 = vadd.f32 1e-05, %v4373_v24 }
0x23fb   :  { %5380 = vrsqrt.f32 %v4377_v37 }
0x23fd   :  { %v4368_v19 = vpop.xlane.xlu0 %4367 }
0x23fe   :  { %v4374_v45 = vmul.f32 0.015625, %v4368_v19 }
0x2400   :  { %v4378_v8 = vadd.f32 1e-05, %v4374_v45 }
0x2401   :  { %v4371_v62 = vpop.xlane.xlu1 %4370 }
0x2402   :  { %5382 = vrsqrt.f32 %v4378_v8  ;;  %v4375_v5 = vmul.f32 0.015625, %v4371_v62 }
0x2404   :  { %v5379_v46 = vpop.eup %5378  ;;  %v4379_v14 = vadd.f32 1e-05, %v4375_v5 }
0x2405   :  { %v4384_v27 = vmul.f32 %v5379_v46, %v4352_v23 }
0x2406   :  { %5384 = vrsqrt.f32 %v4379_v14 }
0x2407   :  { %v4394_v17 = vmul.f32 %v4646_v43, %v4384_v27 }
0x2408   :  { %v5381_v52 = vpop.eup %5380 }
0x2409   :  { %v4385_v34 = vmul.f32 %v5381_v52, %v4353_v40  ;;  %v4404_v4 = vadd.f32 %v4647_v31, %v4394_v17 }
0x240b   :  { %v4395_v39 = vmul.f32 %v4646_v43, %v4385_v34  ;;  %4408 = vst.msk [vmem:[#allocation2] sm:$0xff] %vm170_vm0, %v4404_v4 }
0x240d   :  { %v4405_v61 = vadd.f32 %v4647_v31, %v4395_v39 }
0x240f   :  { %4409 = vst.msk [vmem:[#allocation2 + $0x8] sm:$0xff] %vm170_vm0, %v4405_v61  ;;  %v5383_v13 = vpop.eup %5382 }
0x2410   :  { %v4386_v54 = vmul.f32 %v5383_v13, %v4354_v55 }
0x2412   :  { %v4396_v41 = vmul.f32 %v4646_v43, %v4386_v54 }
0x2413   :  { %v5385_v36 = vpop.eup %5384 }
0x2414   :  { %v4387_v32 = vmul.f32 %v5385_v36, %v4355_v56  ;;  %v4406_v0 = vadd.f32 %v4647_v31, %v4396_v41 }
0x2416   :  { %v4397_v47 = vmul.f32 %v4646_v43, %v4387_v32  ;;  %4410 = vst.msk [vmem:[#allocation2 + $0x10] sm:$0xff] %vm170_vm0, %v4406_v0 }
0x2418   :  { %v4407_v22 = vadd.f32 %v4647_v31, %v4397_v47 }
0x241a   :  { %4411 = vst.msk [vmem:[#allocation2 + $0x18] sm:$0xff] %vm170_vm0, %v4407_v22 }
0x241b   :  { %5397 = shalt.err (!%p5394_p4)
}
0x241c   :  { %s5420_s30 = smov 128   ;;  %s5421_s3 = smov 8  }
0x241d   :  { %4423 = dma.vmem_to_hbm [thread:$0]  %s4418_s0, 512, %s6785_s17, [#allocation3], %s5420_s30, %s5420_s30, %s5421_s3  }
0x241e   :  { %5406 = dma.done.wait [#allocation3], 512  }
0x241f   :  { %5407 = vsyncadd [#allocation3], 4294966784 }
0x2420   :  { %4427 = vsyncpa [#allocation3], 1 }

</bundles_post_ra>
